<compile_context>
chip_gen: v7x
topology: tpu7x:2x2x1
jax: 0.10.0
libtpu: 0.0.40
codegen_flags: <defaults>
</compile_context>

<pallas_src>
import jax
import jax.numpy as jnp
from jax import lax
from jax.experimental import pallas as pl
from jax.experimental.pallas import tpu as pltpu

H = 24          # LSTM hidden size / d_model
GS = 32         # per-gate lane stride inside the single 128-lane gate block
G = 4 * GS      # padded gate width per direction (= 128, one MXU/vreg lane block)
FF = 2048       # TransformerEncoderLayer default dim_feedforward
NCLS = 2        # final Linear(24, 2)
LN_EPS = 1e-5
NEG_INF = -1e30
GATE_PERM = (0, 1, 3, 2)   # pack order (i, f, o, g); torch row order is (i, f, g, o)


# ----------------------------------------------------------------------------
# Fused kernel: 2-layer bidirectional LSTM + transformer head + fc1/ReLU/fc2
# ----------------------------------------------------------------------------
def _make_kernel(B, T):

    def _cell(pre, h, c, whh):
        # pre: (B, G) precomputed x @ W_ih + (b_ih + b_hh);  h, c: (B, H);  whh: (H, G)
        g = pre + jnp.dot(h, whh, preferred_element_type=jnp.float32)   # one MXU tile
        sg = jax.nn.sigmoid(g)            # one EUP pass covers i, f, o (lanes 0..95)
        th = jnp.tanh(g)                  # one EUP pass covers g      (lanes 96..119)
        i = sg[:, 0 * GS:0 * GS + H]
        f = sg[:, 1 * GS:1 * GS + H]
        o = sg[:, 2 * GS:2 * GS + H]
        gg = th[:, 3 * GS:3 * GS + H]
        c_new = f * c + i * gg
        h_new = o * jnp.tanh(c_new)
        return h_new, c_new

    def kernel(x_ref,
               wih0f_ref, whh0f_ref, b0f_ref,
               wih0b_ref, whh0b_ref, b0b_ref,
               wih1ft_ref, wih1fb_ref, whh1f_ref, b1f_ref,
               wih1bt_ref, wih1bb_ref, whh1b_ref, b1b_ref,
               wq_ref, bq_ref, wk_ref, bk_ref, wv_ref, bv_ref, wo_ref, bo_ref,
               ln1g_ref, ln1b_ref, w1_hbm, b1_ref, w2_hbm, b2_ref,
               ln2g_ref, ln2b_ref, fw1_ref, fb1_ref, fw2_ref, fb2_ref,
               out_ref,
               w1_vmem, w2_vmem, dma_sem):
        # ---- start the large FF-weight DMAs; they overlap the whole LSTM chain ----
        cp1 = pltpu.make_async_copy(w1_hbm, w1_vmem, dma_sem.at[0])
        cp2 = pltpu.make_async_copy(w2_hbm, w2_vmem, dma_sem.at[1])
        cp1.start()
        cp2.start()

        x = x_ref[...]                                       # (T*B, H), time-major rows

        # ---- hoisted layer-0 input projections (off the serial path), kept in vregs ----
        pre0f = jnp.dot(x, wih0f_ref[...], preferred_element_type=jnp.float32) + b0f_ref[...]
        pre0b = jnp.dot(x, wih0b_ref[...], preferred_element_type=jnp.float32) + b0b_ref[...]

        zero = jnp.zeros((B, H), jnp.float32)
        whh0f, whh0b = whh0f_ref[...], whh0b_ref[...]

        # ---- layer 0: fwd + bwd recurrences interleaved, fully unrolled ----
        hf, cf, hb, cb = zero, zero, zero, zero
        outs_f = [None] * T
        outs_b = [None] * T
        for s in range(T):
            rf = s * B                 # rows of time step s (forward)
            rb = (T - 1 - s) * B       # rows of time step T-1-s (backward)
            hf, cf = _cell(pre0f[rf:rf + B, :], hf, cf, whh0f)
            hb, cb = _cell(pre0b[rb:rb + B, :], hb, cb, whh0b)
            outs_f[s] = hf
            outs_b[T - 1 - s] = hb
        hn0f, hn0b = hf, hb
        o0f = jnp.concatenate(outs_f, axis=0)                # (T*B, H), stays in vregs
        o0b = jnp.concatenate(outs_b, axis=0)

        # ---- hoisted layer-1 input projections (input = [l0 fwd out | l0 bwd out]) ----
        pre1f = (jnp.dot(o0f, wih1ft_ref[...], preferred_element_type=jnp.float32)
                 + jnp.dot(o0b, wih1fb_ref[...], preferred_element_type=jnp.float32)
                 + b1f_ref[...])
        pre1b = (jnp.dot(o0f, wih1bt_ref[...], preferred_element_type=jnp.float32)
                 + jnp.dot(o0b, wih1bb_ref[...], preferred_element_type=jnp.float32)
                 + b1b_ref[...])

        # ---- layer 1: fwd + bwd recurrences interleaved, fully unrolled ----
        whh1f, whh1b = whh1f_ref[...], whh1b_ref[...]
        hf, cf, hb, cb = zero, zero, zero, zero
        for s in range(T):
            rf = s * B
            rb = (T - 1 - s) * B
            hf, cf = _cell(pre1f[rf:rf + B, :], hf, cf, whh1f)
            hb, cb = _cell(pre1b[rb:rb + B, :], hb, cb, whh1b)
        hn1f, hn1b = hf, hb

        # h_n flattened (4, B, H) -> (4*B, H), order: l0_fwd, l0_bwd, l1_fwd, l1_bwd
        hn = jnp.concatenate([hn0f, hn0b, hn1f, hn1b], axis=0)

        # ---- cross-batch attention mask built in-kernel (no input / DMA needed) ----
        # row r and column c belong to the same batch element iff (r - c) % B == 0.
        S4 = 4 * B
        d = (lax.broadcasted_iota(jnp.int32, (S4, S4), 0)
             - lax.broadcasted_iota(jnp.int32, (S4, S4), 1))
        same = (d == 0)
        for m in range(1, 4):
            same = jnp.logical_or(same, jnp.logical_or(d == m * B, d == -m * B))
        amask = jnp.where(same, 0.0, NEG_INF).astype(jnp.float32)

        # ---- TransformerEncoderLayer (post-norm, 1 head) on the 4 hidden states ----
        q = jnp.dot(hn, wq_ref[...], preferred_element_type=jnp.float32) + bq_ref[...]
        k = jnp.dot(hn, wk_ref[...], preferred_element_type=jnp.float32) + bk_ref[...]
        v = jnp.dot(hn, wv_ref[...], preferred_element_type=jnp.float32) + bv_ref[...]
        scores = lax.dot_general(q, k, (((1,), (1,)), ((), ())),
                                 preferred_element_type=jnp.float32)
        scores = scores * (1.0 / float(H) ** 0.5) + amask
        p = jax.nn.softmax(scores, axis=-1)
        attn = jnp.dot(p, v, preferred_element_type=jnp.float32)
        attn = jnp.dot(attn, wo_ref[...], preferred_element_type=jnp.float32) + bo_ref[...]

        y = hn + attn
        mu = jnp.mean(y, axis=-1, keepdims=True)
        var = jnp.mean((y - mu) ** 2, axis=-1, keepdims=True)
        y = (y - mu) * lax.rsqrt(var + LN_EPS) * ln1g_ref[...] + ln1b_ref[...]

        # only the last "sequence" element survives (out[-1]); FF / LN2 / fcs are per-position
        z = y[(4 - 1) * B:, :]                               # (B, H)

        # FF weights must be resident now (DMA has had the whole recurrence to finish)
        cp1.wait()
        cp2.wait()
        ff = jnp.maximum(jnp.dot(z, w1_vmem[...], preferred_element_type=jnp.float32)
                         + b1_ref[...], 0.0)
        ff = jnp.dot(ff, w2_vmem[...], preferred_element_type=jnp.float32) + b2_ref[...]
        z = z + ff
        mu = jnp.mean(z, axis=-1, keepdims=True)
        var = jnp.mean((z - mu) ** 2, axis=-1, keepdims=True)
        z = (z - mu) * lax.rsqrt(var + LN_EPS) * ln2g_ref[...] + ln2b_ref[...]

        o = jnp.maximum(jnp.dot(z, fw1_ref[...], preferred_element_type=jnp.float32)
                        + fb1_ref[...], 0.0)
        out_ref[...] = (jnp.dot(o, fw2_ref[...], preferred_element_type=jnp.float32)
                        + fb2_ref[...])

    return kernel


# ----------------------------------------------------------------------------
# Wrapper (jitted): layout plumbing in plain JAX + one fused pallas_call
# ----------------------------------------------------------------------------
@jax.jit
def bilstm_forward(x_btd, params):
    """x_btd: (B, T, 24) batch_first input; params: packed tuple (see __main__)."""
    B, T, _ = x_btd.shape
    TB = T * B
    # time-major flattening for the hoisted input projections (trivial, inside the jit)
    x2d = jnp.transpose(x_btd, (1, 0, 2)).reshape(TB, H).astype(jnp.float32)

    kernel = _make_kernel(B, T)

    # All weights live in VMEM except the two big FF matrices, which stay in HBM
    # (pl.ANY) and are DMA'd inside the kernel, overlapped with the recurrence.
    in_specs = [pl.BlockSpec(memory_space=pltpu.MemorySpace.VMEM)]
    for p in params:
        if p.shape in ((H, FF), (FF, H)):
            in_specs.append(pl.BlockSpec(memory_space=pl.ANY))
        else:
            in_specs.append(pl.BlockSpec(memory_space=pltpu.MemorySpace.VMEM))

    return pl.pallas_call(
        kernel,
        out_shape=jax.ShapeDtypeStruct((B, NCLS), jnp.float32),
        in_specs=in_specs,
        out_specs=pl.BlockSpec(memory_space=pltpu.MemorySpace.VMEM),
        scratch_shapes=[
            pltpu.VMEM((H, FF), jnp.float32),      # fc1 (w1) landing buffer
            pltpu.VMEM((FF, H), jnp.float32),      # fc2 (w2) landing buffer
            pltpu.SemaphoreType.DMA((2,)),         # DMA completion sems for w1/w2
        ],
    )(x2d, *params)


# ----------------------------------------------------------------------------
# Weight packing: PyTorch layout -> lane-aligned kernel layout
# ----------------------------------------------------------------------------
def _pad_gate_cols(w_t):
    """(in_dim, 4H) -> (in_dim, G=128): gate slot s (order i,f,o,g) at lanes [s*32, s*32+H)."""
    in_dim = w_t.shape[0]
    out = jnp.zeros((in_dim, G), jnp.float32)
    for s, k in enumerate(GATE_PERM):
        out = out.at[:, s * GS:s * GS + H].set(w_t[:, k * H:(k + 1) * H])
    return out


def _pad_gate_bias(b):
    """(4H,) -> (1, G) with the same lane-aligned gate layout."""
    out = jnp.zeros((1, G), jnp.float32)
    for s, k in enumerate(GATE_PERM):
        out = out.at[0, s * GS:s * GS + H].set(b[k * H:(k + 1) * H])
    return out


def pack_l0(p):
    w_ih, w_hh, b_ih, b_hh = p
    return (_pad_gate_cols(w_ih.T), _pad_gate_cols(w_hh.T), _pad_gate_bias(b_ih + b_hh))


def pack_l1(p):
    w_ih, w_hh, b_ih, b_hh = p
    wih = _pad_gate_cols(w_ih.T)            # (2H, G)
    # split rows: [:H] applies to layer-0 fwd outputs, [H:] to layer-0 bwd outputs
    return (wih[:H], wih[H:], _pad_gate_cols(w_hh.T), _pad_gate_bias(b_ih + b_hh))


# ----------------------------------------------------------------------------
# Pure-JAX reference (PyTorch-layout weights) for verification
# ----------------------------------------------------------------------------
def ref_forward(x_btd, lstm_raw, head_raw):
    def cell(x_t, h, c, w_ih, w_hh, b_ih, b_hh):
        g = x_t @ w_ih.T + b_ih + h @ w_hh.T + b_hh
        i, f, gg, o = jnp.split(g, 4, axis=-1)
        i, f, o = jax.nn.sigmoid(i), jax.nn.sigmoid(f), jax.nn.sigmoid(o)
        gg = jnp.tanh(gg)
        c = f * c + i * gg
        return o * jnp.tanh(c), c

    def run_dir(xs, params, reverse):
        B = xs.shape[1]
        h = jnp.zeros((B, H)); c = jnp.zeros((B, H))
        ts = list(range(xs.shape[0]))
        if reverse:
            ts = ts[::-1]
        outs = [None] * xs.shape[0]
        for t in ts:
            h, c = cell(xs[t], h, c, *params)
            outs[t] = h
        return jnp.stack(outs, 0), h

    x_tbd = jnp.transpose(x_btd, (1, 0, 2))
    of, hf0 = run_dir(x_tbd, lstm_raw[0], False)
    ob, hb0 = run_dir(x_tbd, lstm_raw[1], True)
    x1 = jnp.concatenate([of, ob], axis=-1)
    _, hf1 = run_dir(x1, lstm_raw[2], False)
    _, hb1 = run_dir(x1, lstm_raw[3], True)
    hn = jnp.stack([hf0, hb0, hf1, hb1], 0)            # (4, B, H)

    (wq, bq, wk, bk, wv, bv, wo, bo, ln1g, ln1b,
     w1, b1, w2, b2, ln2g, ln2b, fw1, fb1, fw2, fb2) = head_raw
    x = hn                                             # (S, B, D), seq-first
    q = x @ wq.T + bq; k = x @ wk.T + bk; v = x @ wv.T + bv
    scores = jnp.einsum('sbd,tbd->bst', q, k) / jnp.sqrt(jnp.float32(H))
    a = jax.nn.softmax(scores, -1)
    attn = jnp.einsum('bst,tbd->sbd', a, v) @ wo.T + bo

    def ln(u, g, b):
        mu = u.mean(-1, keepdims=True)
        var = ((u - mu) ** 2).mean(-1, keepdims=True)
        return (u - mu) / jnp.sqrt(var + LN_EPS) * g + b

    y = ln(x + attn, ln1g, ln1b)
    ff = jnp.maximum(y @ w1.T + b1, 0.0) @ w2.T + b2
    y = ln(y + ff, ln2g, ln2b)
    z = y[-1]                                          # out[-1, :, :]
    z = jnp.maximum(z @ fw1.T + fb1, 0.0)
    return z @ fw2.T + fb2


# ----------------------------------------------------------------------------
if __name__ == "__main__":
    B, T = 2, 8
    key = jax.random.PRNGKey(0)
    keys = iter(jax.random.split(key, 64))

    def nrm(shape, scale=0.1):
        return scale * jax.random.normal(next(keys), shape, jnp.float32)

    # ---- deterministic LSTM params (PyTorch layout) ----
    def lstm_dir(in_dim):
        return (nrm((4 * H, in_dim)), nrm((4 * H, H)), nrm((4 * H,)), nrm((4 * H,)))

    l0f, l0b = lstm_dir(H), lstm_dir(H)
    l1f, l1b = lstm_dir(2 * H), lstm_dir(2 * H)
    lstm_raw = (l0f, l0b, l1f, l1b)

    lstm_params = pack_l0(l0f) + pack_l0(l0b) + pack_l1(l1f) + pack_l1(l1b)

    # ---- deterministic TransformerEncoderLayer + fc params (PyTorch layout) ----
    in_proj_w = nrm((3 * H, H)); in_proj_b = nrm((3 * H,))
    wq, wk, wv = in_proj_w[:H], in_proj_w[H:2 * H], in_proj_w[2 * H:]
    bq, bk, bv = in_proj_b[:H], in_proj_b[H:2 * H], in_proj_b[2 * H:]
    wo = nrm((H, H)); bo = nrm((H,))
    ln1g = 1.0 + nrm((H,)); ln1b = nrm((H,))
    w1 = nrm((FF, H)); b1 = nrm((FF,))
    w2 = nrm((H, FF)); b2 = nrm((H,))
    ln2g = 1.0 + nrm((H,)); ln2b = nrm((H,))
    fw1 = nrm((H, H)); fb1 = nrm((H,))
    fw2 = nrm((NCLS, H)); fb2 = nrm((NCLS,))

    head_raw = (wq, bq, wk, bk, wv, bv, wo, bo, ln1g, ln1b,
                w1, b1, w2, b2, ln2g, ln2b, fw1, fb1, fw2, fb2)

    head_params = (wq.T, bq[None], wk.T, bk[None], wv.T, bv[None],
                   wo.T, bo[None],
                   ln1g[None], ln1b[None],
                   w1.T, b1[None], w2.T, b2[None],
                   ln2g[None], ln2b[None],
                   fw1.T, fb1[None], fw2.T, fb2[None])

    params = tuple(lstm_params) + tuple(head_params)

    # ---- input x: (B, T, 24) like the PyTorch batch_first LSTM input ----
    x = jax.random.normal(next(keys), (B, T, H), jnp.float32)

    out = jax.block_until_ready(bilstm_forward(x, params))
    ref = jax.block_until_ready(ref_forward(x, lstm_raw, head_raw))

    assert out.shape == (B, NCLS), out.shape
    assert jnp.allclose(out, ref, rtol=1e-3, atol=1e-3), (out, ref)
    print("KERNEL_OK")
</pallas_src>

<mosaic_0001>
module attributes {stable_mosaic.version = 11 : i64} {
  func.func @kernel(%arg0: memref<16x24xf32, #tpu.memory_space<vmem>>, %arg1: memref<24x128xf32, #tpu.memory_space<vmem>>, %arg2: memref<24x128xf32, #tpu.memory_space<vmem>>, %arg3: memref<1x128xf32, #tpu.memory_space<vmem>>, %arg4: memref<24x128xf32, #tpu.memory_space<vmem>>, %arg5: memref<24x128xf32, #tpu.memory_space<vmem>>, %arg6: memref<1x128xf32, #tpu.memory_space<vmem>>, %arg7: memref<24x128xf32, #tpu.memory_space<vmem>>, %arg8: memref<24x128xf32, #tpu.memory_space<vmem>>, %arg9: memref<24x128xf32, #tpu.memory_space<vmem>>, %arg10: memref<1x128xf32, #tpu.memory_space<vmem>>, %arg11: memref<24x128xf32, #tpu.memory_space<vmem>>, %arg12: memref<24x128xf32, #tpu.memory_space<vmem>>, %arg13: memref<24x128xf32, #tpu.memory_space<vmem>>, %arg14: memref<1x128xf32, #tpu.memory_space<vmem>>, %arg15: memref<24x24xf32, #tpu.memory_space<vmem>>, %arg16: memref<1x24xf32, #tpu.memory_space<vmem>>, %arg17: memref<24x24xf32, #tpu.memory_space<vmem>>, %arg18: memref<1x24xf32, #tpu.memory_space<vmem>>, %arg19: memref<24x24xf32, #tpu.memory_space<vmem>>, %arg20: memref<1x24xf32, #tpu.memory_space<vmem>>, %arg21: memref<24x24xf32, #tpu.memory_space<vmem>>, %arg22: memref<1x24xf32, #tpu.memory_space<vmem>>, %arg23: memref<1x24xf32, #tpu.memory_space<vmem>>, %arg24: memref<1x24xf32, #tpu.memory_space<vmem>>, %arg25: memref<24x2048xf32, #tpu.memory_space<any>>, %arg26: memref<1x2048xf32, #tpu.memory_space<vmem>>, %arg27: memref<2048x24xf32, #tpu.memory_space<any>>, %arg28: memref<1x24xf32, #tpu.memory_space<vmem>>, %arg29: memref<1x24xf32, #tpu.memory_space<vmem>>, %arg30: memref<1x24xf32, #tpu.memory_space<vmem>>, %arg31: memref<24x24xf32, #tpu.memory_space<vmem>>, %arg32: memref<1x24xf32, #tpu.memory_space<vmem>>, %arg33: memref<24x2xf32, #tpu.memory_space<vmem>>, %arg34: memref<1x2xf32, #tpu.memory_space<vmem>>, %arg35: memref<2x2xf32, #tpu.memory_space<vmem>>, %arg36: memref<24x2048xf32, #tpu.memory_space<vmem>>, %arg37: memref<2048x24xf32, #tpu.memory_space<vmem>>, %arg38: memref<2x!tpu.dma_semaphore, #tpu.memory_space<semaphore_mem>>) attributes {dimension_semantics = [], scalar_prefetch = 0 : i64, scratch_operands = 3 : i64, tpu.core_type = #tpu.core_type<tc>} {
    %c0_i32 = arith.constant 0 : i32
    %0 = tpu.memref_slice %arg38[%c0_i32] : memref<2x!tpu.dma_semaphore, #tpu.memory_space<semaphore_mem>> -> memref<1x!tpu.dma_semaphore, #tpu.memory_space<semaphore_mem>>
    %1 = tpu.memref_squeeze %0 : memref<1x!tpu.dma_semaphore, #tpu.memory_space<semaphore_mem>> -> memref<!tpu.dma_semaphore, #tpu.memory_space<semaphore_mem>>
    tpu.enqueue_dma source(%arg25 : memref<24x2048xf32, #tpu.memory_space<any>>) target(%arg36 : memref<24x2048xf32, #tpu.memory_space<vmem>>) target_semaphore(%1 : memref<!tpu.dma_semaphore, #tpu.memory_space<semaphore_mem>>)
    %c1_i32 = arith.constant 1 : i32
    %2 = tpu.memref_slice %arg38[%c1_i32] : memref<2x!tpu.dma_semaphore, #tpu.memory_space<semaphore_mem>> -> memref<1x!tpu.dma_semaphore, #tpu.memory_space<semaphore_mem>>
    %3 = tpu.memref_squeeze %2 : memref<1x!tpu.dma_semaphore, #tpu.memory_space<semaphore_mem>> -> memref<!tpu.dma_semaphore, #tpu.memory_space<semaphore_mem>>
    tpu.enqueue_dma source(%arg27 : memref<2048x24xf32, #tpu.memory_space<any>>) target(%arg37 : memref<2048x24xf32, #tpu.memory_space<vmem>>) target_semaphore(%3 : memref<!tpu.dma_semaphore, #tpu.memory_space<semaphore_mem>>)
    %c0 = arith.constant 0 : index
    %c0_0 = arith.constant 0 : index
    %4 = vector.load %arg0[%c0, %c0_0] : memref<16x24xf32, #tpu.memory_space<vmem>>, vector<16x24xf32>
    %c0_1 = arith.constant 0 : index
    %c0_2 = arith.constant 0 : index
    %5 = vector.load %arg1[%c0_1, %c0_2] : memref<24x128xf32, #tpu.memory_space<vmem>>, vector<24x128xf32>
    %cst = arith.constant dense<0.000000e+00> : vector<16x128xf32>
    %6 = tpu.matmul %4, %5, %cst {dimension_numbers = #tpu.dot_dimension_numbers<[1], [0], [0], [1], [0, 0, 1, 1], [], []>} : vector<16x24xf32>, vector<24x128xf32>, vector<16x128xf32> -> vector<16x128xf32>
    %c0_3 = arith.constant 0 : index
    %c0_4 = arith.constant 0 : index
    %7 = vector.load %arg3[%c0_3, %c0_4] : memref<1x128xf32, #tpu.memory_space<vmem>>, vector<1x128xf32>
    %8 = vector.broadcast %7 : vector<1x128xf32> to vector<16x128xf32>
    %9 = arith.addf %6, %8 : vector<16x128xf32>
    %c0_5 = arith.constant 0 : index
    %c0_6 = arith.constant 0 : index
    %10 = vector.load %arg4[%c0_5, %c0_6] : memref<24x128xf32, #tpu.memory_space<vmem>>, vector<24x128xf32>
    %cst_7 = arith.constant dense<0.000000e+00> : vector<16x128xf32>
    %11 = tpu.matmul %4, %10, %cst_7 {dimension_numbers = #tpu.dot_dimension_numbers<[1], [0], [0], [1], [0, 0, 1, 1], [], []>} : vector<16x24xf32>, vector<24x128xf32>, vector<16x128xf32> -> vector<16x128xf32>
    %c0_8 = arith.constant 0 : index
    %c0_9 = arith.constant 0 : index
    %12 = vector.load %arg6[%c0_8, %c0_9] : memref<1x128xf32, #tpu.memory_space<vmem>>, vector<1x128xf32>
    %13 = vector.broadcast %12 : vector<1x128xf32> to vector<16x128xf32>
    %14 = arith.addf %11, %13 : vector<16x128xf32>
    %cst_10 = arith.constant 0.000000e+00 : f32
    %15 = vector.broadcast %cst_10 : f32 to vector<2x24xf32>
    %c0_11 = arith.constant 0 : index
    %c0_12 = arith.constant 0 : index
    %16 = vector.load %arg2[%c0_11, %c0_12] : memref<24x128xf32, #tpu.memory_space<vmem>>, vector<24x128xf32>
    %c0_13 = arith.constant 0 : index
    %c0_14 = arith.constant 0 : index
    %17 = vector.load %arg5[%c0_13, %c0_14] : memref<24x128xf32, #tpu.memory_space<vmem>>, vector<24x128xf32>
    %18 = vector.extract_strided_slice %9 {offsets = [0, 0], sizes = [2, 128], strides = [1, 1]} : vector<16x128xf32> to vector<2x128xf32>
    %cst_15 = arith.constant dense<0.000000e+00> : vector<2x128xf32>
    %19 = tpu.matmul %15, %16, %cst_15 {dimension_numbers = #tpu.dot_dimension_numbers<[1], [0], [0], [1], [0, 0, 1, 1], [], []>} : vector<2x24xf32>, vector<24x128xf32>, vector<2x128xf32> -> vector<2x128xf32>
    %20 = arith.addf %18, %19 : vector<2x128xf32>
    %21 = arith.negf %20 : vector<2x128xf32>
    %22 = math.exp %21 : vector<2x128xf32>
    %cst_16 = arith.constant 1.000000e+00 : f32
    %23 = vector.broadcast %cst_16 : f32 to vector<2x128xf32>
    %24 = arith.addf %23, %22 : vector<2x128xf32>
    %25 = arith.divf %23, %24 : vector<2x128xf32>
    %26 = math.tanh %20 : vector<2x128xf32>
    %27 = vector.extract_strided_slice %25 {offsets = [0, 0], sizes = [2, 24], strides = [1, 1]} : vector<2x128xf32> to vector<2x24xf32>
    %28 = vector.extract_strided_slice %25 {offsets = [0, 32], sizes = [2, 24], strides = [1, 1]} : vector<2x128xf32> to vector<2x24xf32>
    %29 = vector.extract_strided_slice %25 {offsets = [0, 64], sizes = [2, 24], strides = [1, 1]} : vector<2x128xf32> to vector<2x24xf32>
    %30 = vector.extract_strided_slice %26 {offsets = [0, 96], sizes = [2, 24], strides = [1, 1]} : vector<2x128xf32> to vector<2x24xf32>
    %31 = arith.mulf %28, %15 : vector<2x24xf32>
    %32 = arith.mulf %27, %30 : vector<2x24xf32>
    %33 = arith.addf %31, %32 : vector<2x24xf32>
    %34 = math.tanh %33 : vector<2x24xf32>
    %35 = arith.mulf %29, %34 : vector<2x24xf32>
    %36 = vector.extract_strided_slice %14 {offsets = [14, 0], sizes = [2, 128], strides = [1, 1]} : vector<16x128xf32> to vector<2x128xf32>
    %cst_17 = arith.constant dense<0.000000e+00> : vector<2x128xf32>
    %37 = tpu.matmul %15, %17, %cst_17 {dimension_numbers = #tpu.dot_dimension_numbers<[1], [0], [0], [1], [0, 0, 1, 1], [], []>} : vector<2x24xf32>, vector<24x128xf32>, vector<2x128xf32> -> vector<2x128xf32>
    %38 = arith.addf %36, %37 : vector<2x128xf32>
    %39 = arith.negf %38 : vector<2x128xf32>
    %40 = math.exp %39 : vector<2x128xf32>
    %cst_18 = arith.constant 1.000000e+00 : f32
    %41 = vector.broadcast %cst_18 : f32 to vector<2x128xf32>
    %42 = arith.addf %41, %40 : vector<2x128xf32>
    %43 = arith.divf %41, %42 : vector<2x128xf32>
    %44 = math.tanh %38 : vector<2x128xf32>
    %45 = vector.extract_strided_slice %43 {offsets = [0, 0], sizes = [2, 24], strides = [1, 1]} : vector<2x128xf32> to vector<2x24xf32>
    %46 = vector.extract_strided_slice %43 {offsets = [0, 32], sizes = [2, 24], strides = [1, 1]} : vector<2x128xf32> to vector<2x24xf32>
    %47 = vector.extract_strided_slice %43 {offsets = [0, 64], sizes = [2, 24], strides = [1, 1]} : vector<2x128xf32> to vector<2x24xf32>
    %48 = vector.extract_strided_slice %44 {offsets = [0, 96], sizes = [2, 24], strides = [1, 1]} : vector<2x128xf32> to vector<2x24xf32>
    %49 = arith.mulf %46, %15 : vector<2x24xf32>
    %50 = arith.mulf %45, %48 : vector<2x24xf32>
    %51 = arith.addf %49, %50 : vector<2x24xf32>
    %52 = math.tanh %51 : vector<2x24xf32>
    %53 = arith.mulf %47, %52 : vector<2x24xf32>
    %54 = vector.extract_strided_slice %9 {offsets = [2, 0], sizes = [2, 128], strides = [1, 1]} : vector<16x128xf32> to vector<2x128xf32>
    %cst_19 = arith.constant dense<0.000000e+00> : vector<2x128xf32>
    %55 = tpu.matmul %35, %16, %cst_19 {dimension_numbers = #tpu.dot_dimension_numbers<[1], [0], [0], [1], [0, 0, 1, 1], [], []>} : vector<2x24xf32>, vector<24x128xf32>, vector<2x128xf32> -> vector<2x128xf32>
    %56 = arith.addf %54, %55 : vector<2x128xf32>
    %57 = arith.negf %56 : vector<2x128xf32>
    %58 = math.exp %57 : vector<2x128xf32>
    %cst_20 = arith.constant 1.000000e+00 : f32
    %59 = vector.broadcast %cst_20 : f32 to vector<2x128xf32>
    %60 = arith.addf %59, %58 : vector<2x128xf32>
    %61 = arith.divf %59, %60 : vector<2x128xf32>
    %62 = math.tanh %56 : vector<2x128xf32>
    %63 = vector.extract_strided_slice %61 {offsets = [0, 0], sizes = [2, 24], strides = [1, 1]} : vector<2x128xf32> to vector<2x24xf32>
    %64 = vector.extract_strided_slice %61 {offsets = [0, 32], sizes = [2, 24], strides = [1, 1]} : vector<2x128xf32> to vector<2x24xf32>
    %65 = vector.extract_strided_slice %61 {offsets = [0, 64], sizes = [2, 24], strides = [1, 1]} : vector<2x128xf32> to vector<2x24xf32>
    %66 = vector.extract_strided_slice %62 {offsets = [0, 96], sizes = [2, 24], strides = [1, 1]} : vector<2x128xf32> to vector<2x24xf32>
    %67 = arith.mulf %64, %33 : vector<2x24xf32>
    %68 = arith.mulf %63, %66 : vector<2x24xf32>
    %69 = arith.addf %67, %68 : vector<2x24xf32>
    %70 = math.tanh %69 : vector<2x24xf32>
    %71 = arith.mulf %65, %70 : vector<2x24xf32>
    %72 = vector.extract_strided_slice %14 {offsets = [12, 0], sizes = [2, 128], strides = [1, 1]} : vector<16x128xf32> to vector<2x128xf32>
    %cst_21 = arith.constant dense<0.000000e+00> : vector<2x128xf32>
    %73 = tpu.matmul %53, %17, %cst_21 {dimension_numbers = #tpu.dot_dimension_numbers<[1], [0], [0], [1], [0, 0, 1, 1], [], []>} : vector<2x24xf32>, vector<24x128xf32>, vector<2x128xf32> -> vector<2x128xf32>
    %74 = arith.addf %72, %73 : vector<2x128xf32>
    %75 = arith.negf %74 : vector<2x128xf32>
    %76 = math.exp %75 : vector<2x128xf32>
    %cst_22 = arith.constant 1.000000e+00 : f32
    %77 = vector.broadcast %cst_22 : f32 to vector<2x128xf32>
    %78 = arith.addf %77, %76 : vector<2x128xf32>
    %79 = arith.divf %77, %78 : vector<2x128xf32>
    %80 = math.tanh %74 : vector<2x128xf32>
    %81 = vector.extract_strided_slice %79 {offsets = [0, 0], sizes = [2, 24], strides = [1, 1]} : vector<2x128xf32> to vector<2x24xf32>
    %82 = vector.extract_strided_slice %79 {offsets = [0, 32], sizes = [2, 24], strides = [1, 1]} : vector<2x128xf32> to vector<2x24xf32>
    %83 = vector.extract_strided_slice %79 {offsets = [0, 64], sizes = [2, 24], strides = [1, 1]} : vector<2x128xf32> to vector<2x24xf32>
    %84 = vector.extract_strided_slice %80 {offsets = [0, 96], sizes = [2, 24], strides = [1, 1]} : vector<2x128xf32> to vector<2x24xf32>
    %85 = arith.mulf %82, %51 : vector<2x24xf32>
    %86 = arith.mulf %81, %84 : vector<2x24xf32>
    %87 = arith.addf %85, %86 : vector<2x24xf32>
    %88 = math.tanh %87 : vector<2x24xf32>
    %89 = arith.mulf %83, %88 : vector<2x24xf32>
    %90 = vector.extract_strided_slice %9 {offsets = [4, 0], sizes = [2, 128], strides = [1, 1]} : vector<16x128xf32> to vector<2x128xf32>
    %cst_23 = arith.constant dense<0.000000e+00> : vector<2x128xf32>
    %91 = tpu.matmul %71, %16, %cst_23 {dimension_numbers = #tpu.dot_dimension_numbers<[1], [0], [0], [1], [0, 0, 1, 1], [], []>} : vector<2x24xf32>, vector<24x128xf32>, vector<2x128xf32> -> vector<2x128xf32>
    %92 = arith.addf %90, %91 : vector<2x128xf32>
    %93 = arith.negf %92 : vector<2x128xf32>
    %94 = math.exp %93 : vector<2x128xf32>
    %cst_24 = arith.constant 1.000000e+00 : f32
    %95 = vector.broadcast %cst_24 : f32 to vector<2x128xf32>
    %96 = arith.addf %95, %94 : vector<2x128xf32>
    %97 = arith.divf %95, %96 : vector<2x128xf32>
    %98 = math.tanh %92 : vector<2x128xf32>
    %99 = vector.extract_strided_slice %97 {offsets = [0, 0], sizes = [2, 24], strides = [1, 1]} : vector<2x128xf32> to vector<2x24xf32>
    %100 = vector.extract_strided_slice %97 {offsets = [0, 32], sizes = [2, 24], strides = [1, 1]} : vector<2x128xf32> to vector<2x24xf32>
    %101 = vector.extract_strided_slice %97 {offsets = [0, 64], sizes = [2, 24], strides = [1, 1]} : vector<2x128xf32> to vector<2x24xf32>
    %102 = vector.extract_strided_slice %98 {offsets = [0, 96], sizes = [2, 24], strides = [1, 1]} : vector<2x128xf32> to vector<2x24xf32>
    %103 = arith.mulf %100, %69 : vector<2x24xf32>
    %104 = arith.mulf %99, %102 : vector<2x24xf32>
    %105 = arith.addf %103, %104 : vector<2x24xf32>
    %106 = math.tanh %105 : vector<2x24xf32>
    %107 = arith.mulf %101, %106 : vector<2x24xf32>
    %108 = vector.extract_strided_slice %14 {offsets = [10, 0], sizes = [2, 128], strides = [1, 1]} : vector<16x128xf32> to vector<2x128xf32>
    %cst_25 = arith.constant dense<0.000000e+00> : vector<2x128xf32>
    %109 = tpu.matmul %89, %17, %cst_25 {dimension_numbers = #tpu.dot_dimension_numbers<[1], [0], [0], [1], [0, 0, 1, 1], [], []>} : vector<2x24xf32>, vector<24x128xf32>, vector<2x128xf32> -> vector<2x128xf32>
    %110 = arith.addf %108, %109 : vector<2x128xf32>
    %111 = arith.negf %110 : vector<2x128xf32>
    %112 = math.exp %111 : vector<2x128xf32>
    %cst_26 = arith.constant 1.000000e+00 : f32
    %113 = vector.broadcast %cst_26 : f32 to vector<2x128xf32>
    %114 = arith.addf %113, %112 : vector<2x128xf32>
    %115 = arith.divf %113, %114 : vector<2x128xf32>
    %116 = math.tanh %110 : vector<2x128xf32>
    %117 = vector.extract_strided_slice %115 {offsets = [0, 0], sizes = [2, 24], strides = [1, 1]} : vector<2x128xf32> to vector<2x24xf32>
    %118 = vector.extract_strided_slice %115 {offsets = [0, 32], sizes = [2, 24], strides = [1, 1]} : vector<2x128xf32> to vector<2x24xf32>
    %119 = vector.extract_strided_slice %115 {offsets = [0, 64], sizes = [2, 24], strides = [1, 1]} : vector<2x128xf32> to vector<2x24xf32>
    %120 = vector.extract_strided_slice %116 {offsets = [0, 96], sizes = [2, 24], strides = [1, 1]} : vector<2x128xf32> to vector<2x24xf32>
    %121 = arith.mulf %118, %87 : vector<2x24xf32>
    %122 = arith.mulf %117, %120 : vector<2x24xf32>
    %123 = arith.addf %121, %122 : vector<2x24xf32>
    %124 = math.tanh %123 : vector<2x24xf32>
    %125 = arith.mulf %119, %124 : vector<2x24xf32>
    %126 = vector.extract_strided_slice %9 {offsets = [6, 0], sizes = [2, 128], strides = [1, 1]} : vector<16x128xf32> to vector<2x128xf32>
    %cst_27 = arith.constant dense<0.000000e+00> : vector<2x128xf32>
    %127 = tpu.matmul %107, %16, %cst_27 {dimension_numbers = #tpu.dot_dimension_numbers<[1], [0], [0], [1], [0, 0, 1, 1], [], []>} : vector<2x24xf32>, vector<24x128xf32>, vector<2x128xf32> -> vector<2x128xf32>
    %128 = arith.addf %126, %127 : vector<2x128xf32>
    %129 = arith.negf %128 : vector<2x128xf32>
    %130 = math.exp %129 : vector<2x128xf32>
    %cst_28 = arith.constant 1.000000e+00 : f32
    %131 = vector.broadcast %cst_28 : f32 to vector<2x128xf32>
    %132 = arith.addf %131, %130 : vector<2x128xf32>
    %133 = arith.divf %131, %132 : vector<2x128xf32>
    %134 = math.tanh %128 : vector<2x128xf32>
    %135 = vector.extract_strided_slice %133 {offsets = [0, 0], sizes = [2, 24], strides = [1, 1]} : vector<2x128xf32> to vector<2x24xf32>
    %136 = vector.extract_strided_slice %133 {offsets = [0, 32], sizes = [2, 24], strides = [1, 1]} : vector<2x128xf32> to vector<2x24xf32>
    %137 = vector.extract_strided_slice %133 {offsets = [0, 64], sizes = [2, 24], strides = [1, 1]} : vector<2x128xf32> to vector<2x24xf32>
    %138 = vector.extract_strided_slice %134 {offsets = [0, 96], sizes = [2, 24], strides = [1, 1]} : vector<2x128xf32> to vector<2x24xf32>
    %139 = arith.mulf %136, %105 : vector<2x24xf32>
    %140 = arith.mulf %135, %138 : vector<2x24xf32>
    %141 = arith.addf %139, %140 : vector<2x24xf32>
    %142 = math.tanh %141 : vector<2x24xf32>
    %143 = arith.mulf %137, %142 : vector<2x24xf32>
    %144 = vector.extract_strided_slice %14 {offsets = [8, 0], sizes = [2, 128], strides = [1, 1]} : vector<16x128xf32> to vector<2x128xf32>
    %cst_29 = arith.constant dense<0.000000e+00> : vector<2x128xf32>
    %145 = tpu.matmul %125, %17, %cst_29 {dimension_numbers = #tpu.dot_dimension_numbers<[1], [0], [0], [1], [0, 0, 1, 1], [], []>} : vector<2x24xf32>, vector<24x128xf32>, vector<2x128xf32> -> vector<2x128xf32>
    %146 = arith.addf %144, %145 : vector<2x128xf32>
    %147 = arith.negf %146 : vector<2x128xf32>
    %148 = math.exp %147 : vector<2x128xf32>
    %cst_30 = arith.constant 1.000000e+00 : f32
    %149 = vector.broadcast %cst_30 : f32 to vector<2x128xf32>
    %150 = arith.addf %149, %148 : vector<2x128xf32>
    %151 = arith.divf %149, %150 : vector<2x128xf32>
    %152 = math.tanh %146 : vector<2x128xf32>
    %153 = vector.extract_strided_slice %151 {offsets = [0, 0], sizes = [2, 24], strides = [1, 1]} : vector<2x128xf32> to vector<2x24xf32>
    %154 = vector.extract_strided_slice %151 {offsets = [0, 32], sizes = [2, 24], strides = [1, 1]} : vector<2x128xf32> to vector<2x24xf32>
    %155 = vector.extract_strided_slice %151 {offsets = [0, 64], sizes = [2, 24], strides = [1, 1]} : vector<2x128xf32> to vector<2x24xf32>
    %156 = vector.extract_strided_slice %152 {offsets = [0, 96], sizes = [2, 24], strides = [1, 1]} : vector<2x128xf32> to vector<2x24xf32>
    %157 = arith.mulf %154, %123 : vector<2x24xf32>
    %158 = arith.mulf %153, %156 : vector<2x24xf32>
    %159 = arith.addf %157, %158 : vector<2x24xf32>
    %160 = math.tanh %159 : vector<2x24xf32>
    %161 = arith.mulf %155, %160 : vector<2x24xf32>
    %162 = vector.extract_strided_slice %9 {offsets = [8, 0], sizes = [2, 128], strides = [1, 1]} : vector<16x128xf32> to vector<2x128xf32>
    %cst_31 = arith.constant dense<0.000000e+00> : vector<2x128xf32>
    %163 = tpu.matmul %143, %16, %cst_31 {dimension_numbers = #tpu.dot_dimension_numbers<[1], [0], [0], [1], [0, 0, 1, 1], [], []>} : vector<2x24xf32>, vector<24x128xf32>, vector<2x128xf32> -> vector<2x128xf32>
    %164 = arith.addf %162, %163 : vector<2x128xf32>
    %165 = arith.negf %164 : vector<2x128xf32>
    %166 = math.exp %165 : vector<2x128xf32>
    %cst_32 = arith.constant 1.000000e+00 : f32
    %167 = vector.broadcast %cst_32 : f32 to vector<2x128xf32>
    %168 = arith.addf %167, %166 : vector<2x128xf32>
    %169 = arith.divf %167, %168 : vector<2x128xf32>
    %170 = math.tanh %164 : vector<2x128xf32>
    %171 = vector.extract_strided_slice %169 {offsets = [0, 0], sizes = [2, 24], strides = [1, 1]} : vector<2x128xf32> to vector<2x24xf32>
    %172 = vector.extract_strided_slice %169 {offsets = [0, 32], sizes = [2, 24], strides = [1, 1]} : vector<2x128xf32> to vector<2x24xf32>
    %173 = vector.extract_strided_slice %169 {offsets = [0, 64], sizes = [2, 24], strides = [1, 1]} : vector<2x128xf32> to vector<2x24xf32>
    %174 = vector.extract_strided_slice %170 {offsets = [0, 96], sizes = [2, 24], strides = [1, 1]} : vector<2x128xf32> to vector<2x24xf32>
    %175 = arith.mulf %172, %141 : vector<2x24xf32>
    %176 = arith.mulf %171, %174 : vector<2x24xf32>
    %177 = arith.addf %175, %176 : vector<2x24xf32>
    %178 = math.tanh %177 : vector<2x24xf32>
    %179 = arith.mulf %173, %178 : vector<2x24xf32>
    %180 = vector.extract_strided_slice %14 {offsets = [6, 0], sizes = [2, 128], strides = [1, 1]} : vector<16x128xf32> to vector<2x128xf32>
    %cst_33 = arith.constant dense<0.000000e+00> : vector<2x128xf32>
    %181 = tpu.matmul %161, %17, %cst_33 {dimension_numbers = #tpu.dot_dimension_numbers<[1], [0], [0], [1], [0, 0, 1, 1], [], []>} : vector<2x24xf32>, vector<24x128xf32>, vector<2x128xf32> -> vector<2x128xf32>
    %182 = arith.addf %180, %181 : vector<2x128xf32>
    %183 = arith.negf %182 : vector<2x128xf32>
    %184 = math.exp %183 : vector<2x128xf32>
    %cst_34 = arith.constant 1.000000e+00 : f32
    %185 = vector.broadcast %cst_34 : f32 to vector<2x128xf32>
    %186 = arith.addf %185, %184 : vector<2x128xf32>
    %187 = arith.divf %185, %186 : vector<2x128xf32>
    %188 = math.tanh %182 : vector<2x128xf32>
    %189 = vector.extract_strided_slice %187 {offsets = [0, 0], sizes = [2, 24], strides = [1, 1]} : vector<2x128xf32> to vector<2x24xf32>
    %190 = vector.extract_strided_slice %187 {offsets = [0, 32], sizes = [2, 24], strides = [1, 1]} : vector<2x128xf32> to vector<2x24xf32>
    %191 = vector.extract_strided_slice %187 {offsets = [0, 64], sizes = [2, 24], strides = [1, 1]} : vector<2x128xf32> to vector<2x24xf32>
    %192 = vector.extract_strided_slice %188 {offsets = [0, 96], sizes = [2, 24], strides = [1, 1]} : vector<2x128xf32> to vector<2x24xf32>
    %193 = arith.mulf %190, %159 : vector<2x24xf32>
    %194 = arith.mulf %189, %192 : vector<2x24xf32>
    %195 = arith.addf %193, %194 : vector<2x24xf32>
    %196 = math.tanh %195 : vector<2x24xf32>
    %197 = arith.mulf %191, %196 : vector<2x24xf32>
    %198 = vector.extract_strided_slice %9 {offsets = [10, 0], sizes = [2, 128], strides = [1, 1]} : vector<16x128xf32> to vector<2x128xf32>
    %cst_35 = arith.constant dense<0.000000e+00> : vector<2x128xf32>
    %199 = tpu.matmul %179, %16, %cst_35 {dimension_numbers = #tpu.dot_dimension_numbers<[1], [0], [0], [1], [0, 0, 1, 1], [], []>} : vector<2x24xf32>, vector<24x128xf32>, vector<2x128xf32> -> vector<2x128xf32>
    %200 = arith.addf %198, %199 : vector<2x128xf32>
    %201 = arith.negf %200 : vector<2x128xf32>
    %202 = math.exp %201 : vector<2x128xf32>
    %cst_36 = arith.constant 1.000000e+00 : f32
    %203 = vector.broadcast %cst_36 : f32 to vector<2x128xf32>
    %204 = arith.addf %203, %202 : vector<2x128xf32>
    %205 = arith.divf %203, %204 : vector<2x128xf32>
    %206 = math.tanh %200 : vector<2x128xf32>
    %207 = vector.extract_strided_slice %205 {offsets = [0, 0], sizes = [2, 24], strides = [1, 1]} : vector<2x128xf32> to vector<2x24xf32>
    %208 = vector.extract_strided_slice %205 {offsets = [0, 32], sizes = [2, 24], strides = [1, 1]} : vector<2x128xf32> to vector<2x24xf32>
    %209 = vector.extract_strided_slice %205 {offsets = [0, 64], sizes = [2, 24], strides = [1, 1]} : vector<2x128xf32> to vector<2x24xf32>
    %210 = vector.extract_strided_slice %206 {offsets = [0, 96], sizes = [2, 24], strides = [1, 1]} : vector<2x128xf32> to vector<2x24xf32>
    %211 = arith.mulf %208, %177 : vector<2x24xf32>
    %212 = arith.mulf %207, %210 : vector<2x24xf32>
    %213 = arith.addf %211, %212 : vector<2x24xf32>
    %214 = math.tanh %213 : vector<2x24xf32>
    %215 = arith.mulf %209, %214 : vector<2x24xf32>
    %216 = vector.extract_strided_slice %14 {offsets = [4, 0], sizes = [2, 128], strides = [1, 1]} : vector<16x128xf32> to vector<2x128xf32>
    %cst_37 = arith.constant dense<0.000000e+00> : vector<2x128xf32>
    %217 = tpu.matmul %197, %17, %cst_37 {dimension_numbers = #tpu.dot_dimension_numbers<[1], [0], [0], [1], [0, 0, 1, 1], [], []>} : vector<2x24xf32>, vector<24x128xf32>, vector<2x128xf32> -> vector<2x128xf32>
    %218 = arith.addf %216, %217 : vector<2x128xf32>
    %219 = arith.negf %218 : vector<2x128xf32>
    %220 = math.exp %219 : vector<2x128xf32>
    %cst_38 = arith.constant 1.000000e+00 : f32
    %221 = vector.broadcast %cst_38 : f32 to vector<2x128xf32>
    %222 = arith.addf %221, %220 : vector<2x128xf32>
    %223 = arith.divf %221, %222 : vector<2x128xf32>
    %224 = math.tanh %218 : vector<2x128xf32>
    %225 = vector.extract_strided_slice %223 {offsets = [0, 0], sizes = [2, 24], strides = [1, 1]} : vector<2x128xf32> to vector<2x24xf32>
    %226 = vector.extract_strided_slice %223 {offsets = [0, 32], sizes = [2, 24], strides = [1, 1]} : vector<2x128xf32> to vector<2x24xf32>
    %227 = vector.extract_strided_slice %223 {offsets = [0, 64], sizes = [2, 24], strides = [1, 1]} : vector<2x128xf32> to vector<2x24xf32>
    %228 = vector.extract_strided_slice %224 {offsets = [0, 96], sizes = [2, 24], strides = [1, 1]} : vector<2x128xf32> to vector<2x24xf32>
    %229 = arith.mulf %226, %195 : vector<2x24xf32>
    %230 = arith.mulf %225, %228 : vector<2x24xf32>
    %231 = arith.addf %229, %230 : vector<2x24xf32>
    %232 = math.tanh %231 : vector<2x24xf32>
    %233 = arith.mulf %227, %232 : vector<2x24xf32>
    %234 = vector.extract_strided_slice %9 {offsets = [12, 0], sizes = [2, 128], strides = [1, 1]} : vector<16x128xf32> to vector<2x128xf32>
    %cst_39 = arith.constant dense<0.000000e+00> : vector<2x128xf32>
    %235 = tpu.matmul %215, %16, %cst_39 {dimension_numbers = #tpu.dot_dimension_numbers<[1], [0], [0], [1], [0, 0, 1, 1], [], []>} : vector<2x24xf32>, vector<24x128xf32>, vector<2x128xf32> -> vector<2x128xf32>
    %236 = arith.addf %234, %235 : vector<2x128xf32>
    %237 = arith.negf %236 : vector<2x128xf32>
    %238 = math.exp %237 : vector<2x128xf32>
    %cst_40 = arith.constant 1.000000e+00 : f32
    %239 = vector.broadcast %cst_40 : f32 to vector<2x128xf32>
    %240 = arith.addf %239, %238 : vector<2x128xf32>
    %241 = arith.divf %239, %240 : vector<2x128xf32>
    %242 = math.tanh %236 : vector<2x128xf32>
    %243 = vector.extract_strided_slice %241 {offsets = [0, 0], sizes = [2, 24], strides = [1, 1]} : vector<2x128xf32> to vector<2x24xf32>
    %244 = vector.extract_strided_slice %241 {offsets = [0, 32], sizes = [2, 24], strides = [1, 1]} : vector<2x128xf32> to vector<2x24xf32>
    %245 = vector.extract_strided_slice %241 {offsets = [0, 64], sizes = [2, 24], strides = [1, 1]} : vector<2x128xf32> to vector<2x24xf32>
    %246 = vector.extract_strided_slice %242 {offsets = [0, 96], sizes = [2, 24], strides = [1, 1]} : vector<2x128xf32> to vector<2x24xf32>
    %247 = arith.mulf %244, %213 : vector<2x24xf32>
    %248 = arith.mulf %243, %246 : vector<2x24xf32>
    %249 = arith.addf %247, %248 : vector<2x24xf32>
    %250 = math.tanh %249 : vector<2x24xf32>
    %251 = arith.mulf %245, %250 : vector<2x24xf32>
    %252 = vector.extract_strided_slice %14 {offsets = [2, 0], sizes = [2, 128], strides = [1, 1]} : vector<16x128xf32> to vector<2x128xf32>
    %cst_41 = arith.constant dense<0.000000e+00> : vector<2x128xf32>
    %253 = tpu.matmul %233, %17, %cst_41 {dimension_numbers = #tpu.dot_dimension_numbers<[1], [0], [0], [1], [0, 0, 1, 1], [], []>} : vector<2x24xf32>, vector<24x128xf32>, vector<2x128xf32> -> vector<2x128xf32>
    %254 = arith.addf %252, %253 : vector<2x128xf32>
    %255 = arith.negf %254 : vector<2x128xf32>
    %256 = math.exp %255 : vector<2x128xf32>
    %cst_42 = arith.constant 1.000000e+00 : f32
    %257 = vector.broadcast %cst_42 : f32 to vector<2x128xf32>
    %258 = arith.addf %257, %256 : vector<2x128xf32>
    %259 = arith.divf %257, %258 : vector<2x128xf32>
    %260 = math.tanh %254 : vector<2x128xf32>
    %261 = vector.extract_strided_slice %259 {offsets = [0, 0], sizes = [2, 24], strides = [1, 1]} : vector<2x128xf32> to vector<2x24xf32>
    %262 = vector.extract_strided_slice %259 {offsets = [0, 32], sizes = [2, 24], strides = [1, 1]} : vector<2x128xf32> to vector<2x24xf32>
    %263 = vector.extract_strided_slice %259 {offsets = [0, 64], sizes = [2, 24], strides = [1, 1]} : vector<2x128xf32> to vector<2x24xf32>
    %264 = vector.extract_strided_slice %260 {offsets = [0, 96], sizes = [2, 24], strides = [1, 1]} : vector<2x128xf32> to vector<2x24xf32>
    %265 = arith.mulf %262, %231 : vector<2x24xf32>
    %266 = arith.mulf %261, %264 : vector<2x24xf32>
    %267 = arith.addf %265, %266 : vector<2x24xf32>
    %268 = math.tanh %267 : vector<2x24xf32>
    %269 = arith.mulf %263, %268 : vector<2x24xf32>
    %270 = vector.extract_strided_slice %9 {offsets = [14, 0], sizes = [2, 128], strides = [1, 1]} : vector<16x128xf32> to vector<2x128xf32>
    %cst_43 = arith.constant dense<0.000000e+00> : vector<2x128xf32>
    %271 = tpu.matmul %251, %16, %cst_43 {dimension_numbers = #tpu.dot_dimension_numbers<[1], [0], [0], [1], [0, 0, 1, 1], [], []>} : vector<2x24xf32>, vector<24x128xf32>, vector<2x128xf32> -> vector<2x128xf32>
    %272 = arith.addf %270, %271 : vector<2x128xf32>
    %273 = arith.negf %272 : vector<2x128xf32>
    %274 = math.exp %273 : vector<2x128xf32>
    %cst_44 = arith.constant 1.000000e+00 : f32
    %275 = vector.broadcast %cst_44 : f32 to vector<2x128xf32>
    %276 = arith.addf %275, %274 : vector<2x128xf32>
    %277 = arith.divf %275, %276 : vector<2x128xf32>
    %278 = math.tanh %272 : vector<2x128xf32>
    %279 = vector.extract_strided_slice %277 {offsets = [0, 0], sizes = [2, 24], strides = [1, 1]} : vector<2x128xf32> to vector<2x24xf32>
    %280 = vector.extract_strided_slice %277 {offsets = [0, 32], sizes = [2, 24], strides = [1, 1]} : vector<2x128xf32> to vector<2x24xf32>
    %281 = vector.extract_strided_slice %277 {offsets = [0, 64], sizes = [2, 24], strides = [1, 1]} : vector<2x128xf32> to vector<2x24xf32>
    %282 = vector.extract_strided_slice %278 {offsets = [0, 96], sizes = [2, 24], strides = [1, 1]} : vector<2x128xf32> to vector<2x24xf32>
    %283 = arith.mulf %280, %249 : vector<2x24xf32>
    %284 = arith.mulf %279, %282 : vector<2x24xf32>
    %285 = arith.addf %283, %284 : vector<2x24xf32>
    %286 = math.tanh %285 : vector<2x24xf32>
    %287 = arith.mulf %281, %286 : vector<2x24xf32>
    %288 = vector.extract_strided_slice %14 {offsets = [0, 0], sizes = [2, 128], strides = [1, 1]} : vector<16x128xf32> to vector<2x128xf32>
    %cst_45 = arith.constant dense<0.000000e+00> : vector<2x128xf32>
    %289 = tpu.matmul %269, %17, %cst_45 {dimension_numbers = #tpu.dot_dimension_numbers<[1], [0], [0], [1], [0, 0, 1, 1], [], []>} : vector<2x24xf32>, vector<24x128xf32>, vector<2x128xf32> -> vector<2x128xf32>
    %290 = arith.addf %288, %289 : vector<2x128xf32>
    %291 = arith.negf %290 : vector<2x128xf32>
    %292 = math.exp %291 : vector<2x128xf32>
    %cst_46 = arith.constant 1.000000e+00 : f32
    %293 = vector.broadcast %cst_46 : f32 to vector<2x128xf32>
    %294 = arith.addf %293, %292 : vector<2x128xf32>
    %295 = arith.divf %293, %294 : vector<2x128xf32>
    %296 = math.tanh %290 : vector<2x128xf32>
    %297 = vector.extract_strided_slice %295 {offsets = [0, 0], sizes = [2, 24], strides = [1, 1]} : vector<2x128xf32> to vector<2x24xf32>
    %298 = vector.extract_strided_slice %295 {offsets = [0, 32], sizes = [2, 24], strides = [1, 1]} : vector<2x128xf32> to vector<2x24xf32>
    %299 = vector.extract_strided_slice %295 {offsets = [0, 64], sizes = [2, 24], strides = [1, 1]} : vector<2x128xf32> to vector<2x24xf32>
    %300 = vector.extract_strided_slice %296 {offsets = [0, 96], sizes = [2, 24], strides = [1, 1]} : vector<2x128xf32> to vector<2x24xf32>
    %301 = arith.mulf %298, %267 : vector<2x24xf32>
    %302 = arith.mulf %297, %300 : vector<2x24xf32>
    %303 = arith.addf %301, %302 : vector<2x24xf32>
    %304 = math.tanh %303 : vector<2x24xf32>
    %305 = arith.mulf %299, %304 : vector<2x24xf32>
    %306 = tpu.concatenate %35, %71, %107, %143, %179, %215, %251, %287 in 0 : vector<2x24xf32>, vector<2x24xf32>, vector<2x24xf32>, vector<2x24xf32>, vector<2x24xf32>, vector<2x24xf32>, vector<2x24xf32>, vector<2x24xf32> -> vector<16x24xf32>
    %307 = tpu.concatenate %305, %269, %233, %197, %161, %125, %89, %53 in 0 : vector<2x24xf32>, vector<2x24xf32>, vector<2x24xf32>, vector<2x24xf32>, vector<2x24xf32>, vector<2x24xf32>, vector<2x24xf32>, vector<2x24xf32> -> vector<16x24xf32>
    %c0_47 = arith.constant 0 : index
    %c0_48 = arith.constant 0 : index
    %308 = vector.load %arg7[%c0_47, %c0_48] : memref<24x128xf32, #tpu.memory_space<vmem>>, vector<24x128xf32>
    %cst_49 = arith.constant dense<0.000000e+00> : vector<16x128xf32>
    %309 = tpu.matmul %306, %308, %cst_49 {dimension_numbers = #tpu.dot_dimension_numbers<[1], [0], [0], [1], [0, 0, 1, 1], [], []>} : vector<16x24xf32>, vector<24x128xf32>, vector<16x128xf32> -> vector<16x128xf32>
    %c0_50 = arith.constant 0 : index
    %c0_51 = arith.constant 0 : index
    %310 = vector.load %arg8[%c0_50, %c0_51] : memref<24x128xf32, #tpu.memory_space<vmem>>, vector<24x128xf32>
    %cst_52 = arith.constant dense<0.000000e+00> : vector<16x128xf32>
    %311 = tpu.matmul %307, %310, %cst_52 {dimension_numbers = #tpu.dot_dimension_numbers<[1], [0], [0], [1], [0, 0, 1, 1], [], []>} : vector<16x24xf32>, vector<24x128xf32>, vector<16x128xf32> -> vector<16x128xf32>
    %312 = arith.addf %309, %311 : vector<16x128xf32>
    %c0_53 = arith.constant 0 : index
    %c0_54 = arith.constant 0 : index
    %313 = vector.load %arg10[%c0_53, %c0_54] : memref<1x128xf32, #tpu.memory_space<vmem>>, vector<1x128xf32>
    %314 = vector.broadcast %313 : vector<1x128xf32> to vector<16x128xf32>
    %315 = arith.addf %312, %314 : vector<16x128xf32>
    %c0_55 = arith.constant 0 : index
    %c0_56 = arith.constant 0 : index
    %316 = vector.load %arg11[%c0_55, %c0_56] : memref<24x128xf32, #tpu.memory_space<vmem>>, vector<24x128xf32>
    %cst_57 = arith.constant dense<0.000000e+00> : vector<16x128xf32>
    %317 = tpu.matmul %306, %316, %cst_57 {dimension_numbers = #tpu.dot_dimension_numbers<[1], [0], [0], [1], [0, 0, 1, 1], [], []>} : vector<16x24xf32>, vector<24x128xf32>, vector<16x128xf32> -> vector<16x128xf32>
    %c0_58 = arith.constant 0 : index
    %c0_59 = arith.constant 0 : index
    %318 = vector.load %arg12[%c0_58, %c0_59] : memref<24x128xf32, #tpu.memory_space<vmem>>, vector<24x128xf32>
    %cst_60 = arith.constant dense<0.000000e+00> : vector<16x128xf32>
    %319 = tpu.matmul %307, %318, %cst_60 {dimension_numbers = #tpu.dot_dimension_numbers<[1], [0], [0], [1], [0, 0, 1, 1], [], []>} : vector<16x24xf32>, vector<24x128xf32>, vector<16x128xf32> -> vector<16x128xf32>
    %320 = arith.addf %317, %319 : vector<16x128xf32>
    %c0_61 = arith.constant 0 : index
    %c0_62 = arith.constant 0 : index
    %321 = vector.load %arg14[%c0_61, %c0_62] : memref<1x128xf32, #tpu.memory_space<vmem>>, vector<1x128xf32>
    %322 = vector.broadcast %321 : vector<1x128xf32> to vector<16x128xf32>
    %323 = arith.addf %320, %322 : vector<16x128xf32>
    %c0_63 = arith.constant 0 : index
    %c0_64 = arith.constant 0 : index
    %324 = vector.load %arg9[%c0_63, %c0_64] : memref<24x128xf32, #tpu.memory_space<vmem>>, vector<24x128xf32>
    %c0_65 = arith.constant 0 : index
    %c0_66 = arith.constant 0 : index
    %325 = vector.load %arg13[%c0_65, %c0_66] : memref<24x128xf32, #tpu.memory_space<vmem>>, vector<24x128xf32>
    %326 = vector.extract_strided_slice %315 {offsets = [0, 0], sizes = [2, 128], strides = [1, 1]} : vector<16x128xf32> to vector<2x128xf32>
    %cst_67 = arith.constant dense<0.000000e+00> : vector<2x128xf32>
    %327 = tpu.matmul %15, %324, %cst_67 {dimension_numbers = #tpu.dot_dimension_numbers<[1], [0], [0], [1], [0, 0, 1, 1], [], []>} : vector<2x24xf32>, vector<24x128xf32>, vector<2x128xf32> -> vector<2x128xf32>
    %328 = arith.addf %326, %327 : vector<2x128xf32>
    %329 = arith.negf %328 : vector<2x128xf32>
    %330 = math.exp %329 : vector<2x128xf32>
    %cst_68 = arith.constant 1.000000e+00 : f32
    %331 = vector.broadcast %cst_68 : f32 to vector<2x128xf32>
    %332 = arith.addf %331, %330 : vector<2x128xf32>
    %333 = arith.divf %331, %332 : vector<2x128xf32>
    %334 = math.tanh %328 : vector<2x128xf32>
    %335 = vector.extract_strided_slice %333 {offsets = [0, 0], sizes = [2, 24], strides = [1, 1]} : vector<2x128xf32> to vector<2x24xf32>
    %336 = vector.extract_strided_slice %333 {offsets = [0, 32], sizes = [2, 24], strides = [1, 1]} : vector<2x128xf32> to vector<2x24xf32>
    %337 = vector.extract_strided_slice %333 {offsets = [0, 64], sizes = [2, 24], strides = [1, 1]} : vector<2x128xf32> to vector<2x24xf32>
    %338 = vector.extract_strided_slice %334 {offsets = [0, 96], sizes = [2, 24], strides = [1, 1]} : vector<2x128xf32> to vector<2x24xf32>
    %339 = arith.mulf %336, %15 : vector<2x24xf32>
    %340 = arith.mulf %335, %338 : vector<2x24xf32>
    %341 = arith.addf %339, %340 : vector<2x24xf32>
    %342 = math.tanh %341 : vector<2x24xf32>
    %343 = arith.mulf %337, %342 : vector<2x24xf32>
    %344 = vector.extract_strided_slice %323 {offsets = [14, 0], sizes = [2, 128], strides = [1, 1]} : vector<16x128xf32> to vector<2x128xf32>
    %cst_69 = arith.constant dense<0.000000e+00> : vector<2x128xf32>
    %345 = tpu.matmul %15, %325, %cst_69 {dimension_numbers = #tpu.dot_dimension_numbers<[1], [0], [0], [1], [0, 0, 1, 1], [], []>} : vector<2x24xf32>, vector<24x128xf32>, vector<2x128xf32> -> vector<2x128xf32>
    %346 = arith.addf %344, %345 : vector<2x128xf32>
    %347 = arith.negf %346 : vector<2x128xf32>
    %348 = math.exp %347 : vector<2x128xf32>
    %cst_70 = arith.constant 1.000000e+00 : f32
    %349 = vector.broadcast %cst_70 : f32 to vector<2x128xf32>
    %350 = arith.addf %349, %348 : vector<2x128xf32>
    %351 = arith.divf %349, %350 : vector<2x128xf32>
    %352 = math.tanh %346 : vector<2x128xf32>
    %353 = vector.extract_strided_slice %351 {offsets = [0, 0], sizes = [2, 24], strides = [1, 1]} : vector<2x128xf32> to vector<2x24xf32>
    %354 = vector.extract_strided_slice %351 {offsets = [0, 32], sizes = [2, 24], strides = [1, 1]} : vector<2x128xf32> to vector<2x24xf32>
    %355 = vector.extract_strided_slice %351 {offsets = [0, 64], sizes = [2, 24], strides = [1, 1]} : vector<2x128xf32> to vector<2x24xf32>
    %356 = vector.extract_strided_slice %352 {offsets = [0, 96], sizes = [2, 24], strides = [1, 1]} : vector<2x128xf32> to vector<2x24xf32>
    %357 = arith.mulf %354, %15 : vector<2x24xf32>
    %358 = arith.mulf %353, %356 : vector<2x24xf32>
    %359 = arith.addf %357, %358 : vector<2x24xf32>
    %360 = math.tanh %359 : vector<2x24xf32>
    %361 = arith.mulf %355, %360 : vector<2x24xf32>
    %362 = vector.extract_strided_slice %315 {offsets = [2, 0], sizes = [2, 128], strides = [1, 1]} : vector<16x128xf32> to vector<2x128xf32>
    %cst_71 = arith.constant dense<0.000000e+00> : vector<2x128xf32>
    %363 = tpu.matmul %343, %324, %cst_71 {dimension_numbers = #tpu.dot_dimension_numbers<[1], [0], [0], [1], [0, 0, 1, 1], [], []>} : vector<2x24xf32>, vector<24x128xf32>, vector<2x128xf32> -> vector<2x128xf32>
    %364 = arith.addf %362, %363 : vector<2x128xf32>
    %365 = arith.negf %364 : vector<2x128xf32>
    %366 = math.exp %365 : vector<2x128xf32>
    %cst_72 = arith.constant 1.000000e+00 : f32
    %367 = vector.broadcast %cst_72 : f32 to vector<2x128xf32>
    %368 = arith.addf %367, %366 : vector<2x128xf32>
    %369 = arith.divf %367, %368 : vector<2x128xf32>
    %370 = math.tanh %364 : vector<2x128xf32>
    %371 = vector.extract_strided_slice %369 {offsets = [0, 0], sizes = [2, 24], strides = [1, 1]} : vector<2x128xf32> to vector<2x24xf32>
    %372 = vector.extract_strided_slice %369 {offsets = [0, 32], sizes = [2, 24], strides = [1, 1]} : vector<2x128xf32> to vector<2x24xf32>
    %373 = vector.extract_strided_slice %369 {offsets = [0, 64], sizes = [2, 24], strides = [1, 1]} : vector<2x128xf32> to vector<2x24xf32>
    %374 = vector.extract_strided_slice %370 {offsets = [0, 96], sizes = [2, 24], strides = [1, 1]} : vector<2x128xf32> to vector<2x24xf32>
    %375 = arith.mulf %372, %341 : vector<2x24xf32>
    %376 = arith.mulf %371, %374 : vector<2x24xf32>
    %377 = arith.addf %375, %376 : vector<2x24xf32>
    %378 = math.tanh %377 : vector<2x24xf32>
    %379 = arith.mulf %373, %378 : vector<2x24xf32>
    %380 = vector.extract_strided_slice %323 {offsets = [12, 0], sizes = [2, 128], strides = [1, 1]} : vector<16x128xf32> to vector<2x128xf32>
    %cst_73 = arith.constant dense<0.000000e+00> : vector<2x128xf32>
    %381 = tpu.matmul %361, %325, %cst_73 {dimension_numbers = #tpu.dot_dimension_numbers<[1], [0], [0], [1], [0, 0, 1, 1], [], []>} : vector<2x24xf32>, vector<24x128xf32>, vector<2x128xf32> -> vector<2x128xf32>
    %382 = arith.addf %380, %381 : vector<2x128xf32>
    %383 = arith.negf %382 : vector<2x128xf32>
    %384 = math.exp %383 : vector<2x128xf32>
    %cst_74 = arith.constant 1.000000e+00 : f32
    %385 = vector.broadcast %cst_74 : f32 to vector<2x128xf32>
    %386 = arith.addf %385, %384 : vector<2x128xf32>
    %387 = arith.divf %385, %386 : vector<2x128xf32>
    %388 = math.tanh %382 : vector<2x128xf32>
    %389 = vector.extract_strided_slice %387 {offsets = [0, 0], sizes = [2, 24], strides = [1, 1]} : vector<2x128xf32> to vector<2x24xf32>
    %390 = vector.extract_strided_slice %387 {offsets = [0, 32], sizes = [2, 24], strides = [1, 1]} : vector<2x128xf32> to vector<2x24xf32>
    %391 = vector.extract_strided_slice %387 {offsets = [0, 64], sizes = [2, 24], strides = [1, 1]} : vector<2x128xf32> to vector<2x24xf32>
    %392 = vector.extract_strided_slice %388 {offsets = [0, 96], sizes = [2, 24], strides = [1, 1]} : vector<2x128xf32> to vector<2x24xf32>
    %393 = arith.mulf %390, %359 : vector<2x24xf32>
    %394 = arith.mulf %389, %392 : vector<2x24xf32>
    %395 = arith.addf %393, %394 : vector<2x24xf32>
    %396 = math.tanh %395 : vector<2x24xf32>
    %397 = arith.mulf %391, %396 : vector<2x24xf32>
    %398 = vector.extract_strided_slice %315 {offsets = [4, 0], sizes = [2, 128], strides = [1, 1]} : vector<16x128xf32> to vector<2x128xf32>
    %cst_75 = arith.constant dense<0.000000e+00> : vector<2x128xf32>
    %399 = tpu.matmul %379, %324, %cst_75 {dimension_numbers = #tpu.dot_dimension_numbers<[1], [0], [0], [1], [0, 0, 1, 1], [], []>} : vector<2x24xf32>, vector<24x128xf32>, vector<2x128xf32> -> vector<2x128xf32>
    %400 = arith.addf %398, %399 : vector<2x128xf32>
    %401 = arith.negf %400 : vector<2x128xf32>
    %402 = math.exp %401 : vector<2x128xf32>
    %cst_76 = arith.constant 1.000000e+00 : f32
    %403 = vector.broadcast %cst_76 : f32 to vector<2x128xf32>
    %404 = arith.addf %403, %402 : vector<2x128xf32>
    %405 = arith.divf %403, %404 : vector<2x128xf32>
    %406 = math.tanh %400 : vector<2x128xf32>
    %407 = vector.extract_strided_slice %405 {offsets = [0, 0], sizes = [2, 24], strides = [1, 1]} : vector<2x128xf32> to vector<2x24xf32>
    %408 = vector.extract_strided_slice %405 {offsets = [0, 32], sizes = [2, 24], strides = [1, 1]} : vector<2x128xf32> to vector<2x24xf32>
    %409 = vector.extract_strided_slice %405 {offsets = [0, 64], sizes = [2, 24], strides = [1, 1]} : vector<2x128xf32> to vector<2x24xf32>
    %410 = vector.extract_strided_slice %406 {offsets = [0, 96], sizes = [2, 24], strides = [1, 1]} : vector<2x128xf32> to vector<2x24xf32>
    %411 = arith.mulf %408, %377 : vector<2x24xf32>
    %412 = arith.mulf %407, %410 : vector<2x24xf32>
    %413 = arith.addf %411, %412 : vector<2x24xf32>
    %414 = math.tanh %413 : vector<2x24xf32>
    %415 = arith.mulf %409, %414 : vector<2x24xf32>
    %416 = vector.extract_strided_slice %323 {offsets = [10, 0], sizes = [2, 128], strides = [1, 1]} : vector<16x128xf32> to vector<2x128xf32>
    %cst_77 = arith.constant dense<0.000000e+00> : vector<2x128xf32>
    %417 = tpu.matmul %397, %325, %cst_77 {dimension_numbers = #tpu.dot_dimension_numbers<[1], [0], [0], [1], [0, 0, 1, 1], [], []>} : vector<2x24xf32>, vector<24x128xf32>, vector<2x128xf32> -> vector<2x128xf32>
    %418 = arith.addf %416, %417 : vector<2x128xf32>
    %419 = arith.negf %418 : vector<2x128xf32>
    %420 = math.exp %419 : vector<2x128xf32>
    %cst_78 = arith.constant 1.000000e+00 : f32
    %421 = vector.broadcast %cst_78 : f32 to vector<2x128xf32>
    %422 = arith.addf %421, %420 : vector<2x128xf32>
    %423 = arith.divf %421, %422 : vector<2x128xf32>
    %424 = math.tanh %418 : vector<2x128xf32>
    %425 = vector.extract_strided_slice %423 {offsets = [0, 0], sizes = [2, 24], strides = [1, 1]} : vector<2x128xf32> to vector<2x24xf32>
    %426 = vector.extract_strided_slice %423 {offsets = [0, 32], sizes = [2, 24], strides = [1, 1]} : vector<2x128xf32> to vector<2x24xf32>
    %427 = vector.extract_strided_slice %423 {offsets = [0, 64], sizes = [2, 24], strides = [1, 1]} : vector<2x128xf32> to vector<2x24xf32>
    %428 = vector.extract_strided_slice %424 {offsets = [0, 96], sizes = [2, 24], strides = [1, 1]} : vector<2x128xf32> to vector<2x24xf32>
    %429 = arith.mulf %426, %395 : vector<2x24xf32>
    %430 = arith.mulf %425, %428 : vector<2x24xf32>
    %431 = arith.addf %429, %430 : vector<2x24xf32>
    %432 = math.tanh %431 : vector<2x24xf32>
    %433 = arith.mulf %427, %432 : vector<2x24xf32>
    %434 = vector.extract_strided_slice %315 {offsets = [6, 0], sizes = [2, 128], strides = [1, 1]} : vector<16x128xf32> to vector<2x128xf32>
    %cst_79 = arith.constant dense<0.000000e+00> : vector<2x128xf32>
    %435 = tpu.matmul %415, %324, %cst_79 {dimension_numbers = #tpu.dot_dimension_numbers<[1], [0], [0], [1], [0, 0, 1, 1], [], []>} : vector<2x24xf32>, vector<24x128xf32>, vector<2x128xf32> -> vector<2x128xf32>
    %436 = arith.addf %434, %435 : vector<2x128xf32>
    %437 = arith.negf %436 : vector<2x128xf32>
    %438 = math.exp %437 : vector<2x128xf32>
    %cst_80 = arith.constant 1.000000e+00 : f32
    %439 = vector.broadcast %cst_80 : f32 to vector<2x128xf32>
    %440 = arith.addf %439, %438 : vector<2x128xf32>
    %441 = arith.divf %439, %440 : vector<2x128xf32>
    %442 = math.tanh %436 : vector<2x128xf32>
    %443 = vector.extract_strided_slice %441 {offsets = [0, 0], sizes = [2, 24], strides = [1, 1]} : vector<2x128xf32> to vector<2x24xf32>
    %444 = vector.extract_strided_slice %441 {offsets = [0, 32], sizes = [2, 24], strides = [1, 1]} : vector<2x128xf32> to vector<2x24xf32>
    %445 = vector.extract_strided_slice %441 {offsets = [0, 64], sizes = [2, 24], strides = [1, 1]} : vector<2x128xf32> to vector<2x24xf32>
    %446 = vector.extract_strided_slice %442 {offsets = [0, 96], sizes = [2, 24], strides = [1, 1]} : vector<2x128xf32> to vector<2x24xf32>
    %447 = arith.mulf %444, %413 : vector<2x24xf32>
    %448 = arith.mulf %443, %446 : vector<2x24xf32>
    %449 = arith.addf %447, %448 : vector<2x24xf32>
    %450 = math.tanh %449 : vector<2x24xf32>
    %451 = arith.mulf %445, %450 : vector<2x24xf32>
    %452 = vector.extract_strided_slice %323 {offsets = [8, 0], sizes = [2, 128], strides = [1, 1]} : vector<16x128xf32> to vector<2x128xf32>
    %cst_81 = arith.constant dense<0.000000e+00> : vector<2x128xf32>
    %453 = tpu.matmul %433, %325, %cst_81 {dimension_numbers = #tpu.dot_dimension_numbers<[1], [0], [0], [1], [0, 0, 1, 1], [], []>} : vector<2x24xf32>, vector<24x128xf32>, vector<2x128xf32> -> vector<2x128xf32>
    %454 = arith.addf %452, %453 : vector<2x128xf32>
    %455 = arith.negf %454 : vector<2x128xf32>
    %456 = math.exp %455 : vector<2x128xf32>
    %cst_82 = arith.constant 1.000000e+00 : f32
    %457 = vector.broadcast %cst_82 : f32 to vector<2x128xf32>
    %458 = arith.addf %457, %456 : vector<2x128xf32>
    %459 = arith.divf %457, %458 : vector<2x128xf32>
    %460 = math.tanh %454 : vector<2x128xf32>
    %461 = vector.extract_strided_slice %459 {offsets = [0, 0], sizes = [2, 24], strides = [1, 1]} : vector<2x128xf32> to vector<2x24xf32>
    %462 = vector.extract_strided_slice %459 {offsets = [0, 32], sizes = [2, 24], strides = [1, 1]} : vector<2x128xf32> to vector<2x24xf32>
    %463 = vector.extract_strided_slice %459 {offsets = [0, 64], sizes = [2, 24], strides = [1, 1]} : vector<2x128xf32> to vector<2x24xf32>
    %464 = vector.extract_strided_slice %460 {offsets = [0, 96], sizes = [2, 24], strides = [1, 1]} : vector<2x128xf32> to vector<2x24xf32>
    %465 = arith.mulf %462, %431 : vector<2x24xf32>
    %466 = arith.mulf %461, %464 : vector<2x24xf32>
    %467 = arith.addf %465, %466 : vector<2x24xf32>
    %468 = math.tanh %467 : vector<2x24xf32>
    %469 = arith.mulf %463, %468 : vector<2x24xf32>
    %470 = vector.extract_strided_slice %315 {offsets = [8, 0], sizes = [2, 128], strides = [1, 1]} : vector<16x128xf32> to vector<2x128xf32>
    %cst_83 = arith.constant dense<0.000000e+00> : vector<2x128xf32>
    %471 = tpu.matmul %451, %324, %cst_83 {dimension_numbers = #tpu.dot_dimension_numbers<[1], [0], [0], [1], [0, 0, 1, 1], [], []>} : vector<2x24xf32>, vector<24x128xf32>, vector<2x128xf32> -> vector<2x128xf32>
    %472 = arith.addf %470, %471 : vector<2x128xf32>
    %473 = arith.negf %472 : vector<2x128xf32>
    %474 = math.exp %473 : vector<2x128xf32>
    %cst_84 = arith.constant 1.000000e+00 : f32
    %475 = vector.broadcast %cst_84 : f32 to vector<2x128xf32>
    %476 = arith.addf %475, %474 : vector<2x128xf32>
    %477 = arith.divf %475, %476 : vector<2x128xf32>
    %478 = math.tanh %472 : vector<2x128xf32>
    %479 = vector.extract_strided_slice %477 {offsets = [0, 0], sizes = [2, 24], strides = [1, 1]} : vector<2x128xf32> to vector<2x24xf32>
    %480 = vector.extract_strided_slice %477 {offsets = [0, 32], sizes = [2, 24], strides = [1, 1]} : vector<2x128xf32> to vector<2x24xf32>
    %481 = vector.extract_strided_slice %477 {offsets = [0, 64], sizes = [2, 24], strides = [1, 1]} : vector<2x128xf32> to vector<2x24xf32>
    %482 = vector.extract_strided_slice %478 {offsets = [0, 96], sizes = [2, 24], strides = [1, 1]} : vector<2x128xf32> to vector<2x24xf32>
    %483 = arith.mulf %480, %449 : vector<2x24xf32>
    %484 = arith.mulf %479, %482 : vector<2x24xf32>
    %485 = arith.addf %483, %484 : vector<2x24xf32>
    %486 = math.tanh %485 : vector<2x24xf32>
    %487 = arith.mulf %481, %486 : vector<2x24xf32>
    %488 = vector.extract_strided_slice %323 {offsets = [6, 0], sizes = [2, 128], strides = [1, 1]} : vector<16x128xf32> to vector<2x128xf32>
    %cst_85 = arith.constant dense<0.000000e+00> : vector<2x128xf32>
    %489 = tpu.matmul %469, %325, %cst_85 {dimension_numbers = #tpu.dot_dimension_numbers<[1], [0], [0], [1], [0, 0, 1, 1], [], []>} : vector<2x24xf32>, vector<24x128xf32>, vector<2x128xf32> -> vector<2x128xf32>
    %490 = arith.addf %488, %489 : vector<2x128xf32>
    %491 = arith.negf %490 : vector<2x128xf32>
    %492 = math.exp %491 : vector<2x128xf32>
    %cst_86 = arith.constant 1.000000e+00 : f32
    %493 = vector.broadcast %cst_86 : f32 to vector<2x128xf32>
    %494 = arith.addf %493, %492 : vector<2x128xf32>
    %495 = arith.divf %493, %494 : vector<2x128xf32>
    %496 = math.tanh %490 : vector<2x128xf32>
    %497 = vector.extract_strided_slice %495 {offsets = [0, 0], sizes = [2, 24], strides = [1, 1]} : vector<2x128xf32> to vector<2x24xf32>
    %498 = vector.extract_strided_slice %495 {offsets = [0, 32], sizes = [2, 24], strides = [1, 1]} : vector<2x128xf32> to vector<2x24xf32>
    %499 = vector.extract_strided_slice %495 {offsets = [0, 64], sizes = [2, 24], strides = [1, 1]} : vector<2x128xf32> to vector<2x24xf32>
    %500 = vector.extract_strided_slice %496 {offsets = [0, 96], sizes = [2, 24], strides = [1, 1]} : vector<2x128xf32> to vector<2x24xf32>
    %501 = arith.mulf %498, %467 : vector<2x24xf32>
    %502 = arith.mulf %497, %500 : vector<2x24xf32>
    %503 = arith.addf %501, %502 : vector<2x24xf32>
    %504 = math.tanh %503 : vector<2x24xf32>
    %505 = arith.mulf %499, %504 : vector<2x24xf32>
    %506 = vector.extract_strided_slice %315 {offsets = [10, 0], sizes = [2, 128], strides = [1, 1]} : vector<16x128xf32> to vector<2x128xf32>
    %cst_87 = arith.constant dense<0.000000e+00> : vector<2x128xf32>
    %507 = tpu.matmul %487, %324, %cst_87 {dimension_numbers = #tpu.dot_dimension_numbers<[1], [0], [0], [1], [0, 0, 1, 1], [], []>} : vector<2x24xf32>, vector<24x128xf32>, vector<2x128xf32> -> vector<2x128xf32>
    %508 = arith.addf %506, %507 : vector<2x128xf32>
    %509 = arith.negf %508 : vector<2x128xf32>
    %510 = math.exp %509 : vector<2x128xf32>
    %cst_88 = arith.constant 1.000000e+00 : f32
    %511 = vector.broadcast %cst_88 : f32 to vector<2x128xf32>
    %512 = arith.addf %511, %510 : vector<2x128xf32>
    %513 = arith.divf %511, %512 : vector<2x128xf32>
    %514 = math.tanh %508 : vector<2x128xf32>
    %515 = vector.extract_strided_slice %513 {offsets = [0, 0], sizes = [2, 24], strides = [1, 1]} : vector<2x128xf32> to vector<2x24xf32>
    %516 = vector.extract_strided_slice %513 {offsets = [0, 32], sizes = [2, 24], strides = [1, 1]} : vector<2x128xf32> to vector<2x24xf32>
    %517 = vector.extract_strided_slice %513 {offsets = [0, 64], sizes = [2, 24], strides = [1, 1]} : vector<2x128xf32> to vector<2x24xf32>
    %518 = vector.extract_strided_slice %514 {offsets = [0, 96], sizes = [2, 24], strides = [1, 1]} : vector<2x128xf32> to vector<2x24xf32>
    %519 = arith.mulf %516, %485 : vector<2x24xf32>
    %520 = arith.mulf %515, %518 : vector<2x24xf32>
    %521 = arith.addf %519, %520 : vector<2x24xf32>
    %522 = math.tanh %521 : vector<2x24xf32>
    %523 = arith.mulf %517, %522 : vector<2x24xf32>
    %524 = vector.extract_strided_slice %323 {offsets = [4, 0], sizes = [2, 128], strides = [1, 1]} : vector<16x128xf32> to vector<2x128xf32>
    %cst_89 = arith.constant dense<0.000000e+00> : vector<2x128xf32>
    %525 = tpu.matmul %505, %325, %cst_89 {dimension_numbers = #tpu.dot_dimension_numbers<[1], [0], [0], [1], [0, 0, 1, 1], [], []>} : vector<2x24xf32>, vector<24x128xf32>, vector<2x128xf32> -> vector<2x128xf32>
    %526 = arith.addf %524, %525 : vector<2x128xf32>
    %527 = arith.negf %526 : vector<2x128xf32>
    %528 = math.exp %527 : vector<2x128xf32>
    %cst_90 = arith.constant 1.000000e+00 : f32
    %529 = vector.broadcast %cst_90 : f32 to vector<2x128xf32>
    %530 = arith.addf %529, %528 : vector<2x128xf32>
    %531 = arith.divf %529, %530 : vector<2x128xf32>
    %532 = math.tanh %526 : vector<2x128xf32>
    %533 = vector.extract_strided_slice %531 {offsets = [0, 0], sizes = [2, 24], strides = [1, 1]} : vector<2x128xf32> to vector<2x24xf32>
    %534 = vector.extract_strided_slice %531 {offsets = [0, 32], sizes = [2, 24], strides = [1, 1]} : vector<2x128xf32> to vector<2x24xf32>
    %535 = vector.extract_strided_slice %531 {offsets = [0, 64], sizes = [2, 24], strides = [1, 1]} : vector<2x128xf32> to vector<2x24xf32>
    %536 = vector.extract_strided_slice %532 {offsets = [0, 96], sizes = [2, 24], strides = [1, 1]} : vector<2x128xf32> to vector<2x24xf32>
    %537 = arith.mulf %534, %503 : vector<2x24xf32>
    %538 = arith.mulf %533, %536 : vector<2x24xf32>
    %539 = arith.addf %537, %538 : vector<2x24xf32>
    %540 = math.tanh %539 : vector<2x24xf32>
    %541 = arith.mulf %535, %540 : vector<2x24xf32>
    %542 = vector.extract_strided_slice %315 {offsets = [12, 0], sizes = [2, 128], strides = [1, 1]} : vector<16x128xf32> to vector<2x128xf32>
    %cst_91 = arith.constant dense<0.000000e+00> : vector<2x128xf32>
    %543 = tpu.matmul %523, %324, %cst_91 {dimension_numbers = #tpu.dot_dimension_numbers<[1], [0], [0], [1], [0, 0, 1, 1], [], []>} : vector<2x24xf32>, vector<24x128xf32>, vector<2x128xf32> -> vector<2x128xf32>
    %544 = arith.addf %542, %543 : vector<2x128xf32>
    %545 = arith.negf %544 : vector<2x128xf32>
    %546 = math.exp %545 : vector<2x128xf32>
    %cst_92 = arith.constant 1.000000e+00 : f32
    %547 = vector.broadcast %cst_92 : f32 to vector<2x128xf32>
    %548 = arith.addf %547, %546 : vector<2x128xf32>
    %549 = arith.divf %547, %548 : vector<2x128xf32>
    %550 = math.tanh %544 : vector<2x128xf32>
    %551 = vector.extract_strided_slice %549 {offsets = [0, 0], sizes = [2, 24], strides = [1, 1]} : vector<2x128xf32> to vector<2x24xf32>
    %552 = vector.extract_strided_slice %549 {offsets = [0, 32], sizes = [2, 24], strides = [1, 1]} : vector<2x128xf32> to vector<2x24xf32>
    %553 = vector.extract_strided_slice %549 {offsets = [0, 64], sizes = [2, 24], strides = [1, 1]} : vector<2x128xf32> to vector<2x24xf32>
    %554 = vector.extract_strided_slice %550 {offsets = [0, 96], sizes = [2, 24], strides = [1, 1]} : vector<2x128xf32> to vector<2x24xf32>
    %555 = arith.mulf %552, %521 : vector<2x24xf32>
    %556 = arith.mulf %551, %554 : vector<2x24xf32>
    %557 = arith.addf %555, %556 : vector<2x24xf32>
    %558 = math.tanh %557 : vector<2x24xf32>
    %559 = arith.mulf %553, %558 : vector<2x24xf32>
    %560 = vector.extract_strided_slice %323 {offsets = [2, 0], sizes = [2, 128], strides = [1, 1]} : vector<16x128xf32> to vector<2x128xf32>
    %cst_93 = arith.constant dense<0.000000e+00> : vector<2x128xf32>
    %561 = tpu.matmul %541, %325, %cst_93 {dimension_numbers = #tpu.dot_dimension_numbers<[1], [0], [0], [1], [0, 0, 1, 1], [], []>} : vector<2x24xf32>, vector<24x128xf32>, vector<2x128xf32> -> vector<2x128xf32>
    %562 = arith.addf %560, %561 : vector<2x128xf32>
    %563 = arith.negf %562 : vector<2x128xf32>
    %564 = math.exp %563 : vector<2x128xf32>
    %cst_94 = arith.constant 1.000000e+00 : f32
    %565 = vector.broadcast %cst_94 : f32 to vector<2x128xf32>
    %566 = arith.addf %565, %564 : vector<2x128xf32>
    %567 = arith.divf %565, %566 : vector<2x128xf32>
    %568 = math.tanh %562 : vector<2x128xf32>
    %569 = vector.extract_strided_slice %567 {offsets = [0, 0], sizes = [2, 24], strides = [1, 1]} : vector<2x128xf32> to vector<2x24xf32>
    %570 = vector.extract_strided_slice %567 {offsets = [0, 32], sizes = [2, 24], strides = [1, 1]} : vector<2x128xf32> to vector<2x24xf32>
    %571 = vector.extract_strided_slice %567 {offsets = [0, 64], sizes = [2, 24], strides = [1, 1]} : vector<2x128xf32> to vector<2x24xf32>
    %572 = vector.extract_strided_slice %568 {offsets = [0, 96], sizes = [2, 24], strides = [1, 1]} : vector<2x128xf32> to vector<2x24xf32>
    %573 = arith.mulf %570, %539 : vector<2x24xf32>
    %574 = arith.mulf %569, %572 : vector<2x24xf32>
    %575 = arith.addf %573, %574 : vector<2x24xf32>
    %576 = math.tanh %575 : vector<2x24xf32>
    %577 = arith.mulf %571, %576 : vector<2x24xf32>
    %578 = vector.extract_strided_slice %315 {offsets = [14, 0], sizes = [2, 128], strides = [1, 1]} : vector<16x128xf32> to vector<2x128xf32>
    %cst_95 = arith.constant dense<0.000000e+00> : vector<2x128xf32>
    %579 = tpu.matmul %559, %324, %cst_95 {dimension_numbers = #tpu.dot_dimension_numbers<[1], [0], [0], [1], [0, 0, 1, 1], [], []>} : vector<2x24xf32>, vector<24x128xf32>, vector<2x128xf32> -> vector<2x128xf32>
    %580 = arith.addf %578, %579 : vector<2x128xf32>
    %581 = arith.negf %580 : vector<2x128xf32>
    %582 = math.exp %581 : vector<2x128xf32>
    %cst_96 = arith.constant 1.000000e+00 : f32
    %583 = vector.broadcast %cst_96 : f32 to vector<2x128xf32>
    %584 = arith.addf %583, %582 : vector<2x128xf32>
    %585 = arith.divf %583, %584 : vector<2x128xf32>
    %586 = math.tanh %580 : vector<2x128xf32>
    %587 = vector.extract_strided_slice %585 {offsets = [0, 0], sizes = [2, 24], strides = [1, 1]} : vector<2x128xf32> to vector<2x24xf32>
    %588 = vector.extract_strided_slice %585 {offsets = [0, 32], sizes = [2, 24], strides = [1, 1]} : vector<2x128xf32> to vector<2x24xf32>
    %589 = vector.extract_strided_slice %585 {offsets = [0, 64], sizes = [2, 24], strides = [1, 1]} : vector<2x128xf32> to vector<2x24xf32>
    %590 = vector.extract_strided_slice %586 {offsets = [0, 96], sizes = [2, 24], strides = [1, 1]} : vector<2x128xf32> to vector<2x24xf32>
    %591 = arith.mulf %588, %557 : vector<2x24xf32>
    %592 = arith.mulf %587, %590 : vector<2x24xf32>
    %593 = arith.addf %591, %592 : vector<2x24xf32>
    %594 = math.tanh %593 : vector<2x24xf32>
    %595 = arith.mulf %589, %594 : vector<2x24xf32>
    %596 = vector.extract_strided_slice %323 {offsets = [0, 0], sizes = [2, 128], strides = [1, 1]} : vector<16x128xf32> to vector<2x128xf32>
    %cst_97 = arith.constant dense<0.000000e+00> : vector<2x128xf32>
    %597 = tpu.matmul %577, %325, %cst_97 {dimension_numbers = #tpu.dot_dimension_numbers<[1], [0], [0], [1], [0, 0, 1, 1], [], []>} : vector<2x24xf32>, vector<24x128xf32>, vector<2x128xf32> -> vector<2x128xf32>
    %598 = arith.addf %596, %597 : vector<2x128xf32>
    %599 = arith.negf %598 : vector<2x128xf32>
    %600 = math.exp %599 : vector<2x128xf32>
    %cst_98 = arith.constant 1.000000e+00 : f32
    %601 = vector.broadcast %cst_98 : f32 to vector<2x128xf32>
    %602 = arith.addf %601, %600 : vector<2x128xf32>
    %603 = arith.divf %601, %602 : vector<2x128xf32>
    %604 = math.tanh %598 : vector<2x128xf32>
    %605 = vector.extract_strided_slice %603 {offsets = [0, 0], sizes = [2, 24], strides = [1, 1]} : vector<2x128xf32> to vector<2x24xf32>
    %606 = vector.extract_strided_slice %603 {offsets = [0, 32], sizes = [2, 24], strides = [1, 1]} : vector<2x128xf32> to vector<2x24xf32>
    %607 = vector.extract_strided_slice %603 {offsets = [0, 64], sizes = [2, 24], strides = [1, 1]} : vector<2x128xf32> to vector<2x24xf32>
    %608 = vector.extract_strided_slice %604 {offsets = [0, 96], sizes = [2, 24], strides = [1, 1]} : vector<2x128xf32> to vector<2x24xf32>
    %609 = arith.mulf %606, %575 : vector<2x24xf32>
    %610 = arith.mulf %605, %608 : vector<2x24xf32>
    %611 = arith.addf %609, %610 : vector<2x24xf32>
    %612 = math.tanh %611 : vector<2x24xf32>
    %613 = arith.mulf %607, %612 : vector<2x24xf32>
    %614 = tpu.concatenate %287, %305, %595, %613 in 0 : vector<2x24xf32>, vector<2x24xf32>, vector<2x24xf32>, vector<2x24xf32> -> vector<8x24xf32>
    %615 = tpu.iota {dimensions = array<i32: 0>} : vector<8x8xi32>
    %616 = tpu.iota {dimensions = array<i32: 1>} : vector<8x8xi32>
    %617 = arith.subi %615, %616 : vector<8x8xi32>
    %c0_i32_99 = arith.constant 0 : i32
    %618 = vector.broadcast %c0_i32_99 : i32 to vector<8x8xi32>
    %619 = arith.cmpi eq, %617, %618 : vector<8x8xi32>
    %c2_i32 = arith.constant 2 : i32
    %620 = vector.broadcast %c2_i32 : i32 to vector<8x8xi32>
    %621 = arith.cmpi eq, %617, %620 : vector<8x8xi32>
    %c-2_i32 = arith.constant -2 : i32
    %622 = vector.broadcast %c-2_i32 : i32 to vector<8x8xi32>
    %623 = arith.cmpi eq, %617, %622 : vector<8x8xi32>
    %624 = arith.ori %621, %623 : vector<8x8xi1>
    %625 = arith.ori %619, %624 : vector<8x8xi1>
    %c4_i32 = arith.constant 4 : i32
    %626 = vector.broadcast %c4_i32 : i32 to vector<8x8xi32>
    %627 = arith.cmpi eq, %617, %626 : vector<8x8xi32>
    %c-4_i32 = arith.constant -4 : i32
    %628 = vector.broadcast %c-4_i32 : i32 to vector<8x8xi32>
    %629 = arith.cmpi eq, %617, %628 : vector<8x8xi32>
    %630 = arith.ori %627, %629 : vector<8x8xi1>
    %631 = arith.ori %625, %630 : vector<8x8xi1>
    %c6_i32 = arith.constant 6 : i32
    %632 = vector.broadcast %c6_i32 : i32 to vector<8x8xi32>
    %633 = arith.cmpi eq, %617, %632 : vector<8x8xi32>
    %c-6_i32 = arith.constant -6 : i32
    %634 = vector.broadcast %c-6_i32 : i32 to vector<8x8xi32>
    %635 = arith.cmpi eq, %617, %634 : vector<8x8xi32>
    %636 = arith.ori %633, %635 : vector<8x8xi1>
    %637 = arith.ori %631, %636 : vector<8x8xi1>
    %cst_100 = arith.constant 0.000000e+00 : f32
    %cst_101 = arith.constant -1.000000e+30 : f32
    %638 = vector.broadcast %cst_100 : f32 to vector<8x8xf32>
    %639 = vector.broadcast %cst_101 : f32 to vector<8x8xf32>
    %640 = arith.select %637, %638, %639 : vector<8x8xi1>, vector<8x8xf32>
    %c0_102 = arith.constant 0 : index
    %c0_103 = arith.constant 0 : index
    %641 = vector.load %arg15[%c0_102, %c0_103] : memref<24x24xf32, #tpu.memory_space<vmem>>, vector<24x24xf32>
    %cst_104 = arith.constant dense<0.000000e+00> : vector<8x24xf32>
    %642 = tpu.matmul %614, %641, %cst_104 {dimension_numbers = #tpu.dot_dimension_numbers<[1], [0], [0], [1], [0, 0, 1, 1], [], []>} : vector<8x24xf32>, vector<24x24xf32>, vector<8x24xf32> -> vector<8x24xf32>
    %c0_105 = arith.constant 0 : index
    %c0_106 = arith.constant 0 : index
    %643 = vector.load %arg16[%c0_105, %c0_106] : memref<1x24xf32, #tpu.memory_space<vmem>>, vector<1x24xf32>
    %644 = vector.broadcast %643 : vector<1x24xf32> to vector<8x24xf32>
    %645 = arith.addf %642, %644 : vector<8x24xf32>
    %c0_107 = arith.constant 0 : index
    %c0_108 = arith.constant 0 : index
    %646 = vector.load %arg17[%c0_107, %c0_108] : memref<24x24xf32, #tpu.memory_space<vmem>>, vector<24x24xf32>
    %cst_109 = arith.constant dense<0.000000e+00> : vector<8x24xf32>
    %647 = tpu.matmul %614, %646, %cst_109 {dimension_numbers = #tpu.dot_dimension_numbers<[1], [0], [0], [1], [0, 0, 1, 1], [], []>} : vector<8x24xf32>, vector<24x24xf32>, vector<8x24xf32> -> vector<8x24xf32>
    %c0_110 = arith.constant 0 : index
    %c0_111 = arith.constant 0 : index
    %648 = vector.load %arg18[%c0_110, %c0_111] : memref<1x24xf32, #tpu.memory_space<vmem>>, vector<1x24xf32>
    %649 = vector.broadcast %648 : vector<1x24xf32> to vector<8x24xf32>
    %650 = arith.addf %647, %649 : vector<8x24xf32>
    %c0_112 = arith.constant 0 : index
    %c0_113 = arith.constant 0 : index
    %651 = vector.load %arg19[%c0_112, %c0_113] : memref<24x24xf32, #tpu.memory_space<vmem>>, vector<24x24xf32>
    %cst_114 = arith.constant dense<0.000000e+00> : vector<8x24xf32>
    %652 = tpu.matmul %614, %651, %cst_114 {dimension_numbers = #tpu.dot_dimension_numbers<[1], [0], [0], [1], [0, 0, 1, 1], [], []>} : vector<8x24xf32>, vector<24x24xf32>, vector<8x24xf32> -> vector<8x24xf32>
    %c0_115 = arith.constant 0 : index
    %c0_116 = arith.constant 0 : index
    %653 = vector.load %arg20[%c0_115, %c0_116] : memref<1x24xf32, #tpu.memory_space<vmem>>, vector<1x24xf32>
    %654 = vector.broadcast %653 : vector<1x24xf32> to vector<8x24xf32>
    %655 = arith.addf %652, %654 : vector<8x24xf32>
    %cst_117 = arith.constant dense<0.000000e+00> : vector<8x8xf32>
    %656 = tpu.matmul %645, %650, %cst_117 {dimension_numbers = #tpu.dot_dimension_numbers<[1], [1], [0], [0], [0, 0, 1, 0], [], []>} : vector<8x24xf32>, vector<8x24xf32>, vector<8x8xf32> -> vector<8x8xf32>
    %cst_118 = arith.constant 0.204124153 : f32
    %657 = vector.broadcast %cst_118 : f32 to vector<8x8xf32>
    %658 = arith.mulf %656, %657 : vector<8x8xf32>
    %659 = arith.addf %658, %640 : vector<8x8xf32>
    %cst_119 = arith.constant dense<0xFF800000> : vector<8xf32>
    %660 = vector.multi_reduction <maximumf>, %659, %cst_119 [1] : vector<8x8xf32> to vector<8xf32>
    %cst_120 = arith.constant 0xFF800000 : f32
    %661 = vector.broadcast %cst_120 : f32 to vector<8xf32>
    %662 = arith.maximumf %661, %660 : vector<8xf32>
    %663 = vector.shape_cast %662 : vector<8xf32> to vector<8x1xf32>
    %664 = vector.broadcast %663 : vector<8x1xf32> to vector<8x8xf32>
    %665 = arith.subf %659, %664 : vector<8x8xf32>
    %666 = math.exp %665 : vector<8x8xf32>
    %cst_121 = arith.constant dense<0.000000e+00> : vector<8xf32>
    %667 = vector.multi_reduction <add>, %666, %cst_121 [1] : vector<8x8xf32> to vector<8xf32>
    %668 = vector.shape_cast %667 : vector<8xf32> to vector<8x1xf32>
    %669 = vector.broadcast %668 : vector<8x1xf32> to vector<8x8xf32>
    %670 = arith.divf %666, %669 : vector<8x8xf32>
    %cst_122 = arith.constant dense<0.000000e+00> : vector<8x24xf32>
    %671 = tpu.matmul %670, %655, %cst_122 {dimension_numbers = #tpu.dot_dimension_numbers<[1], [0], [0], [1], [0, 0, 1, 1], [], []>} : vector<8x8xf32>, vector<8x24xf32>, vector<8x24xf32> -> vector<8x24xf32>
    %c0_123 = arith.constant 0 : index
    %c0_124 = arith.constant 0 : index
    %672 = vector.load %arg21[%c0_123, %c0_124] : memref<24x24xf32, #tpu.memory_space<vmem>>, vector<24x24xf32>
    %cst_125 = arith.constant dense<0.000000e+00> : vector<8x24xf32>
    %673 = tpu.matmul %671, %672, %cst_125 {dimension_numbers = #tpu.dot_dimension_numbers<[1], [0], [0], [1], [0, 0, 1, 1], [], []>} : vector<8x24xf32>, vector<24x24xf32>, vector<8x24xf32> -> vector<8x24xf32>
    %c0_126 = arith.constant 0 : index
    %c0_127 = arith.constant 0 : index
    %674 = vector.load %arg22[%c0_126, %c0_127] : memref<1x24xf32, #tpu.memory_space<vmem>>, vector<1x24xf32>
    %675 = vector.broadcast %674 : vector<1x24xf32> to vector<8x24xf32>
    %676 = arith.addf %673, %675 : vector<8x24xf32>
    %677 = arith.addf %614, %676 : vector<8x24xf32>
    %cst_128 = arith.constant dense<0.000000e+00> : vector<8xf32>
    %678 = vector.multi_reduction <add>, %677, %cst_128 [1] : vector<8x24xf32> to vector<8xf32>
    %679 = vector.shape_cast %678 : vector<8xf32> to vector<8x1xf32>
    %cst_129 = arith.constant 2.400000e+01 : f32
    %680 = vector.broadcast %cst_129 : f32 to vector<8x1xf32>
    %681 = arith.divf %679, %680 : vector<8x1xf32>
    %682 = vector.broadcast %681 : vector<8x1xf32> to vector<8x24xf32>
    %683 = arith.subf %677, %682 : vector<8x24xf32>
    %684 = arith.mulf %683, %683 : vector<8x24xf32>
    %cst_130 = arith.constant dense<0.000000e+00> : vector<8xf32>
    %685 = vector.multi_reduction <add>, %684, %cst_130 [1] : vector<8x24xf32> to vector<8xf32>
    %686 = vector.shape_cast %685 : vector<8xf32> to vector<8x1xf32>
    %cst_131 = arith.constant 2.400000e+01 : f32
    %687 = vector.broadcast %cst_131 : f32 to vector<8x1xf32>
    %688 = arith.divf %686, %687 : vector<8x1xf32>
    %689 = vector.broadcast %681 : vector<8x1xf32> to vector<8x24xf32>
    %690 = arith.subf %677, %689 : vector<8x24xf32>
    %cst_132 = arith.constant 9.99999974E-6 : f32
    %691 = vector.broadcast %cst_132 : f32 to vector<8x1xf32>
    %692 = arith.addf %688, %691 : vector<8x1xf32>
    %693 = math.rsqrt %692 : vector<8x1xf32>
    %694 = vector.broadcast %693 : vector<8x1xf32> to vector<8x24xf32>
    %695 = arith.mulf %690, %694 : vector<8x24xf32>
    %c0_133 = arith.constant 0 : index
    %c0_134 = arith.constant 0 : index
    %696 = vector.load %arg23[%c0_133, %c0_134] : memref<1x24xf32, #tpu.memory_space<vmem>>, vector<1x24xf32>
    %697 = vector.broadcast %696 : vector<1x24xf32> to vector<8x24xf32>
    %698 = arith.mulf %695, %697 : vector<8x24xf32>
    %c0_135 = arith.constant 0 : index
    %c0_136 = arith.constant 0 : index
    %699 = vector.load %arg24[%c0_135, %c0_136] : memref<1x24xf32, #tpu.memory_space<vmem>>, vector<1x24xf32>
    %700 = vector.broadcast %699 : vector<1x24xf32> to vector<8x24xf32>
    %701 = arith.addf %698, %700 : vector<8x24xf32>
    %702 = vector.extract_strided_slice %701 {offsets = [6, 0], sizes = [2, 24], strides = [1, 1]} : vector<8x24xf32> to vector<2x24xf32>
    %c0_i32_137 = arith.constant 0 : i32
    %703 = tpu.memref_slice %arg38[%c0_i32_137] : memref<2x!tpu.dma_semaphore, #tpu.memory_space<semaphore_mem>> -> memref<1x!tpu.dma_semaphore, #tpu.memory_space<semaphore_mem>>
    %704 = tpu.memref_squeeze %703 : memref<1x!tpu.dma_semaphore, #tpu.memory_space<semaphore_mem>> -> memref<!tpu.dma_semaphore, #tpu.memory_space<semaphore_mem>>
    tpu.wait_dma2 semaphore(%704 : memref<!tpu.dma_semaphore, #tpu.memory_space<semaphore_mem>>) src(%arg25 : memref<24x2048xf32, #tpu.memory_space<any>>) dst(%arg36 : memref<24x2048xf32, #tpu.memory_space<vmem>>)
    %c1_i32_138 = arith.constant 1 : i32
    %705 = tpu.memref_slice %arg38[%c1_i32_138] : memref<2x!tpu.dma_semaphore, #tpu.memory_space<semaphore_mem>> -> memref<1x!tpu.dma_semaphore, #tpu.memory_space<semaphore_mem>>
    %706 = tpu.memref_squeeze %705 : memref<1x!tpu.dma_semaphore, #tpu.memory_space<semaphore_mem>> -> memref<!tpu.dma_semaphore, #tpu.memory_space<semaphore_mem>>
    tpu.wait_dma2 semaphore(%706 : memref<!tpu.dma_semaphore, #tpu.memory_space<semaphore_mem>>) src(%arg27 : memref<2048x24xf32, #tpu.memory_space<any>>) dst(%arg37 : memref<2048x24xf32, #tpu.memory_space<vmem>>)
    %c0_139 = arith.constant 0 : index
    %c0_140 = arith.constant 0 : index
    %707 = vector.load %arg36[%c0_139, %c0_140] : memref<24x2048xf32, #tpu.memory_space<vmem>>, vector<24x2048xf32>
    %cst_141 = arith.constant dense<0.000000e+00> : vector<2x2048xf32>
    %708 = tpu.matmul %702, %707, %cst_141 {dimension_numbers = #tpu.dot_dimension_numbers<[1], [0], [0], [1], [0, 0, 1, 1], [], []>} : vector<2x24xf32>, vector<24x2048xf32>, vector<2x2048xf32> -> vector<2x2048xf32>
    %c0_142 = arith.constant 0 : index
    %c0_143 = arith.constant 0 : index
    %709 = vector.load %arg26[%c0_142, %c0_143] : memref<1x2048xf32, #tpu.memory_space<vmem>>, vector<1x2048xf32>
    %710 = vector.broadcast %709 : vector<1x2048xf32> to vector<2x2048xf32>
    %711 = arith.addf %708, %710 : vector<2x2048xf32>
    %cst_144 = arith.constant 0.000000e+00 : f32
    %712 = vector.broadcast %cst_144 : f32 to vector<2x2048xf32>
    %713 = arith.maximumf %711, %712 : vector<2x2048xf32>
    %c0_145 = arith.constant 0 : index
    %c0_146 = arith.constant 0 : index
    %714 = vector.load %arg37[%c0_145, %c0_146] : memref<2048x24xf32, #tpu.memory_space<vmem>>, vector<2048x24xf32>
    %cst_147 = arith.constant dense<0.000000e+00> : vector<2x24xf32>
    %715 = tpu.matmul %713, %714, %cst_147 {dimension_numbers = #tpu.dot_dimension_numbers<[1], [0], [0], [1], [0, 0, 1, 1], [], []>} : vector<2x2048xf32>, vector<2048x24xf32>, vector<2x24xf32> -> vector<2x24xf32>
    %c0_148 = arith.constant 0 : index
    %c0_149 = arith.constant 0 : index
    %716 = vector.load %arg28[%c0_148, %c0_149] : memref<1x24xf32, #tpu.memory_space<vmem>>, vector<1x24xf32>
    %717 = vector.broadcast %716 : vector<1x24xf32> to vector<2x24xf32>
    %718 = arith.addf %715, %717 : vector<2x24xf32>
    %719 = arith.addf %702, %718 : vector<2x24xf32>
    %cst_150 = arith.constant dense<0.000000e+00> : vector<2xf32>
    %720 = vector.multi_reduction <add>, %719, %cst_150 [1] : vector<2x24xf32> to vector<2xf32>
    %721 = vector.shape_cast %720 : vector<2xf32> to vector<2x1xf32>
    %cst_151 = arith.constant 2.400000e+01 : f32
    %722 = vector.broadcast %cst_151 : f32 to vector<2x1xf32>
    %723 = arith.divf %721, %722 : vector<2x1xf32>
    %724 = vector.broadcast %723 : vector<2x1xf32> to vector<2x24xf32>
    %725 = arith.subf %719, %724 : vector<2x24xf32>
    %726 = arith.mulf %725, %725 : vector<2x24xf32>
    %cst_152 = arith.constant dense<0.000000e+00> : vector<2xf32>
    %727 = vector.multi_reduction <add>, %726, %cst_152 [1] : vector<2x24xf32> to vector<2xf32>
    %728 = vector.shape_cast %727 : vector<2xf32> to vector<2x1xf32>
    %cst_153 = arith.constant 2.400000e+01 : f32
    %729 = vector.broadcast %cst_153 : f32 to vector<2x1xf32>
    %730 = arith.divf %728, %729 : vector<2x1xf32>
    %731 = vector.broadcast %723 : vector<2x1xf32> to vector<2x24xf32>
    %732 = arith.subf %719, %731 : vector<2x24xf32>
    %cst_154 = arith.constant 9.99999974E-6 : f32
    %733 = vector.broadcast %cst_154 : f32 to vector<2x1xf32>
    %734 = arith.addf %730, %733 : vector<2x1xf32>
    %735 = math.rsqrt %734 : vector<2x1xf32>
    %736 = vector.broadcast %735 : vector<2x1xf32> to vector<2x24xf32>
    %737 = arith.mulf %732, %736 : vector<2x24xf32>
    %c0_155 = arith.constant 0 : index
    %c0_156 = arith.constant 0 : index
    %738 = vector.load %arg29[%c0_155, %c0_156] : memref<1x24xf32, #tpu.memory_space<vmem>>, vector<1x24xf32>
    %739 = vector.broadcast %738 : vector<1x24xf32> to vector<2x24xf32>
    %740 = arith.mulf %737, %739 : vector<2x24xf32>
    %c0_157 = arith.constant 0 : index
    %c0_158 = arith.constant 0 : index
    %741 = vector.load %arg30[%c0_157, %c0_158] : memref<1x24xf32, #tpu.memory_space<vmem>>, vector<1x24xf32>
    %742 = vector.broadcast %741 : vector<1x24xf32> to vector<2x24xf32>
    %743 = arith.addf %740, %742 : vector<2x24xf32>
    %c0_159 = arith.constant 0 : index
    %c0_160 = arith.constant 0 : index
    %744 = vector.load %arg31[%c0_159, %c0_160] : memref<24x24xf32, #tpu.memory_space<vmem>>, vector<24x24xf32>
    %cst_161 = arith.constant dense<0.000000e+00> : vector<2x24xf32>
    %745 = tpu.matmul %743, %744, %cst_161 {dimension_numbers = #tpu.dot_dimension_numbers<[1], [0], [0], [1], [0, 0, 1, 1], [], []>} : vector<2x24xf32>, vector<24x24xf32>, vector<2x24xf32> -> vector<2x24xf32>
    %c0_162 = arith.constant 0 : index
    %c0_163 = arith.constant 0 : index
    %746 = vector.load %arg32[%c0_162, %c0_163] : memref<1x24xf32, #tpu.memory_space<vmem>>, vector<1x24xf32>
    %747 = vector.broadcast %746 : vector<1x24xf32> to vector<2x24xf32>
    %748 = arith.addf %745, %747 : vector<2x24xf32>
    %cst_164 = arith.constant 0.000000e+00 : f32
    %749 = vector.broadcast %cst_164 : f32 to vector<2x24xf32>
    %750 = arith.maximumf %748, %749 : vector<2x24xf32>
    %c0_165 = arith.constant 0 : index
    %c0_166 = arith.constant 0 : index
    %751 = vector.load %arg33[%c0_165, %c0_166] : memref<24x2xf32, #tpu.memory_space<vmem>>, vector<24x2xf32>
    %cst_167 = arith.constant dense<0.000000e+00> : vector<2x2xf32>
    %752 = tpu.matmul %750, %751, %cst_167 {dimension_numbers = #tpu.dot_dimension_numbers<[1], [0], [0], [1], [0, 0, 1, 1], [], []>} : vector<2x24xf32>, vector<24x2xf32>, vector<2x2xf32> -> vector<2x2xf32>
    %c0_168 = arith.constant 0 : index
    %c0_169 = arith.constant 0 : index
    %753 = vector.load %arg34[%c0_168, %c0_169] : memref<1x2xf32, #tpu.memory_space<vmem>>, vector<1x2xf32>
    %754 = vector.broadcast %753 : vector<1x2xf32> to vector<2x2xf32>
    %755 = arith.addf %752, %754 : vector<2x2xf32>
    %c0_170 = arith.constant 0 : index
    %c0_171 = arith.constant 0 : index
    %756 = vector.load %arg35[%c0_170, %c0_171] : memref<2x2xf32, #tpu.memory_space<vmem>>, vector<2x2xf32>
    tpu.vector_store %arg35[%c0_170, %c0_171], %755 {strides = array<i32>} : memref<2x2xf32, #tpu.memory_space<vmem>>, vector<2x2xf32>,
    return
  }
}

</mosaic_0001>

<bundles_post_ra>
// kernel: bilstm_forward.1
= control target key start
LH: loop header
LB: loop body
LE: loop exit
PB: predicated region body
PF: predicated region fallthrough
CT: control target
= control target key end

     0   :  { %s8913_s6 = smov 1   ;;  %s8914_s10 = smov 2   ;;  %s11173_s0 = inlined_call_operand.smem [shape: u32[36], index: -1, kind: input, shape index: {}] }
   0x1   :  { %s8963_s5 = sld [smem:[%s11173_s0]]   ;;  %s8915_s14 = smov 3  }
   0x2   :  { %s8968_s9 = sld [smem:[%s11173_s0 + %s8913_s6]]   ;;  %s8916_s18 = smov 4  }
   0x3   :  { %s8973_s13 = sld [smem:[%s11173_s0 + %s8914_s10]]   ;;  %s8917_s22 = smov 5  }
   0x4   :  { %s8978_s17 = sld [smem:[%s11173_s0 + %s8915_s14]]   ;;  %s8918_s26 = smov 6  }
   0x5   :  { %s8983_s21 = sld [smem:[%s11173_s0 + %s8916_s18]]   ;;  %s8919_s30 = smov 7  }
   0x6   :  { %s8988_s25 = sld [smem:[%s11173_s0 + %s8917_s22]]   ;;  %s8920_s4 = smov 8  }
   0x7   :  { %s8993_s29 = sld [smem:[%s11173_s0 + %s8918_s26]]   ;;  %s8921_s10 = smov 9  }
   0x8   :  { %s8998_s3 = sld [smem:[%s11173_s0 + %s8919_s30]]   ;;  %s8922_s15 = smov 10  }
   0x9   :  { %s9003_s8 = sld [smem:[%s11173_s0 + %s8920_s4]]   ;;  %s8923_s20 = smov 11  }
   0xa   :  { %s9008_s14 = sld [smem:[%s11173_s0 + %s8921_s10]]   ;;  %s8924_s26 = smov 12  }
   0xb   :  { %s9013_s19 = sld [smem:[%s11173_s0 + %s8922_s15]]   ;;  %s8925_s1 = smov 13  }
   0xc   :  { %s9018_s24 = sld [smem:[%s11173_s0 + %s8923_s20]]   ;;  %s8926_s7 = smov 14  }
   0xd   :  { %s9023_s30 = sld [smem:[%s11173_s0 + %s8924_s26]]   ;;  %s8927_s15 = smov 15  }
   0xe   :  { %s9028_s6 = sld [smem:[%s11173_s0 + %s8925_s1]]   ;;  %s8928_s22 = smov 16  }
   0xf   :  { %s9033_s12 = sld [smem:[%s11173_s0 + %s8926_s7]]   ;;  %s8929_s28 = smov 17  }
  0x10   :  { %s9038_s20 = sld [smem:[%s11173_s0 + %s8927_s15]]   ;;  %s8930_s7 = smov 18  }
  0x11   :  { %11185 = sst [smem:[#allocation12_spill]] %s9013_s19  ;;  %s8931_s15 = smov 19  }
  0x12   :  { %s9043_s27 = sld [smem:[%s11173_s0 + %s8928_s22]]   ;;  %s8932_s22 = smov 20  }
  0x13   :  { %s9048_s4 = sld [smem:[%s11173_s0 + %s8929_s28]]   ;;  %s8933_s28 = smov 21  }
  0x14   :  { %11186 = sst [smem:[#allocation13_spill]] %s9028_s6 }
  0x15   :  { %11187 = sst [smem:[#allocation14_spill]] %s9033_s12 }
  0x16   :  { %11188 = sst [smem:[#allocation15_spill]] %s9038_s20 }
  0x17   :  { %s9053_s12 = sld [smem:[%s11173_s0 + %s8930_s7]]   ;;  %s8934_s7 = smov 22  }
  0x18   :  { %11189 = sst [smem:[#allocation16_spill]] %s9043_s27 }
  0x19   :  { %11190 = sst [smem:[#allocation17_spill]] %s9048_s4 }
  0x1a   :  { %s9058_s20 = sld [smem:[%s11173_s0 + %s8931_s15]]   ;;  %s8935_s15 = smov 23  }
  0x1b   :  { %s9063_s27 = sld [smem:[%s11173_s0 + %s8932_s22]]   ;;  %s8936_s22 = smov 24  }
  0x1c   :  { %s9068_s4 = sld [smem:[%s11173_s0 + %s8933_s28]]   ;;  %s8937_s28 = smov 25  }
  0x1d   :  { %11191 = sst [smem:[#allocation18_spill]] %s9053_s12 }
  0x1e   :  { %s9073_s12 = sld [smem:[%s11173_s0 + %s8934_s7]]   ;;  %s8938_s7 = smov 26  }
  0x20   :  { %11192 = sst [smem:[#allocation19_spill]] %s9058_s20 }
  0x21   :  { %11193 = sst [smem:[#allocation20_spill]] %s9063_s27 }
  0x22   :  { %11194 = sst [smem:[#allocation21_spill]] %s9068_s4 }
  0x23   :  { %s9078_s20 = sld [smem:[%s11173_s0 + %s8935_s15]]   ;;  %s8939_s15 = smov 27  }
  0x24   :  { %11195 = sst [smem:[#allocation22_spill]] %s9073_s12 }
  0x25   :  { %s9083_s27 = sld [smem:[%s11173_s0 + %s8936_s22]]   ;;  %s8940_s22 = smov 28  }
  0x26   :  { %s9088_s4 = sld [smem:[%s11173_s0 + %s8937_s28]]   ;;  %s8941_s28 = smov 29  }
  0x27   :  { %s9093_s12 = sld [smem:[%s11173_s0 + %s8938_s7]]   ;;  %s8942_s7 = smov 30  }
  0x28   :  { %s9108_s19 = sld [smem:[%s11173_s0 + %s8941_s28]]   ;;  %s8945_s28 = smov 33  }
  0x29   :  { %11196 = sst [smem:[#allocation23_spill]] %s9078_s20 }
  0x2a   :  { %s9098_s20 = sld [smem:[%s11173_s0 + %s8939_s15]]   ;;  %s8943_s15 = smov 31  }
  0x2b   :  { %11197 = sst [smem:[#allocation24_spill]] %s9083_s27 }
  0x2c   :  { %s9103_s27 = sld [smem:[%s11173_s0 + %s8940_s22]]   ;;  %s8944_s22 = smov 32  }
  0x2d   :  { %11198 = sst [smem:[#allocation25_spill]] %s9093_s12 }
  0x2e   :  { %11200 = sst [smem:[#allocation27_spill]] %s9108_s19 }
  0x2f   :  { %s9113_s12 = sld [smem:[%s11173_s0 + %s8942_s7]]   ;;  %s8946_s7 = smov 34  }
  0x30   :  { %s9118_s6 = sld [smem:[%s11173_s0 + %s8943_s15]]   ;;  %s8947_s15 = smov 35  }
  0x31   :  { %s9128_s19 = sld [smem:[%s11173_s0 + %s8945_s28]]  }
  0x32   :  { %11199 = sst [smem:[#allocation26_spill]] %s9103_s27 }
  0x33   :  { %s9123_s27 = sld [smem:[%s11173_s0 + %s8944_s22]]  }
  0x35   :  { %11201 = sst [smem:[#allocation28_spill]] %s9113_s12 }
  0x36   :  { %11202 = sst [smem:[#allocation29_spill]] %s9118_s6 }
  0x37   :  { %s9133_s12 = sld [smem:[%s11173_s0 + %s8946_s7]]  }
  0x38   :  { %s9138_s6 = sld [smem:[%s11173_s0 + %s8947_s15]]  }
  0x39   :  { %76 = vsyncpa [#allocation6], 0  ;;  %v9141_v0 = vld [vmem:[%s9088_s4] sm:$0xff]  ;;  %v9144_v1 = vld [vmem:[%s9088_s4 + $0x8] sm:$0xff] }
  0x3a   :  { %v9147_v2 = vld [vmem:[%s9088_s4 + $0x10] sm:$0xff]  ;;  %v9150_v3 = vld [vmem:[%s9088_s4 + $0x18] sm:$0xff]  ;;  %v9153_v4 = vld [vmem:[%s9088_s4 + $0x20] sm:$0xff] }
  0x3b   :  { %v9156_v5 = vld [vmem:[%s9088_s4 + $0x28] sm:$0xff]  ;;  %v9159_v6 = vld [vmem:[%s9088_s4 + $0x30] sm:$0xff]  ;;  %v9162_v7 = vld [vmem:[%s9088_s4 + $0x38] sm:$0xff] }
  0x3c   :  { %v9165_v8 = vld [vmem:[%s9088_s4 + $0x40] sm:$0xff]  ;;  %v9168_v9 = vld [vmem:[%s9088_s4 + $0x48] sm:$0xff]  ;;  %v9171_v10 = vld [vmem:[%s9088_s4 + $0x50] sm:$0xff] }
  0x3d   :  { %v9174_v11 = vld [vmem:[%s9088_s4 + $0x58] sm:$0xff]  ;;  %v9177_v12 = vld [vmem:[%s9088_s4 + $0x60] sm:$0xff]  ;;  %v9180_v13 = vld [vmem:[%s9088_s4 + $0x68] sm:$0xff] }
  0x3e   :  { %11203 = vst [vmem:[#allocation30_spill] sm:$0xff] %v9177_v12  ;;  %11204 = vst [vmem:[#allocation31_spill] sm:$0xff] %v9180_v13  ;;  %v9183_v14 = vld [vmem:[%s9088_s4 + $0x70] sm:$0xff]  ;;  %v9186_v15 = vld [vmem:[%s9088_s4 + $0x78] sm:$0xff] }
  0x3f   :  { %11205 = vst [vmem:[#allocation32_spill] sm:$0xff] %v9183_v14  ;;  %11206 = vst [vmem:[#allocation33_spill] sm:$0xff] %v9186_v15  ;;  %v9189_v16 = vld [vmem:[%s9088_s4 + $0x80] sm:$0xff]  ;;  %v9192_v17 = vld [vmem:[%s9088_s4 + $0x88] sm:$0xff] }
  0x40   :  { %v9195_v18 = vld [vmem:[%s9088_s4 + $0x90] sm:$0xff]  ;;  %v9198_v19 = vld [vmem:[%s9088_s4 + $0x98] sm:$0xff]  ;;  %v9201_v20 = vld [vmem:[%s9088_s4 + $0xa0] sm:$0xff] }
  0x41   :  { %v9204_v21 = vld [vmem:[%s9088_s4 + $0xa8] sm:$0xff]  ;;  %v9207_v22 = vld [vmem:[%s9088_s4 + $0xb0] sm:$0xff]  ;;  %v9210_v23 = vld [vmem:[%s9088_s4 + $0xb8] sm:$0xff] }
  0x42   :  { %v9213_v24 = vld [vmem:[%s9088_s4 + $0xc0] sm:$0xff]  ;;  %v9216_v25 = vld [vmem:[%s9088_s4 + $0xc8] sm:$0xff]  ;;  %v9219_v26 = vld [vmem:[%s9088_s4 + $0xd0] sm:$0xff] }
  0x43   :  { %v9222_v27 = vld [vmem:[%s9088_s4 + $0xd8] sm:$0xff]  ;;  %v9225_v28 = vld [vmem:[%s9088_s4 + $0xe0] sm:$0xff]  ;;  %v9228_v29 = vld [vmem:[%s9088_s4 + $0xe8] sm:$0xff] }
  0x44   :  { %11207 = vst [vmem:[#allocation34_spill] sm:$0xff] %v9225_v28  ;;  %11208 = vst [vmem:[#allocation35_spill] sm:$0xff] %v9228_v29  ;;  %v9231_v30 = vld [vmem:[%s9088_s4 + $0xf0] sm:$0xff]  ;;  %v9234_v31 = vld [vmem:[%s9088_s4 + $0xf8] sm:$0xff] }
  0x45   :  { %11209 = vst [vmem:[#allocation36_spill] sm:$0xff] %v9231_v30  ;;  %11210 = vst [vmem:[#allocation37_spill] sm:$0xff] %v9234_v31  ;;  %v9237_v32 = vld [vmem:[%s9088_s4 + $0x100] sm:$0xff]  ;;  %v9240_v33 = vld [vmem:[%s9088_s4 + $0x108] sm:$0xff] }
  0x46   :  { %v9243_v34 = vld [vmem:[%s9088_s4 + $0x110] sm:$0xff]  ;;  %v9246_v35 = vld [vmem:[%s9088_s4 + $0x118] sm:$0xff]  ;;  %v9249_v36 = vld [vmem:[%s9088_s4 + $0x120] sm:$0xff] }
  0x47   :  { %v9252_v37 = vld [vmem:[%s9088_s4 + $0x128] sm:$0xff]  ;;  %v9255_v38 = vld [vmem:[%s9088_s4 + $0x130] sm:$0xff]  ;;  %v9258_v39 = vld [vmem:[%s9088_s4 + $0x138] sm:$0xff] }
  0x48   :  { %v9261_v40 = vld [vmem:[%s9088_s4 + $0x140] sm:$0xff]  ;;  %v9264_v41 = vld [vmem:[%s9088_s4 + $0x148] sm:$0xff]  ;;  %v9267_v42 = vld [vmem:[%s9088_s4 + $0x150] sm:$0xff] }
  0x49   :  { %11211 = vst [vmem:[#allocation38_spill] sm:$0xff] %v9261_v40  ;;  %11212 = vst [vmem:[#allocation39_spill] sm:$0xff] %v9264_v41  ;;  %v9270_v43 = vld [vmem:[%s9088_s4 + $0x158] sm:$0xff]  ;;  %v9273_v44 = vld [vmem:[%s9088_s4 + $0x160] sm:$0xff] }
  0x4a   :  { %11213 = vst [vmem:[#allocation40_spill] sm:$0xff] %v9267_v42  ;;  %11214 = vst [vmem:[#allocation41_spill] sm:$0xff] %v9270_v43  ;;  %v9276_v45 = vld [vmem:[%s9088_s4 + $0x168] sm:$0xff]  ;;  %v9279_v46 = vld [vmem:[%s9088_s4 + $0x170] sm:$0xff] }
  0x4b   :  { %11215 = vst [vmem:[#allocation42_spill] sm:$0xff] %v9273_v44  ;;  %11216 = vst [vmem:[#allocation43_spill] sm:$0xff] %v9276_v45  ;;  %v9282_v47 = vld [vmem:[%s9088_s4 + $0x178] sm:$0xff] }
  0x4c   :  { %11217 = vst [vmem:[#allocation44_spill] sm:$0xff] %v9279_v46  ;;  %11218 = vst [vmem:[#allocation45_spill] sm:$0xff] %v9282_v47 }
  0x4d   :  { %278 = vsyncadd [#allocation4], 6144  ;;  %v9285_v48 = vld [vmem:[%s9098_s20] sm:$0xff]  ;;  %v9288_v49 = vld [vmem:[%s9098_s20 + $0x8] sm:$0xff]  ;;  %vm844_vm0 = vcmask 195584  }
  0x4e   :  { %11219 = vst [vmem:[#allocation46_spill] sm:$0xff] %v9285_v48  ;;  %11220 = vst [vmem:[#allocation47_spill] sm:$0xff] %v9288_v49  ;;  %v9291_v50 = vld [vmem:[%s9098_s20 + $0x10] sm:$0xff]  ;;  %v9294_v51 = vld [vmem:[%s9098_s20 + $0x18] sm:$0xff] }
  0x4f   :  { %11221 = vst [vmem:[#allocation48_spill] sm:$0xff] %v9291_v50  ;;  %11222 = vst [vmem:[#allocation49_spill] sm:$0xff] %v9294_v51  ;;  %v9297_v52 = vld [vmem:[%s9098_s20 + $0x20] sm:$0xff]  ;;  %v9300_v53 = vld [vmem:[%s9098_s20 + $0x28] sm:$0xff] }
  0x50   :  { %11223 = vst [vmem:[#allocation50_spill] sm:$0xff] %v9297_v52  ;;  %11224 = vst [vmem:[#allocation51_spill] sm:$0xff] %v9300_v53  ;;  %v9303_v54 = vld [vmem:[%s9098_s20 + $0x30] sm:$0xff]  ;;  %v9306_v55 = vld [vmem:[%s9098_s20 + $0x38] sm:$0xff] }
  0x51   :  { %11225 = vst [vmem:[#allocation52_spill] sm:$0xff] %v9303_v54  ;;  %11226 = vst [vmem:[#allocation53_spill] sm:$0xff] %v9306_v55  ;;  %v9309_v56 = vld [vmem:[%s9098_s20 + $0x40] sm:$0xff]  ;;  %v9312_v57 = vld [vmem:[%s9098_s20 + $0x48] sm:$0xff] }
  0x52   :  { %11227 = vst [vmem:[#allocation54_spill] sm:$0xff] %v9309_v56  ;;  %11228 = vst [vmem:[#allocation55_spill] sm:$0xff] %v9312_v57  ;;  %v9315_v58 = vld [vmem:[%s9098_s20 + $0x50] sm:$0xff]  ;;  %v9318_v59 = vld [vmem:[%s9098_s20 + $0x58] sm:$0xff] }
  0x53   :  { %11229 = vst [vmem:[#allocation56_spill] sm:$0xff] %v9315_v58  ;;  %11230 = vst [vmem:[#allocation57_spill] sm:$0xff] %v9318_v59  ;;  %v9321_v60 = vld [vmem:[%s9098_s20 + $0x60] sm:$0xff]  ;;  %v9324_v61 = vld [vmem:[%s9098_s20 + $0x68] sm:$0xff] }
  0x54   :  { %11231 = vst [vmem:[#allocation58_spill] sm:$0xff] %v9321_v60  ;;  %11232 = vst [vmem:[#allocation59_spill] sm:$0xff] %v9324_v61  ;;  %v9327_v62 = vld [vmem:[%s9098_s20 + $0x70] sm:$0xff]  ;;  %v9330_v63 = vld [vmem:[%s9098_s20 + $0x78] sm:$0xff] }
  0x55   :  { %11233 = vst [vmem:[#allocation60_spill] sm:$0xff] %v9327_v62  ;;  %11234 = vst [vmem:[#allocation61_spill] sm:$0xff] %v9330_v63  ;;  %v9333_v57 = vld [vmem:[%s9098_s20 + $0x80] sm:$0xff]  ;;  %v9336_v58 = vld [vmem:[%s9098_s20 + $0x88] sm:$0xff] }
  0x56   :  { %11235 = vst [vmem:[#allocation62_spill] sm:$0xff] %v9333_v57  ;;  %11236 = vst [vmem:[#allocation63_spill] sm:$0xff] %v9336_v58  ;;  %v9339_v59 = vld [vmem:[%s9098_s20 + $0x90] sm:$0xff]  ;;  %v9342_v60 = vld [vmem:[%s9098_s20 + $0x98] sm:$0xff] }
  0x57   :  { %11237 = vst [vmem:[#allocation64_spill] sm:$0xff] %v9339_v59  ;;  %11238 = vst [vmem:[#allocation65_spill] sm:$0xff] %v9342_v60  ;;  %v9345_v61 = vld [vmem:[%s9098_s20 + $0xa0] sm:$0xff]  ;;  %v9348_v62 = vld [vmem:[%s9098_s20 + $0xa8] sm:$0xff] }
  0x58   :  { %11239 = vst [vmem:[#allocation66_spill] sm:$0xff] %v9345_v61  ;;  %11240 = vst [vmem:[#allocation67_spill] sm:$0xff] %v9348_v62  ;;  %v9351_v63 = vld [vmem:[%s9098_s20 + $0xb0] sm:$0xff]  ;;  %v9354_v56 = vld [vmem:[%s9098_s20 + $0xb8] sm:$0xff] }
  0x59   :  { %11241 = vst [vmem:[#allocation68_spill] sm:$0xff] %v9351_v63  ;;  %11242 = vst [vmem:[#allocation69_spill] sm:$0xff] %v9354_v56  ;;  %v9357_v55 = vld [vmem:[%s9098_s20 + $0xc0] sm:$0xff]  ;;  %v9360_v54 = vld [vmem:[%s9098_s20 + $0xc8] sm:$0xff] }
  0x5a   :  { %11243 = vst [vmem:[#allocation70_spill] sm:$0xff] %v9357_v55  ;;  %11244 = vst [vmem:[#allocation71_spill] sm:$0xff] %v9360_v54  ;;  %v9363_v53 = vld [vmem:[%s9098_s20 + $0xd0] sm:$0xff]  ;;  %v9366_v52 = vld [vmem:[%s9098_s20 + $0xd8] sm:$0xff] }
  0x5b   :  { %11245 = vst [vmem:[#allocation72_spill] sm:$0xff] %v9363_v53  ;;  %11246 = vst [vmem:[#allocation73_spill] sm:$0xff] %v9366_v52  ;;  %v9369_v62 = vld [vmem:[%s9098_s20 + $0xe0] sm:$0xff]  ;;  %v9372_v63 = vld [vmem:[%s9098_s20 + $0xe8] sm:$0xff] }
  0x5c   :  { %11247 = vst [vmem:[#allocation74_spill] sm:$0xff] %v9369_v62  ;;  %11248 = vst [vmem:[#allocation75_spill] sm:$0xff] %v9372_v63  ;;  %v9375_v56 = vld [vmem:[%s9098_s20 + $0xf0] sm:$0xff]  ;;  %v9378_v55 = vld [vmem:[%s9098_s20 + $0xf8] sm:$0xff] }
  0x5d   :  { %11249 = vst [vmem:[#allocation76_spill] sm:$0xff] %v9375_v56  ;;  %11250 = vst [vmem:[#allocation77_spill] sm:$0xff] %v9378_v55  ;;  %v9381_v54 = vld [vmem:[%s9098_s20 + $0x100] sm:$0xff]  ;;  %v9384_v53 = vld [vmem:[%s9098_s20 + $0x108] sm:$0xff] }
  0x5e   :  { %11251 = vst [vmem:[#allocation78_spill] sm:$0xff] %v9381_v54  ;;  %11252 = vst [vmem:[#allocation79_spill] sm:$0xff] %v9384_v53  ;;  %v9387_v52 = vld [vmem:[%s9098_s20 + $0x110] sm:$0xff]  ;;  %v9390_v62 = vld [vmem:[%s9098_s20 + $0x118] sm:$0xff] }
  0x5f   :  { %11253 = vst [vmem:[#allocation80_spill] sm:$0xff] %v9387_v52  ;;  %11254 = vst [vmem:[#allocation81_spill] sm:$0xff] %v9390_v62  ;;  %v9393_v63 = vld [vmem:[%s9098_s20 + $0x120] sm:$0xff]  ;;  %v9396_v56 = vld [vmem:[%s9098_s20 + $0x128] sm:$0xff] }
  0x60   :  { %11255 = vst [vmem:[#allocation82_spill] sm:$0xff] %v9393_v63  ;;  %11256 = vst [vmem:[#allocation83_spill] sm:$0xff] %v9396_v56  ;;  %v9399_v55 = vld [vmem:[%s9098_s20 + $0x130] sm:$0xff]  ;;  %v9402_v61 = vld [vmem:[%s9098_s20 + $0x138] sm:$0xff] }
  0x61   :  { %11257 = vst [vmem:[#allocation84_spill] sm:$0xff] %v9399_v55  ;;  %11258 = vst [vmem:[#allocation85_spill] sm:$0xff] %v9402_v61  ;;  %v9405_v51 = vld [vmem:[%s9098_s20 + $0x140] sm:$0xff]  ;;  %v9408_v52 = vld [vmem:[%s9098_s20 + $0x148] sm:$0xff] }
  0x62   :  { %11259 = vst [vmem:[#allocation86_spill] sm:$0xff] %v9405_v51  ;;  %11260 = vst [vmem:[#allocation87_spill] sm:$0xff] %v9408_v52  ;;  %v9411_v62 = vld [vmem:[%s9098_s20 + $0x150] sm:$0xff]  ;;  %v9414_v63 = vld [vmem:[%s9098_s20 + $0x158] sm:$0xff] }
  0x63   :  { %11261 = vst [vmem:[#allocation88_spill] sm:$0xff] %v9411_v62  ;;  %11262 = vst [vmem:[#allocation89_spill] sm:$0xff] %v9414_v63  ;;  %v9417_v56 = vld [vmem:[%s9098_s20 + $0x160] sm:$0xff]  ;;  %v9420_v55 = vld [vmem:[%s9098_s20 + $0x168] sm:$0xff] }
  0x64   :  { %11263 = vst [vmem:[#allocation90_spill] sm:$0xff] %v9417_v56  ;;  %11264 = vst [vmem:[#allocation91_spill] sm:$0xff] %v9420_v55  ;;  %v9423_v61 = vld [vmem:[%s9098_s20 + $0x170] sm:$0xff]  ;;  %v9426_v51 = vld [vmem:[%s9098_s20 + $0x178] sm:$0xff] }
  0x65   :  { %11265 = vst [vmem:[#allocation92_spill] sm:$0xff] %v9423_v61  ;;  %11266 = vst [vmem:[#allocation93_spill] sm:$0xff] %v9426_v51  ;;  %v9429_v52 = vld [vmem:[%s9098_s20 + $0x180] sm:$0xff]  ;;  %v9432_v62 = vld [vmem:[%s9098_s20 + $0x188] sm:$0xff] }
  0x66   :  { %11267 = vst [vmem:[#allocation94_spill] sm:$0xff] %v9429_v52  ;;  %11268 = vst [vmem:[#allocation95_spill] sm:$0xff] %v9432_v62  ;;  %v9435_v63 = vld [vmem:[%s9098_s20 + $0x190] sm:$0xff]  ;;  %v9438_v56 = vld [vmem:[%s9098_s20 + $0x198] sm:$0xff] }
  0x67   :  { %11269 = vst [vmem:[#allocation96_spill] sm:$0xff] %v9435_v63  ;;  %11270 = vst [vmem:[#allocation97_spill] sm:$0xff] %v9438_v56  ;;  %v9441_v55 = vld [vmem:[%s9098_s20 + $0x1a0] sm:$0xff]  ;;  %v9444_v61 = vld [vmem:[%s9098_s20 + $0x1a8] sm:$0xff] }
  0x68   :  { %11271 = vst [vmem:[#allocation98_spill] sm:$0xff] %v9441_v55  ;;  %11272 = vst [vmem:[#allocation99_spill] sm:$0xff] %v9444_v61  ;;  %v9447_v51 = vld [vmem:[%s9098_s20 + $0x1b0] sm:$0xff]  ;;  %v9450_v50 = vld [vmem:[%s9098_s20 + $0x1b8] sm:$0xff] }
  0x69   :  { %11273 = vst [vmem:[#allocation100_spill] sm:$0xff] %v9447_v51  ;;  %11274 = vst [vmem:[#allocation101_spill] sm:$0xff] %v9450_v50  ;;  %v9453_v60 = vld [vmem:[%s9098_s20 + $0x1c0] sm:$0xff]  ;;  %v9456_v63 = vld [vmem:[%s9098_s20 + $0x1c8] sm:$0xff] }
  0x6a   :  { %11275 = vst [vmem:[#allocation102_spill] sm:$0xff] %v9453_v60  ;;  %11276 = vst [vmem:[#allocation103_spill] sm:$0xff] %v9456_v63  ;;  %v9459_v56 = vld [vmem:[%s9098_s20 + $0x1d0] sm:$0xff]  ;;  %v9462_v55 = vld [vmem:[%s9098_s20 + $0x1d8] sm:$0xff] }
  0x6b   :  { %11277 = vst [vmem:[#allocation104_spill] sm:$0xff] %v9459_v56  ;;  %11278 = vst [vmem:[#allocation105_spill] sm:$0xff] %v9462_v55  ;;  %v9465_v61 = vld [vmem:[%s9098_s20 + $0x1e0] sm:$0xff]  ;;  %v9468_v51 = vld [vmem:[%s9098_s20 + $0x1e8] sm:$0xff] }
  0x6c   :  { %11279 = vst [vmem:[#allocation106_spill] sm:$0xff] %v9465_v61  ;;  %11280 = vst [vmem:[#allocation107_spill] sm:$0xff] %v9468_v51  ;;  %v9471_v50 = vld [vmem:[%s9098_s20 + $0x1f0] sm:$0xff]  ;;  %v9474_v60 = vld [vmem:[%s9098_s20 + $0x1f8] sm:$0xff] }
  0x6d   :  { %11281 = vst [vmem:[#allocation108_spill] sm:$0xff] %v9471_v50  ;;  %11282 = vst [vmem:[#allocation109_spill] sm:$0xff] %v9474_v60  ;;  %v9477_v63 = vld [vmem:[%s9098_s20 + $0x200] sm:$0xff]  ;;  %v9480_v56 = vld [vmem:[%s9098_s20 + $0x208] sm:$0xff] }
  0x6e   :  { %11283 = vst [vmem:[#allocation110_spill] sm:$0xff] %v9477_v63  ;;  %11284 = vst [vmem:[#allocation111_spill] sm:$0xff] %v9480_v56  ;;  %v9483_v55 = vld [vmem:[%s9098_s20 + $0x210] sm:$0xff]  ;;  %v9486_v61 = vld [vmem:[%s9098_s20 + $0x218] sm:$0xff] }
  0x6f   :  { %11285 = vst [vmem:[#allocation112_spill] sm:$0xff] %v9483_v55  ;;  %11286 = vst [vmem:[#allocation113_spill] sm:$0xff] %v9486_v61  ;;  %v9489_v51 = vld [vmem:[%s9098_s20 + $0x220] sm:$0xff]  ;;  %v9492_v50 = vld [vmem:[%s9098_s20 + $0x228] sm:$0xff] }
  0x70   :  { %11287 = vst [vmem:[#allocation114_spill] sm:$0xff] %v9489_v51  ;;  %11288 = vst [vmem:[#allocation115_spill] sm:$0xff] %v9492_v50  ;;  %v9495_v60 = vld [vmem:[%s9098_s20 + $0x230] sm:$0xff]  ;;  %v9498_v63 = vld [vmem:[%s9098_s20 + $0x238] sm:$0xff] }
  0x71   :  { %11289 = vst [vmem:[#allocation116_spill] sm:$0xff] %v9495_v60  ;;  %11290 = vst [vmem:[#allocation117_spill] sm:$0xff] %v9498_v63  ;;  %v9501_v56 = vld [vmem:[%s9098_s20 + $0x240] sm:$0xff]  ;;  %v9504_v55 = vld [vmem:[%s9098_s20 + $0x248] sm:$0xff] }
  0x72   :  { %11291 = vst [vmem:[#allocation118_spill] sm:$0xff] %v9501_v56  ;;  %11292 = vst [vmem:[#allocation119_spill] sm:$0xff] %v9504_v55  ;;  %v9507_v61 = vld [vmem:[%s9098_s20 + $0x250] sm:$0xff]  ;;  %v9510_v51 = vld [vmem:[%s9098_s20 + $0x258] sm:$0xff] }
  0x73   :  { %11293 = vst [vmem:[#allocation120_spill] sm:$0xff] %v9507_v61  ;;  %11294 = vst [vmem:[#allocation121_spill] sm:$0xff] %v9510_v51  ;;  %v9513_v50 = vld [vmem:[%s9098_s20 + $0x260] sm:$0xff]  ;;  %v9516_v60 = vld [vmem:[%s9098_s20 + $0x268] sm:$0xff] }
  0x74   :  { %11295 = vst [vmem:[#allocation122_spill] sm:$0xff] %v9513_v50  ;;  %11296 = vst [vmem:[#allocation123_spill] sm:$0xff] %v9516_v60  ;;  %v9519_v63 = vld [vmem:[%s9098_s20 + $0x270] sm:$0xff]  ;;  %v9522_v56 = vld [vmem:[%s9098_s20 + $0x278] sm:$0xff] }
  0x75   :  { %11297 = vst [vmem:[#allocation124_spill] sm:$0xff] %v9519_v63  ;;  %11298 = vst [vmem:[#allocation125_spill] sm:$0xff] %v9522_v56  ;;  %v9525_v55 = vld [vmem:[%s9098_s20 + $0x280] sm:$0xff]  ;;  %v9528_v61 = vld [vmem:[%s9098_s20 + $0x288] sm:$0xff] }
  0x76   :  { %11299 = vst [vmem:[#allocation126_spill] sm:$0xff] %v9525_v55  ;;  %11300 = vst [vmem:[#allocation127_spill] sm:$0xff] %v9528_v61  ;;  %v9531_v51 = vld [vmem:[%s9098_s20 + $0x290] sm:$0xff]  ;;  %v9534_v50 = vld [vmem:[%s9098_s20 + $0x298] sm:$0xff] }
  0x77   :  { %11301 = vst [vmem:[#allocation128_spill] sm:$0xff] %v9531_v51  ;;  %11302 = vst [vmem:[#allocation129_spill] sm:$0xff] %v9534_v50  ;;  %v9537_v60 = vld [vmem:[%s9098_s20 + $0x2a0] sm:$0xff]  ;;  %v9540_v63 = vld [vmem:[%s9098_s20 + $0x2a8] sm:$0xff] }
  0x78   :  { %11303 = vst [vmem:[#allocation130_spill] sm:$0xff] %v9537_v60  ;;  %11304 = vst [vmem:[#allocation131_spill] sm:$0xff] %v9540_v63  ;;  %v9543_v56 = vld [vmem:[%s9098_s20 + $0x2b0] sm:$0xff]  ;;  %v9546_v55 = vld [vmem:[%s9098_s20 + $0x2b8] sm:$0xff] }
  0x79   :  { %11305 = vst [vmem:[#allocation132_spill] sm:$0xff] %v9543_v56  ;;  %11306 = vst [vmem:[#allocation133_spill] sm:$0xff] %v9546_v55  ;;  %v9549_v61 = vld [vmem:[%s9098_s20 + $0x2c0] sm:$0xff]  ;;  %v9552_v51 = vld [vmem:[%s9098_s20 + $0x2c8] sm:$0xff] }
  0x7a   :  { %11307 = vst [vmem:[#allocation134_spill] sm:$0xff] %v9549_v61  ;;  %11308 = vst [vmem:[#allocation135_spill] sm:$0xff] %v9552_v51  ;;  %v9555_v50 = vld [vmem:[%s9098_s20 + $0x2d0] sm:$0xff]  ;;  %v9558_v60 = vld [vmem:[%s9098_s20 + $0x2d8] sm:$0xff] }
  0x7b   :  { %11309 = vst [vmem:[#allocation136_spill] sm:$0xff] %v9555_v50  ;;  %11310 = vst [vmem:[#allocation137_spill] sm:$0xff] %v9558_v60  ;;  %v9561_v63 = vld [vmem:[%s9098_s20 + $0x2e0] sm:$0xff]  ;;  %v9564_v56 = vld [vmem:[%s9098_s20 + $0x2e8] sm:$0xff] }
  0x7c   :  { %11311 = vst [vmem:[#allocation138_spill] sm:$0xff] %v9561_v63  ;;  %11312 = vst [vmem:[#allocation139_spill] sm:$0xff] %v9564_v56  ;;  %v9567_v55 = vld [vmem:[%s9098_s20 + $0x2f0] sm:$0xff]  ;;  %v9570_v61 = vld [vmem:[%s9098_s20 + $0x2f8] sm:$0xff] }
  0x7d   :  { %11313 = vst [vmem:[#allocation140_spill] sm:$0xff] %v9567_v55  ;;  %11314 = vst [vmem:[#allocation141_spill] sm:$0xff] %v9570_v61  ;;  %v9573_v51 = vld [vmem:[%s9098_s20 + $0x300] sm:$0xff]  ;;  %v9576_v50 = vld [vmem:[%s9098_s20 + $0x308] sm:$0xff] }
  0x7e   :  { %11315 = vst [vmem:[#allocation142_spill] sm:$0xff] %v9573_v51  ;;  %11316 = vst [vmem:[#allocation143_spill] sm:$0xff] %v9576_v50  ;;  %v9579_v60 = vld [vmem:[%s9098_s20 + $0x310] sm:$0xff]  ;;  %v9582_v63 = vld [vmem:[%s9098_s20 + $0x318] sm:$0xff] }
  0x7f   :  { %11317 = vst [vmem:[#allocation144_spill] sm:$0xff] %v9579_v60  ;;  %11318 = vst [vmem:[#allocation145_spill] sm:$0xff] %v9582_v63  ;;  %v9585_v56 = vld [vmem:[%s9098_s20 + $0x320] sm:$0xff]  ;;  %v9588_v55 = vld [vmem:[%s9098_s20 + $0x328] sm:$0xff] }
  0x80   :  { %11319 = vst [vmem:[#allocation146_spill] sm:$0xff] %v9585_v56  ;;  %11320 = vst [vmem:[#allocation147_spill] sm:$0xff] %v9588_v55  ;;  %v9591_v61 = vld [vmem:[%s9098_s20 + $0x330] sm:$0xff]  ;;  %v9594_v51 = vld [vmem:[%s9098_s20 + $0x338] sm:$0xff] }
  0x81   :  { %11321 = vst [vmem:[#allocation148_spill] sm:$0xff] %v9591_v61  ;;  %11322 = vst [vmem:[#allocation149_spill] sm:$0xff] %v9594_v51  ;;  %v9597_v50 = vld [vmem:[%s9098_s20 + $0x340] sm:$0xff]  ;;  %v9600_v60 = vld [vmem:[%s9098_s20 + $0x348] sm:$0xff] }
  0x82   :  { %11323 = vst [vmem:[#allocation150_spill] sm:$0xff] %v9597_v50  ;;  %11324 = vst [vmem:[#allocation151_spill] sm:$0xff] %v9600_v60  ;;  %v9603_v63 = vld [vmem:[%s9098_s20 + $0x350] sm:$0xff]  ;;  %v9606_v56 = vld [vmem:[%s9098_s20 + $0x358] sm:$0xff] }
  0x83   :  { %11325 = vst [vmem:[#allocation152_spill] sm:$0xff] %v9603_v63  ;;  %11326 = vst [vmem:[#allocation153_spill] sm:$0xff] %v9606_v56  ;;  %v9609_v55 = vld [vmem:[%s9098_s20 + $0x360] sm:$0xff]  ;;  %v9612_v61 = vld [vmem:[%s9098_s20 + $0x368] sm:$0xff] }
  0x84   :  { %11327 = vst [vmem:[#allocation154_spill] sm:$0xff] %v9609_v55  ;;  %11328 = vst [vmem:[#allocation155_spill] sm:$0xff] %v9612_v61  ;;  %v9615_v51 = vld [vmem:[%s9098_s20 + $0x370] sm:$0xff]  ;;  %v9618_v50 = vld [vmem:[%s9098_s20 + $0x378] sm:$0xff] }
  0x85   :  { %11329 = vst [vmem:[#allocation156_spill] sm:$0xff] %v9615_v51  ;;  %11330 = vst [vmem:[#allocation157_spill] sm:$0xff] %v9618_v50  ;;  %v9621_v60 = vld [vmem:[%s9098_s20 + $0x380] sm:$0xff]  ;;  %v9624_v63 = vld [vmem:[%s9098_s20 + $0x388] sm:$0xff] }
  0x86   :  { %11331 = vst [vmem:[#allocation158_spill] sm:$0xff] %v9621_v60  ;;  %11332 = vst [vmem:[#allocation159_spill] sm:$0xff] %v9624_v63  ;;  %v9627_v56 = vld [vmem:[%s9098_s20 + $0x390] sm:$0xff]  ;;  %v9630_v55 = vld [vmem:[%s9098_s20 + $0x398] sm:$0xff] }
  0x87   :  { %11333 = vst [vmem:[#allocation160_spill] sm:$0xff] %v9627_v56  ;;  %11334 = vst [vmem:[#allocation161_spill] sm:$0xff] %v9630_v55  ;;  %v9633_v61 = vld [vmem:[%s9098_s20 + $0x3a0] sm:$0xff]  ;;  %v9636_v51 = vld [vmem:[%s9098_s20 + $0x3a8] sm:$0xff] }
  0x88   :  { %11335 = vst [vmem:[#allocation162_spill] sm:$0xff] %v9633_v61  ;;  %11336 = vst [vmem:[#allocation163_spill] sm:$0xff] %v9636_v51  ;;  %v9639_v50 = vld [vmem:[%s9098_s20 + $0x3b0] sm:$0xff]  ;;  %v9642_v60 = vld [vmem:[%s9098_s20 + $0x3b8] sm:$0xff] }
  0x89   :  { %11337 = vst [vmem:[#allocation164_spill] sm:$0xff] %v9639_v50  ;;  %11338 = vst [vmem:[#allocation165_spill] sm:$0xff] %v9642_v60  ;;  %v9645_v63 = vld [vmem:[%s9098_s20 + $0x3c0] sm:$0xff]  ;;  %v9648_v56 = vld [vmem:[%s9098_s20 + $0x3c8] sm:$0xff] }
  0x8a   :  { %11339 = vst [vmem:[#allocation166_spill] sm:$0xff] %v9645_v63  ;;  %11340 = vst [vmem:[#allocation167_spill] sm:$0xff] %v9648_v56  ;;  %v9651_v55 = vld [vmem:[%s9098_s20 + $0x3d0] sm:$0xff]  ;;  %v9654_v61 = vld [vmem:[%s9098_s20 + $0x3d8] sm:$0xff] }
  0x8b   :  { %11341 = vst [vmem:[#allocation168_spill] sm:$0xff] %v9651_v55  ;;  %11342 = vst [vmem:[#allocation169_spill] sm:$0xff] %v9654_v61  ;;  %v9657_v51 = vld [vmem:[%s9098_s20 + $0x3e0] sm:$0xff]  ;;  %v9660_v50 = vld [vmem:[%s9098_s20 + $0x3e8] sm:$0xff] }
  0x8c   :  { %11343 = vst [vmem:[#allocation170_spill] sm:$0xff] %v9657_v51  ;;  %11344 = vst [vmem:[#allocation171_spill] sm:$0xff] %v9660_v50  ;;  %v9663_v60 = vld [vmem:[%s9098_s20 + $0x3f0] sm:$0xff]  ;;  %v9666_v63 = vld [vmem:[%s9098_s20 + $0x3f8] sm:$0xff] }
  0x8d   :  { %11345 = vst [vmem:[#allocation172_spill] sm:$0xff] %v9663_v60  ;;  %11346 = vst [vmem:[#allocation173_spill] sm:$0xff] %v9666_v63  ;;  %v9669_v56 = vld [vmem:[%s9098_s20 + $0x400] sm:$0xff]  ;;  %v9672_v55 = vld [vmem:[%s9098_s20 + $0x408] sm:$0xff] }
  0x8e   :  { %11347 = vst [vmem:[#allocation174_spill] sm:$0xff] %v9669_v56  ;;  %11348 = vst [vmem:[#allocation175_spill] sm:$0xff] %v9672_v55  ;;  %v9675_v61 = vld [vmem:[%s9098_s20 + $0x410] sm:$0xff]  ;;  %v9678_v51 = vld [vmem:[%s9098_s20 + $0x418] sm:$0xff] }
  0x8f   :  { %11349 = vst [vmem:[#allocation176_spill] sm:$0xff] %v9675_v61  ;;  %11350 = vst [vmem:[#allocation177_spill] sm:$0xff] %v9678_v51  ;;  %v9681_v50 = vld [vmem:[%s9098_s20 + $0x420] sm:$0xff]  ;;  %v9684_v60 = vld [vmem:[%s9098_s20 + $0x428] sm:$0xff] }
  0x90   :  { %11351 = vst [vmem:[#allocation178_spill] sm:$0xff] %v9681_v50  ;;  %11352 = vst [vmem:[#allocation179_spill] sm:$0xff] %v9684_v60  ;;  %v9687_v63 = vld [vmem:[%s9098_s20 + $0x430] sm:$0xff]  ;;  %v9690_v56 = vld [vmem:[%s9098_s20 + $0x438] sm:$0xff] }
  0x91   :  { %11353 = vst [vmem:[#allocation180_spill] sm:$0xff] %v9687_v63  ;;  %11354 = vst [vmem:[#allocation181_spill] sm:$0xff] %v9690_v56  ;;  %v9693_v55 = vld [vmem:[%s9098_s20 + $0x440] sm:$0xff]  ;;  %v9696_v61 = vld [vmem:[%s9098_s20 + $0x448] sm:$0xff] }
  0x92   :  { %11355 = vst [vmem:[#allocation182_spill] sm:$0xff] %v9693_v55  ;;  %11356 = vst [vmem:[#allocation183_spill] sm:$0xff] %v9696_v61  ;;  %v9699_v51 = vld [vmem:[%s9098_s20 + $0x450] sm:$0xff]  ;;  %v9702_v50 = vld [vmem:[%s9098_s20 + $0x458] sm:$0xff] }
  0x93   :  { %11357 = vst [vmem:[#allocation184_spill] sm:$0xff] %v9699_v51  ;;  %11358 = vst [vmem:[#allocation185_spill] sm:$0xff] %v9702_v50  ;;  %v9705_v60 = vld [vmem:[%s9098_s20 + $0x460] sm:$0xff]  ;;  %v9708_v63 = vld [vmem:[%s9098_s20 + $0x468] sm:$0xff] }
  0x94   :  { %11359 = vst [vmem:[#allocation186_spill] sm:$0xff] %v9705_v60  ;;  %11360 = vst [vmem:[#allocation187_spill] sm:$0xff] %v9708_v63  ;;  %v9711_v56 = vld [vmem:[%s9098_s20 + $0x470] sm:$0xff]  ;;  %v9714_v55 = vld [vmem:[%s9098_s20 + $0x478] sm:$0xff] }
  0x95   :  { %11361 = vst [vmem:[#allocation188_spill] sm:$0xff] %v9711_v56  ;;  %11362 = vst [vmem:[#allocation189_spill] sm:$0xff] %v9714_v55  ;;  %v9717_v61 = vld [vmem:[%s9098_s20 + $0x480] sm:$0xff]  ;;  %v9720_v51 = vld [vmem:[%s9098_s20 + $0x488] sm:$0xff] }
  0x96   :  { %11363 = vst [vmem:[#allocation190_spill] sm:$0xff] %v9717_v61  ;;  %11364 = vst [vmem:[#allocation191_spill] sm:$0xff] %v9720_v51  ;;  %v9723_v50 = vld [vmem:[%s9098_s20 + $0x490] sm:$0xff]  ;;  %v9726_v60 = vld [vmem:[%s9098_s20 + $0x498] sm:$0xff] }
  0x97   :  { %11365 = vst [vmem:[#allocation192_spill] sm:$0xff] %v9723_v50  ;;  %11366 = vst [vmem:[#allocation193_spill] sm:$0xff] %v9726_v60  ;;  %v9729_v63 = vld [vmem:[%s9098_s20 + $0x4a0] sm:$0xff]  ;;  %v9732_v56 = vld [vmem:[%s9098_s20 + $0x4a8] sm:$0xff] }
  0x98   :  { %11367 = vst [vmem:[#allocation194_spill] sm:$0xff] %v9729_v63  ;;  %11368 = vst [vmem:[#allocation195_spill] sm:$0xff] %v9732_v56  ;;  %v9735_v55 = vld [vmem:[%s9098_s20 + $0x4b0] sm:$0xff]  ;;  %v9738_v61 = vld [vmem:[%s9098_s20 + $0x4b8] sm:$0xff] }
  0x99   :  { %11369 = vst [vmem:[#allocation196_spill] sm:$0xff] %v9735_v55  ;;  %11370 = vst [vmem:[#allocation197_spill] sm:$0xff] %v9738_v61  ;;  %v9741_v51 = vld [vmem:[%s9098_s20 + $0x4c0] sm:$0xff]  ;;  %v9744_v50 = vld [vmem:[%s9098_s20 + $0x4c8] sm:$0xff] }
  0x9a   :  { %11371 = vst [vmem:[#allocation198_spill] sm:$0xff] %v9741_v51  ;;  %11372 = vst [vmem:[#allocation199_spill] sm:$0xff] %v9744_v50  ;;  %v9747_v60 = vld [vmem:[%s9098_s20 + $0x4d0] sm:$0xff]  ;;  %v9750_v63 = vld [vmem:[%s9098_s20 + $0x4d8] sm:$0xff] }
  0x9b   :  { %11373 = vst [vmem:[#allocation200_spill] sm:$0xff] %v9747_v60  ;;  %11374 = vst [vmem:[#allocation201_spill] sm:$0xff] %v9750_v63  ;;  %v9753_v56 = vld [vmem:[%s9098_s20 + $0x4e0] sm:$0xff]  ;;  %v9756_v55 = vld [vmem:[%s9098_s20 + $0x4e8] sm:$0xff] }
  0x9c   :  { %11375 = vst [vmem:[#allocation202_spill] sm:$0xff] %v9753_v56  ;;  %11376 = vst [vmem:[#allocation203_spill] sm:$0xff] %v9756_v55  ;;  %v9759_v61 = vld [vmem:[%s9098_s20 + $0x4f0] sm:$0xff]  ;;  %v9762_v51 = vld [vmem:[%s9098_s20 + $0x4f8] sm:$0xff] }
  0x9d   :  { %11377 = vst [vmem:[#allocation204_spill] sm:$0xff] %v9759_v61  ;;  %11378 = vst [vmem:[#allocation205_spill] sm:$0xff] %v9762_v51  ;;  %v9765_v50 = vld [vmem:[%s9098_s20 + $0x500] sm:$0xff]  ;;  %v9768_v60 = vld [vmem:[%s9098_s20 + $0x508] sm:$0xff] }
  0x9e   :  { %11379 = vst [vmem:[#allocation206_spill] sm:$0xff] %v9765_v50  ;;  %11380 = vst [vmem:[#allocation207_spill] sm:$0xff] %v9768_v60  ;;  %v9771_v63 = vld [vmem:[%s9098_s20 + $0x510] sm:$0xff]  ;;  %v9774_v56 = vld [vmem:[%s9098_s20 + $0x518] sm:$0xff] }
  0x9f   :  { %11381 = vst [vmem:[#allocation208_spill] sm:$0xff] %v9771_v63  ;;  %11382 = vst [vmem:[#allocation209_spill] sm:$0xff] %v9774_v56  ;;  %v9777_v55 = vld [vmem:[%s9098_s20 + $0x520] sm:$0xff]  ;;  %v9780_v61 = vld [vmem:[%s9098_s20 + $0x528] sm:$0xff] }
  0xa0   :  { %11383 = vst [vmem:[#allocation210_spill] sm:$0xff] %v9777_v55  ;;  %11384 = vst [vmem:[#allocation211_spill] sm:$0xff] %v9780_v61  ;;  %v9783_v51 = vld [vmem:[%s9098_s20 + $0x530] sm:$0xff]  ;;  %v9786_v50 = vld [vmem:[%s9098_s20 + $0x538] sm:$0xff] }
  0xa1   :  { %11385 = vst [vmem:[#allocation212_spill] sm:$0xff] %v9783_v51  ;;  %11386 = vst [vmem:[#allocation213_spill] sm:$0xff] %v9786_v50  ;;  %v9789_v60 = vld [vmem:[%s9098_s20 + $0x540] sm:$0xff]  ;;  %v9792_v63 = vld [vmem:[%s9098_s20 + $0x548] sm:$0xff] }
  0xa2   :  { %11387 = vst [vmem:[#allocation214_spill] sm:$0xff] %v9789_v60  ;;  %11388 = vst [vmem:[#allocation215_spill] sm:$0xff] %v9792_v63  ;;  %v9795_v56 = vld [vmem:[%s9098_s20 + $0x550] sm:$0xff]  ;;  %v9798_v55 = vld [vmem:[%s9098_s20 + $0x558] sm:$0xff] }
  0xa3   :  { %11389 = vst [vmem:[#allocation216_spill] sm:$0xff] %v9795_v56  ;;  %11390 = vst [vmem:[#allocation217_spill] sm:$0xff] %v9798_v55  ;;  %v9801_v61 = vld [vmem:[%s9098_s20 + $0x560] sm:$0xff]  ;;  %v9804_v51 = vld [vmem:[%s9098_s20 + $0x568] sm:$0xff] }
  0xa4   :  { %11391 = vst [vmem:[#allocation218_spill] sm:$0xff] %v9801_v61  ;;  %11392 = vst [vmem:[#allocation219_spill] sm:$0xff] %v9804_v51  ;;  %v9807_v50 = vld [vmem:[%s9098_s20 + $0x570] sm:$0xff]  ;;  %v9810_v60 = vld [vmem:[%s9098_s20 + $0x578] sm:$0xff] }
  0xa5   :  { %11393 = vst [vmem:[#allocation220_spill] sm:$0xff] %v9807_v50  ;;  %11394 = vst [vmem:[#allocation221_spill] sm:$0xff] %v9810_v60  ;;  %v9813_v63 = vld [vmem:[%s9098_s20 + $0x580] sm:$0xff]  ;;  %v9816_v56 = vld [vmem:[%s9098_s20 + $0x588] sm:$0xff] }
  0xa6   :  { %11395 = vst [vmem:[#allocation222_spill] sm:$0xff] %v9813_v63  ;;  %11396 = vst [vmem:[#allocation223_spill] sm:$0xff] %v9816_v56  ;;  %v9819_v55 = vld [vmem:[%s9098_s20 + $0x590] sm:$0xff]  ;;  %v9822_v61 = vld [vmem:[%s9098_s20 + $0x598] sm:$0xff] }
  0xa7   :  { %11397 = vst [vmem:[#allocation224_spill] sm:$0xff] %v9819_v55  ;;  %11398 = vst [vmem:[#allocation225_spill] sm:$0xff] %v9822_v61  ;;  %v9825_v51 = vld [vmem:[%s9098_s20 + $0x5a0] sm:$0xff]  ;;  %v9828_v50 = vld [vmem:[%s9098_s20 + $0x5a8] sm:$0xff] }
  0xa8   :  { %11399 = vst [vmem:[#allocation226_spill] sm:$0xff] %v9825_v51  ;;  %11400 = vst [vmem:[#allocation227_spill] sm:$0xff] %v9828_v50  ;;  %v9831_v60 = vld [vmem:[%s9098_s20 + $0x5b0] sm:$0xff]  ;;  %v9834_v63 = vld [vmem:[%s9098_s20 + $0x5b8] sm:$0xff] }
  0xa9   :  { %11401 = vst [vmem:[#allocation228_spill] sm:$0xff] %v9831_v60  ;;  %11402 = vst [vmem:[#allocation229_spill] sm:$0xff] %v9834_v63  ;;  %v9837_v56 = vld [vmem:[%s9098_s20 + $0x5c0] sm:$0xff]  ;;  %v9840_v55 = vld [vmem:[%s9098_s20 + $0x5c8] sm:$0xff] }
  0xaa   :  { %11403 = vst [vmem:[#allocation230_spill] sm:$0xff] %v9837_v56  ;;  %11404 = vst [vmem:[#allocation231_spill] sm:$0xff] %v9840_v55  ;;  %v9843_v61 = vld [vmem:[%s9098_s20 + $0x5d0] sm:$0xff]  ;;  %v9846_v51 = vld [vmem:[%s9098_s20 + $0x5d8] sm:$0xff] }
  0xab   :  { %11405 = vst [vmem:[#allocation232_spill] sm:$0xff] %v9843_v61  ;;  %11406 = vst [vmem:[#allocation233_spill] sm:$0xff] %v9846_v51  ;;  %v9849_v50 = vld [vmem:[%s9098_s20 + $0x5e0] sm:$0xff]  ;;  %v9852_v60 = vld [vmem:[%s9098_s20 + $0x5e8] sm:$0xff] }
  0xac   :  { %11407 = vst [vmem:[#allocation234_spill] sm:$0xff] %v9849_v50  ;;  %11408 = vst [vmem:[#allocation235_spill] sm:$0xff] %v9852_v60  ;;  %v9855_v63 = vld [vmem:[%s9098_s20 + $0x5f0] sm:$0xff]  ;;  %v9858_v56 = vld [vmem:[%s9098_s20 + $0x5f8] sm:$0xff] }
  0xad   :  { %11409 = vst [vmem:[#allocation236_spill] sm:$0xff] %v9855_v63  ;;  %11410 = vst [vmem:[#allocation237_spill] sm:$0xff] %v9858_v56  ;;  %v9861_v55 = vld [vmem:[%s9098_s20 + $0x600] sm:$0xff]  ;;  %v9864_v61 = vld [vmem:[%s9098_s20 + $0x608] sm:$0xff] }
  0xae   :  { %11411 = vst [vmem:[#allocation238_spill] sm:$0xff] %v9861_v55  ;;  %11412 = vst [vmem:[#allocation239_spill] sm:$0xff] %v9864_v61  ;;  %v9867_v51 = vld [vmem:[%s9098_s20 + $0x610] sm:$0xff]  ;;  %v9870_v50 = vld [vmem:[%s9098_s20 + $0x618] sm:$0xff] }
  0xaf   :  { %11413 = vst [vmem:[#allocation240_spill] sm:$0xff] %v9867_v51  ;;  %11414 = vst [vmem:[#allocation241_spill] sm:$0xff] %v9870_v50  ;;  %v9873_v60 = vld [vmem:[%s9098_s20 + $0x620] sm:$0xff]  ;;  %v9876_v63 = vld [vmem:[%s9098_s20 + $0x628] sm:$0xff] }
  0xb0   :  { %11415 = vst [vmem:[#allocation242_spill] sm:$0xff] %v9873_v60  ;;  %11416 = vst [vmem:[#allocation243_spill] sm:$0xff] %v9876_v63  ;;  %v9879_v56 = vld [vmem:[%s9098_s20 + $0x630] sm:$0xff]  ;;  %v9882_v55 = vld [vmem:[%s9098_s20 + $0x638] sm:$0xff] }
  0xb1   :  { %11417 = vst [vmem:[#allocation244_spill] sm:$0xff] %v9879_v56  ;;  %11418 = vst [vmem:[#allocation245_spill] sm:$0xff] %v9882_v55  ;;  %v9885_v61 = vld [vmem:[%s9098_s20 + $0x640] sm:$0xff]  ;;  %v9888_v51 = vld [vmem:[%s9098_s20 + $0x648] sm:$0xff] }
  0xb2   :  { %11419 = vst [vmem:[#allocation246_spill] sm:$0xff] %v9885_v61  ;;  %11420 = vst [vmem:[#allocation247_spill] sm:$0xff] %v9888_v51  ;;  %v9891_v50 = vld [vmem:[%s9098_s20 + $0x650] sm:$0xff]  ;;  %v9894_v60 = vld [vmem:[%s9098_s20 + $0x658] sm:$0xff] }
  0xb3   :  { %11421 = vst [vmem:[#allocation248_spill] sm:$0xff] %v9891_v50  ;;  %11422 = vst [vmem:[#allocation249_spill] sm:$0xff] %v9894_v60  ;;  %v9897_v63 = vld [vmem:[%s9098_s20 + $0x660] sm:$0xff]  ;;  %v9900_v56 = vld [vmem:[%s9098_s20 + $0x668] sm:$0xff] }
  0xb4   :  { %11423 = vst [vmem:[#allocation250_spill] sm:$0xff] %v9897_v63  ;;  %11424 = vst [vmem:[#allocation251_spill] sm:$0xff] %v9900_v56  ;;  %v9903_v55 = vld [vmem:[%s9098_s20 + $0x670] sm:$0xff]  ;;  %v9906_v61 = vld [vmem:[%s9098_s20 + $0x678] sm:$0xff] }
  0xb5   :  { %11425 = vst [vmem:[#allocation252_spill] sm:$0xff] %v9903_v55  ;;  %11426 = vst [vmem:[#allocation253_spill] sm:$0xff] %v9906_v61  ;;  %v9909_v51 = vld [vmem:[%s9098_s20 + $0x680] sm:$0xff]  ;;  %v9912_v50 = vld [vmem:[%s9098_s20 + $0x688] sm:$0xff] }
  0xb6   :  { %11427 = vst [vmem:[#allocation254_spill] sm:$0xff] %v9909_v51  ;;  %11428 = vst [vmem:[#allocation255_spill] sm:$0xff] %v9912_v50  ;;  %v9915_v60 = vld [vmem:[%s9098_s20 + $0x690] sm:$0xff]  ;;  %v9918_v63 = vld [vmem:[%s9098_s20 + $0x698] sm:$0xff] }
  0xb7   :  { %11429 = vst [vmem:[#allocation256_spill] sm:$0xff] %v9915_v60  ;;  %11430 = vst [vmem:[#allocation257_spill] sm:$0xff] %v9918_v63  ;;  %v9921_v56 = vld [vmem:[%s9098_s20 + $0x6a0] sm:$0xff]  ;;  %v9924_v55 = vld [vmem:[%s9098_s20 + $0x6a8] sm:$0xff] }
  0xb8   :  { %11431 = vst [vmem:[#allocation258_spill] sm:$0xff] %v9921_v56  ;;  %11432 = vst [vmem:[#allocation259_spill] sm:$0xff] %v9924_v55  ;;  %v9927_v61 = vld [vmem:[%s9098_s20 + $0x6b0] sm:$0xff]  ;;  %v9930_v51 = vld [vmem:[%s9098_s20 + $0x6b8] sm:$0xff] }
  0xb9   :  { %11433 = vst [vmem:[#allocation260_spill] sm:$0xff] %v9927_v61  ;;  %11434 = vst [vmem:[#allocation261_spill] sm:$0xff] %v9930_v51  ;;  %v9933_v50 = vld [vmem:[%s9098_s20 + $0x6c0] sm:$0xff]  ;;  %v9936_v60 = vld [vmem:[%s9098_s20 + $0x6c8] sm:$0xff] }
  0xba   :  { %11435 = vst [vmem:[#allocation262_spill] sm:$0xff] %v9933_v50  ;;  %11436 = vst [vmem:[#allocation263_spill] sm:$0xff] %v9936_v60  ;;  %v9939_v63 = vld [vmem:[%s9098_s20 + $0x6d0] sm:$0xff]  ;;  %v9942_v56 = vld [vmem:[%s9098_s20 + $0x6d8] sm:$0xff] }
  0xbb   :  { %11437 = vst [vmem:[#allocation264_spill] sm:$0xff] %v9939_v63  ;;  %11438 = vst [vmem:[#allocation265_spill] sm:$0xff] %v9942_v56  ;;  %v9945_v55 = vld [vmem:[%s9098_s20 + $0x6e0] sm:$0xff]  ;;  %v9948_v61 = vld [vmem:[%s9098_s20 + $0x6e8] sm:$0xff] }
  0xbc   :  { %11439 = vst [vmem:[#allocation266_spill] sm:$0xff] %v9945_v55  ;;  %11440 = vst [vmem:[#allocation267_spill] sm:$0xff] %v9948_v61  ;;  %v9951_v51 = vld [vmem:[%s9098_s20 + $0x6f0] sm:$0xff]  ;;  %v9954_v50 = vld [vmem:[%s9098_s20 + $0x6f8] sm:$0xff] }
  0xbd   :  { %11441 = vst [vmem:[#allocation268_spill] sm:$0xff] %v9951_v51  ;;  %11442 = vst [vmem:[#allocation269_spill] sm:$0xff] %v9954_v50  ;;  %v9957_v60 = vld [vmem:[%s9098_s20 + $0x700] sm:$0xff]  ;;  %v9960_v63 = vld [vmem:[%s9098_s20 + $0x708] sm:$0xff] }
  0xbe   :  { %11443 = vst [vmem:[#allocation270_spill] sm:$0xff] %v9957_v60  ;;  %11444 = vst [vmem:[#allocation271_spill] sm:$0xff] %v9960_v63  ;;  %v9963_v56 = vld [vmem:[%s9098_s20 + $0x710] sm:$0xff]  ;;  %v9966_v55 = vld [vmem:[%s9098_s20 + $0x718] sm:$0xff] }
  0xbf   :  { %11445 = vst [vmem:[#allocation272_spill] sm:$0xff] %v9963_v56  ;;  %11446 = vst [vmem:[#allocation273_spill] sm:$0xff] %v9966_v55  ;;  %v9969_v61 = vld [vmem:[%s9098_s20 + $0x720] sm:$0xff]  ;;  %v9972_v51 = vld [vmem:[%s9098_s20 + $0x728] sm:$0xff] }
  0xc0   :  { %11447 = vst [vmem:[#allocation274_spill] sm:$0xff] %v9969_v61  ;;  %11448 = vst [vmem:[#allocation275_spill] sm:$0xff] %v9972_v51  ;;  %v9975_v50 = vld [vmem:[%s9098_s20 + $0x730] sm:$0xff]  ;;  %v9978_v60 = vld [vmem:[%s9098_s20 + $0x738] sm:$0xff] }
  0xc1   :  { %11449 = vst [vmem:[#allocation276_spill] sm:$0xff] %v9975_v50  ;;  %11450 = vst [vmem:[#allocation277_spill] sm:$0xff] %v9978_v60  ;;  %v9981_v63 = vld [vmem:[%s9098_s20 + $0x740] sm:$0xff]  ;;  %v9984_v56 = vld [vmem:[%s9098_s20 + $0x748] sm:$0xff] }
  0xc2   :  { %11451 = vst [vmem:[#allocation278_spill] sm:$0xff] %v9981_v63  ;;  %11452 = vst [vmem:[#allocation279_spill] sm:$0xff] %v9984_v56  ;;  %v9987_v55 = vld [vmem:[%s9098_s20 + $0x750] sm:$0xff]  ;;  %v9990_v61 = vld [vmem:[%s9098_s20 + $0x758] sm:$0xff] }
  0xc3   :  { %11453 = vst [vmem:[#allocation280_spill] sm:$0xff] %v9987_v55  ;;  %11454 = vst [vmem:[#allocation281_spill] sm:$0xff] %v9990_v61  ;;  %v9993_v51 = vld [vmem:[%s9098_s20 + $0x760] sm:$0xff]  ;;  %v9996_v50 = vld [vmem:[%s9098_s20 + $0x768] sm:$0xff] }
  0xc4   :  { %11455 = vst [vmem:[#allocation282_spill] sm:$0xff] %v9993_v51  ;;  %11456 = vst [vmem:[#allocation283_spill] sm:$0xff] %v9996_v50  ;;  %v9999_v60 = vld [vmem:[%s9098_s20 + $0x770] sm:$0xff]  ;;  %v10002_v63 = vld [vmem:[%s9098_s20 + $0x778] sm:$0xff] }
  0xc5   :  { %11457 = vst [vmem:[#allocation284_spill] sm:$0xff] %v9999_v60  ;;  %11458 = vst [vmem:[#allocation285_spill] sm:$0xff] %v10002_v63  ;;  %v10005_v56 = vld [vmem:[%s9098_s20 + $0x780] sm:$0xff]  ;;  %v10008_v55 = vld [vmem:[%s9098_s20 + $0x788] sm:$0xff] }
  0xc6   :  { %11459 = vst [vmem:[#allocation286_spill] sm:$0xff] %v10005_v56  ;;  %11460 = vst [vmem:[#allocation287_spill] sm:$0xff] %v10008_v55  ;;  %v10011_v61 = vld [vmem:[%s9098_s20 + $0x790] sm:$0xff]  ;;  %v10014_v59 = vld [vmem:[%s9098_s20 + $0x798] sm:$0xff] }
  0xc7   :  { %11461 = vst [vmem:[#allocation288_spill] sm:$0xff] %v10011_v61  ;;  %11462 = vst [vmem:[#allocation289_spill] sm:$0xff] %v10014_v59  ;;  %v10017_v51 = vld [vmem:[%s9098_s20 + $0x7a0] sm:$0xff]  ;;  %v10020_v50 = vld [vmem:[%s9098_s20 + $0x7a8] sm:$0xff] }
  0xc8   :  { %11463 = vst [vmem:[#allocation290_spill] sm:$0xff] %v10017_v51  ;;  %11464 = vst [vmem:[#allocation291_spill] sm:$0xff] %v10020_v50  ;;  %v10023_v60 = vld [vmem:[%s9098_s20 + $0x7b0] sm:$0xff]  ;;  %v10026_v46 = vld [vmem:[%s9098_s20 + $0x7b8] sm:$0xff] }
  0xc9   :  { %11465 = vst [vmem:[#allocation292_spill] sm:$0xff] %v10023_v60  ;;  %11466 = vst [vmem:[#allocation293_spill] sm:$0xff] %v10026_v46  ;;  %v10029_v63 = vld [vmem:[%s9098_s20 + $0x7c0] sm:$0xff]  ;;  %v10032_v56 = vld [vmem:[%s9098_s20 + $0x7c8] sm:$0xff] }
  0xca   :  { %11467 = vst [vmem:[#allocation294_spill] sm:$0xff] %v10029_v63  ;;  %11468 = vst [vmem:[#allocation295_spill] sm:$0xff] %v10032_v56  ;;  %v10035_v44 = vld [vmem:[%s9098_s20 + $0x7d0] sm:$0xff]  ;;  %v10038_v55 = vld [vmem:[%s9098_s20 + $0x7d8] sm:$0xff] }
  0xcb   :  { %11469 = vst [vmem:[#allocation296_spill] sm:$0xff] %v10035_v44  ;;  %11470 = vst [vmem:[#allocation297_spill] sm:$0xff] %v10038_v55  ;;  %v10041_v61 = vld [vmem:[%s9098_s20 + $0x7e0] sm:$0xff]  ;;  %v10044_v59 = vld [vmem:[%s9098_s20 + $0x7e8] sm:$0xff] }
  0xcc   :  { %11471 = vst [vmem:[#allocation298_spill] sm:$0xff] %v10041_v61  ;;  %11472 = vst [vmem:[#allocation299_spill] sm:$0xff] %v10044_v59  ;;  %v10047_v51 = vld [vmem:[%s9098_s20 + $0x7f0] sm:$0xff]  ;;  %v10050_v53 = vld [vmem:[%s9098_s20 + $0x7f8] sm:$0xff] }
  0xcd   :  { %11473 = vst [vmem:[#allocation300_spill] sm:$0xff] %v10047_v51  ;;  %11474 = vst [vmem:[#allocation301_spill] sm:$0xff] %v10050_v53  ;;  %v926_v50 = vld [vmem:[%s8983_s21] sm:$0xff]  ;;  %v927_v60 = vld [vmem:[%s8983_s21 + $0x8] sm:$0xff] }
  0xce   :  { %v8153_v46 = vpack.c.bf16 %v927_v60, %v926_v50  ;;  %v832_v54 = vld [vmem:[%s8963_s5] sm:$0xff] }
  0xcf   :  { %831 = vsyncadd [#allocation4 + $0x1], 32768  ;;  %v834_v61 = vld [vmem:[%s8968_s9] sm:$0xff]  ;;  %v928_v59 = vld [vmem:[%s8983_s21 + $0x10] sm:$0xff]  ;;  %7758 = vmatprep.mubr.msk.f32.mxu1 %vm844_vm0, %v832_v54  ;;  %7749 = vmatprep.mubr.msk.f32.mxu0 %vm844_vm0, %v832_v54  ;;  %v11183_v54 = vmov 0.0|0.0   ;;  %vm8950_vm1 = vmmov 0  }
  0xd0   :  { %v835_v53 = vld [vmem:[%s8968_s9 + $0x8] sm:$0xff]  ;;  %8154 = vmatprep.subr.bf16.mxu1 %v8153_v46  ;;  %v1014_v60 = vld [vmem:[%s8988_s25] sm:$0xff]  ;;  %v836_v55 = vld [vmem:[%s8968_s9 + $0x10] sm:$0xff]  ;;  %s8951_s0 = smov 32   ;;  %vm2699_vm2 = vcmask 1041408   ;;  %vm2701_vm3 = vcmask 1043456  }
  0xd1   :  { %v8149_v50 = vpack.c.bf16 %v835_v53, %v834_v61  ;;  %v1015_v51 = vld [vmem:[%s8988_s25 + $0x8] sm:$0xff]  ;;  %8156 = vmatpush3.bf16.msra.mxu1 %v8153_v46  ;;  %v1011_v63 = vld [vmem:[%s8973_s13] sm:$0xff]  ;;  %v11181_v46 = vmov 0.0   ;;  %vm2703_vm4 = vcmask 1045504   ;;  %s11477_s9 = sld [smem:[#allocation13_spill]]  ;;  %s11480_s21 = sld [smem:[#allocation15_spill]] }
  0xd2   :  { %7756 = vmatprep.subr.mxu1 %v928_v59  ;;  %v833_v44 = vld [vmem:[%s8963_s5 + $0x8] sm:$0xff]  ;;  %v10064_v56 = vpack.c.bf16 %v1015_v51, %v1014_v60  ;;  %v10075_v51 = vld [vmem:[%s8988_s25 + $0x10] sm:$0xff]  ;;  %s8952_s5 = smov 64   ;;  %s11481_s25 = sld [smem:[#allocation17_spill]] }
  0xd3   :  { %8150 = vmatprep.subr.bf16.mxu0 %v8149_v50  ;;  %v1012_v49 = vld [vmem:[%s8973_s13 + $0x8] sm:$0xff]  ;;  %s11488_s20 = sld [smem:[#allocation23_spill]]  ;;  %s11489_s4 = sld [smem:[#allocation24_spill]] }
  0xd4   :  { %8152 = vmatpush3.bf16.msra.mxu0 %v8149_v50  ;;  %v10070_v53 = vpack.c.bf16 %v1012_v49, %v1011_v63  ;;  %v10087_v49 = vld [vmem:[%s8973_s13 + $0x10] sm:$0xff]  ;;  %v7171_v50 = vld [vmem:[%s8978_s17] ss:$0 sm:$0xff]  ;;  %s11478_s13 = sld [smem:[#allocation12_spill]]  ;;  %s11479_s17 = sld [smem:[#allocation14_spill]] }
  0xd5   :  { %7747 = vmatprep.subr.mxu0 %v836_v55  ;;  %7757 = vmatpush3.msra.mxu1 %v928_v59 }
  0xd6   :  { %7759 = vmatmul.mubr.msk.f32.vlgmr.msra.gmra.mrb[0].mxu1 %vm844_vm0, %v833_v44  ;;  %8160 = vmatprep.subr.bf16.mxu1 %v11183_v54 }
  0xd7   :  { %8162 = vmatpush3.bf16.msra.mxu1 %v10064_v56  ;;  %7776 = vmatprep.mubr.msk.f32.mxu1 %vm8950_vm1, %v11181_v46 }
  0xd8   :  { %7748 = vmatpush3.msra.mxu0 %v836_v55  ;;  %7774 = vmatprep.subr.mxu1 %v11181_v46 }
  0xd9   :  { %8157 = vmatprep.subr.bf16.mxu0 %v11183_v54  ;;  %7750 = vmatmul.mubr.msk.f32.vlgmr.msra.gmra.mrb[0].mxu0 %vm844_vm0, %v833_v44  ;;  %v7174_v44 = vld [vmem:[%s8993_s29] ss:$0 sm:$0xff]  ;;  %s11482_s29 = sld [smem:[#allocation19_spill]] }
  0xda   :  { %8159 = vmatpush3.bf16.msra.mxu0 %v10070_v53  ;;  %7767 = vmatprep.mubr.msk.f32.mxu0 %vm8950_vm1, %v11181_v46 }
  0xdb   :  { %7775 = vmatpush3.msra.mxu1 %v10075_v51  ;;  %7765 = vmatprep.subr.mxu0 %v11181_v46 }
  0xdc   :  { %7777 = vmatmul.mubr.f32.vlgmr.msra.gmra.mrb[2].mxu1 %v11181_v46  ;;  %8166 = vmatprep.subr.bf16.mxu1 %v11183_v54 }
  0xdd   :  { %8168 = vmatpush3.bf16.msra.mxu1 %v10064_v56  ;;  %7794 = vmatprep.mubr.msk.f32.mxu1 %vm8950_vm1, %v11181_v46 }
  0xde   :  { %7766 = vmatpush3.msra.mxu0 %v10087_v49  ;;  %7792 = vmatprep.subr.mxu1 %v11181_v46 }
  0xdf   :  { %7768 = vmatmul.mubr.f32.vlgmr.msra.gmra.mrb[2].mxu0 %v11181_v46  ;;  %8163 = vmatprep.subr.bf16.mxu0 %v11183_v54 }
  0xe0   :  { %8165 = vmatpush3.bf16.msra.mxu0 %v10070_v53  ;;  %7785 = vmatprep.mubr.msk.f32.mxu0 %vm8950_vm1, %v11181_v46 }
  0xe1   :  { %7793 = vmatpush3.msra.mxu1 %v10075_v51  ;;  %7783 = vmatprep.subr.mxu0 %v11181_v46 }
  0xe2   :  { %8172 = vmatprep.subr.bf16.mxu1 %v11183_v54 }
  0xe4   :  { %7784 = vmatpush3.msra.mxu0 %v10087_v49 }
  0xe5   :  { %8169 = vmatprep.subr.bf16.mxu0 %v11183_v54 }
 0x1a9   :  { %v7760_v55 = vpop.f32.mrb[0].mxu1 }
 0x1aa   :  { %v1002_v59 = vpop.f32.mrb[1].mxu1  ;;  %v10114_v46 = vadd.f32 %v7760_v55, %v7174_v44 }
 0x1ab   :  { %v10107_v61 = vadd.f32 %v7174_v44, %v1002_v59 }
 0x1ac   :  { %v7751_v63 = vpop.f32.mrb[0].mxu0 }
 0x1ad   :  { %v10110_v60 = vadd.f32 %v7751_v63, %v7171_v50  ;;  %v917_v48 = vpop.f32.mrb[1].mxu0 }
 0x1ae   :  { %v10112_v52 = vadd.f32 %v7171_v50, %v917_v48 }
 0x1af   :  { %v1181_v62 = vpop.f32.mrb[2].mxu1 }
 0x1b0   :  { %v1186_v58 = vrot.slane %v1181_v62, 2  ;;  %v7778_v57 = vpop.f32.mrb[3].mxu1 }
 0x1b2   :  { %v1188_v47 = vadd.f32 %v1186_v58, %v10114_v46  ;;  %v1086_v54 = vpop.f32.mrb[2].mxu0 }
 0x1b3   :  { %v1090_v45 = vadd.f32 %v1086_v54, %v10112_v52  ;;  %v7769_v42 = vpop.f32.mrb[3].mxu0 }
 0x1b4   :  { %8621 = vtanh.f32 %v1188_v47  ;;  %v7178_v48 = vmul.f32 -1.442695, %v1188_v47 }
 0x1b5   :  { %8623 = vtanh.f32 %v1090_v45  ;;  %v7177_v44 = vmul.f32 -1.442695, %v1090_v45 }
 0x1b6   :  { %8625 = vpow2.f32 %v7178_v48 }
 0x1b7   :  { %8627 = vpow2.f32 %v7177_v44 }
 0x1be   :  { %v8622_v59 = vpop.eup %8621 }
 0x1bf   :  { %1198 = vrot.lane.b32.xlu0 %v8622_v59, %s8951_s0  ;;  %v8624_v63 = vpop.eup %8623 }
 0x1c0   :  { %v8626_v57 = vpop.eup %8625 }
 0x1c1   :  { %v1192_v62 = vadd.f32 1.0, %v8626_v57  ;;  %v8628_v58 = vpop.eup %8627 }
 0x1c2   :  { %v1094_v55 = vadd.f32 1.0, %v8628_v58 }
 0x1c3   :  { %1100 = vrot.lane.b32.xlu0 %v8624_v63, %s8951_s0  ;;  %8629 = vrcp.f32 %v1192_v62 }
 0x1c4   :  { %8631 = vrcp.f32 %v1094_v55 }
 0x1cd   :  { %v8630_v42 = vpop.eup %8629 }
 0x1ce   :  { %v8632_v40 = vpop.eup %8631  ;;  %v1196_v47 = vmul.f32 0.0, %v8630_v42 }
 0x1cf   :  { %v1098_v48 = vmul.f32 0.0, %v8632_v40 }
 0x231   :  { %v1199_v54 = vpop.permute.xlu0 %1198 }
 0x232   :  { %v1201_v50 = vmul.f32 %v8630_v42, %v1199_v54 }
 0x234   :  { %1203 = vrot.lane.b32.xlu1 %v1201_v50, %s8951_s0 }
 0x235   :  { %v1101_v59 = vpop.permute.xlu0 %1100 }
 0x236   :  { %v1103_v30 = vmul.f32 %v8632_v40, %v1101_v59 }
 0x238   :  { %1105 = vrot.lane.b32.xlu1 %v1103_v30, %s8951_s0 }
 0x2a6   :  { %v1204_v63 = vpop.permute.xlu1 %1203 }
 0x2a7   :  { %v10122_v45 = vadd.f32 %v1204_v63, %v1196_v47 }
 0x2a9   :  { %8633 = vtanh.f32 %v10122_v45 }
 0x2aa   :  { %v1106_v44 = vpop.permute.xlu1 %1105 }
 0x2ab   :  { %v10125_v57 = vadd.f32 %v1106_v44, %v1098_v48  ;;  %v11475_v48 = vmov 0.0  }
 0x2ad   :  { %8635 = vtanh.f32 %v10125_v57 }
 0x2b3   :  { %v8634_v62 = vpop.eup %8633 }
 0x2b4   :  { %1209 = vrot.lane.b32.xlu0 %v8634_v62, %s8951_s0 }
 0x2b7   :  { %v8636_v58 = vpop.eup %8635 }
 0x2b8   :  { %1111 = vrot.lane.b32.xlu1 %v8636_v58, %s8951_s0 }
 0x326   :  { %v1210_v55 = vpop.permute.xlu0 %1209 }
 0x327   :  { %v10130_v30 = vmul.f32 %v8630_v42, %v1210_v55 }
 0x329   :  { %v1320_v54 = vrot.slane %v10130_v30, 6 }
 0x32a   :  { %v1112_v50 = vpop.permute.xlu1 %1111 }
 0x32b   :  { %v10133_v59 = vmul.f32 %v8632_v40, %v1112_v50  ;;  %1321 = vrot.lane.b32.xlu0 %v1320_v54, %s8952_s5  ;;  %v11476_v40 = vmov 0.0|0.0  }
 0x32d   :  { %1214 = vrot.lane.b32.xlu1 %v10133_v59, %s8952_s5 }
 0x39d   :  { %v1322_v47 = vpop.permute.xlu0 %1321 }
 0x39e   :  { %7795 = vmatmul.mubr.msk.f32.vlgmr.msra.gmra.mrb[4].mxu1 %vm844_vm0, %v1322_v47 }
 0x39f   :  { %v1215_v63 = vpop.permute.xlu1 %1214  ;;  %8174 = vmatpush3.bf16.msra.mxu1 %v10064_v56  ;;  %7812 = vmatprep.mubr.msk.f32.mxu1 %vm8950_vm1, %v11475_v48 }
 0x3a0   :  { %7786 = vmatmul.mubr.msk.f32.vlgmr.msra.gmra.mrb[4].mxu0 %vm844_vm0, %v1215_v63  ;;  %7810 = vmatprep.subr.mxu1 %v11475_v48 }
 0x3a1   :  { %8171 = vmatpush3.bf16.msra.mxu0 %v10070_v53  ;;  %7803 = vmatprep.mubr.msk.f32.mxu0 %vm8950_vm1, %v11475_v48 }
 0x3a2   :  { %7801 = vmatprep.subr.mxu0 %v11475_v48 }
 0x3a3   :  { %7811 = vmatpush3.msra.mxu1 %v10075_v51 }
 0x3a4   :  { %8178 = vmatprep.subr.bf16.mxu1 %v11476_v40 }
 0x3a5   :  { %7802 = vmatpush3.msra.mxu0 %v10087_v49 }
 0x3a6   :  { %8175 = vmatprep.subr.bf16.mxu0 %v11476_v40 }
 0x471   :  { %v1391_v42 = vpop.f32.mrb[4].mxu1 }
 0x472   :  { %v1396_v44 = vrot.slane %v1391_v42, 4  ;;  %v7796_v62 = vpop.f32.mrb[5].mxu1 }
 0x473   :  { %v1284_v58 = vpop.f32.mrb[4].mxu0 }
 0x474   :  { %v1398_v55 = vadd.f32 %v1396_v44, %v10114_v46  ;;  %v1289_v54 = vrot.slane %v1284_v58, 6  ;;  %v7787_v50 = vpop.f32.mrb[5].mxu0 }
 0x476   :  { %8637 = vtanh.f32 %v1398_v55  ;;  %v1291_v47 = vadd.f32 %v1289_v54, %v10112_v52  ;;  %v7182_v28 = vmul.f32 -1.442695, %v1398_v55 }
 0x478   :  { %8639 = vtanh.f32 %v1291_v47  ;;  %v7180_v12 = vmul.f32 -1.442695, %v1291_v47 }
 0x479   :  { %8641 = vpow2.f32 %v7182_v28 }
 0x47a   :  { %8643 = vpow2.f32 %v7180_v12  ;;  %v1300_v12 = vrot.slane %v10125_v57, 6 }
 0x480   :  { %v8638_v63 = vpop.eup %8637 }
 0x481   :  { %1411 = vrot.lane.b32.xlu0 %v8638_v63, %s8951_s0 }
 0x482   :  { %v8640_v14 = vpop.eup %8639 }
 0x483   :  { %1304 = vrot.lane.b32.xlu1 %v8640_v14, %s8951_s0  ;;  %v8642_v42 = vpop.eup %8641  ;;  %v1407_v14 = vrot.slane %v10122_v45, 2 }
 0x484   :  { %v8644_v62 = vpop.eup %8643  ;;  %v1402_v31 = vadd.f32 1.0, %v8642_v42 }
 0x485   :  { %v1295_v44 = vadd.f32 1.0, %v8644_v62 }
 0x486   :  { %8645 = vrcp.f32 %v1402_v31 }
 0x487   :  { %8647 = vrcp.f32 %v1295_v44 }
 0x490   :  { %v8646_v58 = vpop.eup %8645 }
 0x491   :  { %v8648_v15 = vpop.eup %8647  ;;  %v1409_v28 = vmul.f32 %v8646_v58, %v1407_v14 }
 0x492   :  { %v1302_v31 = vmul.f32 %v8648_v15, %v1300_v12 }
 0x4f3   :  { %v1412_v50 = vpop.permute.xlu0 %1411 }
 0x4f4   :  { %v1414_v54 = vmul.f32 %v8646_v58, %v1412_v50 }
 0x4f5   :  { %v1305_v29 = vpop.permute.xlu1 %1304 }
 0x4f6   :  { %1416 = vrot.lane.b32.xlu0 %v1414_v54, %s8951_s0  ;;  %v1307_v63 = vmul.f32 %v8648_v15, %v1305_v29 }
 0x4f8   :  { %1309 = vrot.lane.b32.xlu1 %v1307_v63, %s8951_s0 }
 0x568   :  { %v1417_v55 = vpop.permute.xlu0 %1416 }
 0x569   :  { %v10160_v47 = vadd.f32 %v1417_v55, %v1409_v28 }
 0x56a   :  { %v1310_v42 = vpop.permute.xlu1 %1309 }
 0x56b   :  { %8649 = vtanh.f32 %v10160_v47  ;;  %v10163_v62 = vadd.f32 %v1310_v42, %v1302_v31 }
 0x56d   :  { %8651 = vtanh.f32 %v10163_v62 }
 0x575   :  { %v8650_v44 = vpop.eup %8649 }
 0x576   :  { %1422 = vrot.lane.b32.xlu0 %v8650_v44, %s8951_s0 }
 0x577   :  { %v8652_v29 = vpop.eup %8651 }
 0x578   :  { %1315 = vrot.lane.b32.xlu1 %v8652_v29, %s8951_s0 }
 0x5e8   :  { %v1423_v45 = vpop.permute.xlu0 %1422 }
 0x5e9   :  { %v10168_v50 = vmul.f32 %v8646_v58, %v1423_v45 }
 0x5ea   :  { %v1316_v54 = vpop.permute.xlu1 %1315 }
 0x5eb   :  { %v1534_v57 = vrot.slane %v10168_v50, 4  ;;  %v10171_v63 = vmul.f32 %v8648_v15, %v1316_v54 }
 0x5ed   :  { %1535 = vrot.lane.b32.xlu0 %v1534_v57, %s8952_s5  ;;  %v1427_v14 = vrot.slane %v10171_v63, 2 }
 0x5ef   :  { %1428 = vrot.lane.b32.xlu1 %v1427_v14, %s8952_s5 }
 0x65f   :  { %v1536_v28 = vpop.permute.xlu0 %1535 }
 0x660   :  { %7813 = vmatmul.mubr.msk.f32.vlgmr.msra.gmra.mrb[6].mxu1 %vm844_vm0, %v1536_v28 }
 0x661   :  { %8180 = vmatpush3.bf16.msra.mxu1 %v10064_v56  ;;  %7830 = vmatprep.mubr.msk.f32.mxu1 %vm8950_vm1, %v11475_v48  ;;  %v1429_v58 = vpop.permute.xlu1 %1428 }
 0x662   :  { %7828 = vmatprep.subr.mxu1 %v11475_v48  ;;  %7804 = vmatmul.mubr.msk.f32.vlgmr.msra.gmra.mrb[6].mxu0 %vm844_vm0, %v1429_v58 }
 0x663   :  { %8177 = vmatpush3.bf16.msra.mxu0 %v10070_v53  ;;  %7821 = vmatprep.mubr.msk.f32.mxu0 %vm8950_vm1, %v11475_v48 }
 0x664   :  { %7819 = vmatprep.subr.mxu0 %v11475_v48 }
 0x665   :  { %7829 = vmatpush3.msra.mxu1 %v10075_v51 }
 0x666   :  { %8184 = vmatprep.subr.bf16.mxu1 %v11476_v40 }
 0x667   :  { %7820 = vmatpush3.msra.mxu0 %v10087_v49 }
 0x668   :  { %8181 = vmatprep.subr.bf16.mxu0 %v11476_v40 }
 0x733   :  { %v1605_v15 = vpop.f32.mrb[6].mxu1 }
 0x734   :  { %v1610_v12 = vrot.slane %v1605_v15, 6  ;;  %v7814_v55 = vpop.f32.mrb[7].mxu1 }
 0x735   :  { %v1498_v42 = vpop.f32.mrb[6].mxu0 }
 0x736   :  { %v1612_v31 = vadd.f32 %v1610_v12, %v10114_v46  ;;  %v1503_v44 = vrot.slane %v1498_v42, 4  ;;  %v7805_v29 = vpop.f32.mrb[7].mxu0 }
 0x738   :  { %8653 = vtanh.f32 %v1612_v31  ;;  %v1505_v45 = vadd.f32 %v1503_v44, %v10112_v52  ;;  %v7186_v14 = vmul.f32 -1.442695, %v1612_v31  ;;  %v1621_v31 = vrot.slane %v10160_v47, 2 }
 0x73a   :  { %8655 = vtanh.f32 %v1505_v45  ;;  %v7184_v28 = vmul.f32 -1.442695, %v1505_v45 }
 0x73b   :  { %8657 = vpow2.f32 %v7186_v14 }
 0x73c   :  { %8659 = vpow2.f32 %v7184_v28 }
 0x742   :  { %v8654_v57 = vpop.eup %8653 }
 0x743   :  { %1625 = vrot.lane.b32.xlu0 %v8654_v57, %s8951_s0 }
 0x744   :  { %v8656_v54 = vpop.eup %8655 }
 0x745   :  { %1518 = vrot.lane.b32.xlu1 %v8656_v54, %s8951_s0  ;;  %v8658_v58 = vpop.eup %8657  ;;  %v1514_v54 = vrot.slane %v10163_v62, 6 }
 0x746   :  { %v8660_v15 = vpop.eup %8659  ;;  %v1616_v12 = vadd.f32 1.0, %v8658_v58 }
 0x747   :  { %v1509_v55 = vadd.f32 1.0, %v8660_v15 }
 0x748   :  { %8661 = vrcp.f32 %v1616_v12 }
 0x749   :  { %8663 = vrcp.f32 %v1509_v55 }
 0x752   :  { %v8662_v42 = vpop.eup %8661 }
 0x753   :  { %v8664_v13 = vpop.eup %8663  ;;  %v1623_v45 = vmul.f32 %v8662_v42, %v1621_v31  ;;  %v2700_v31 = vsel %vm2699_vm2, %v10133_v59, %v10171_v63 }
 0x754   :  { %v1516_v58 = vmul.f32 %v8664_v13, %v1514_v54 }
 0x7b5   :  { %v1626_v29 = vpop.permute.xlu0 %1625 }
 0x7b6   :  { %v1628_v44 = vmul.f32 %v8662_v42, %v1626_v29 }
 0x7b7   :  { %v1519_v43 = vpop.permute.xlu1 %1518 }
 0x7b8   :  { %1630 = vrot.lane.b32.xlu0 %v1628_v44, %s8951_s0  ;;  %v1521_v57 = vmul.f32 %v8664_v13, %v1519_v43 }
 0x7ba   :  { %1523 = vrot.lane.b32.xlu1 %v1521_v57, %s8951_s0 }
 0x82a   :  { %v1631_v14 = vpop.permute.xlu0 %1630 }
 0x82b   :  { %v10198_v28 = vadd.f32 %v1631_v14, %v1623_v45 }
 0x82c   :  { %v1524_v15 = vpop.permute.xlu1 %1523 }
 0x82d   :  { %8665 = vtanh.f32 %v10198_v28  ;;  %v10201_v12 = vadd.f32 %v1524_v15, %v1516_v58 }
 0x82f   :  { %8667 = vtanh.f32 %v10201_v12 }
 0x837   :  { %v8666_v55 = vpop.eup %8665 }
 0x838   :  { %1636 = vrot.lane.b32.xlu0 %v8666_v55, %s8951_s0 }
 0x839   :  { %v8668_v43 = vpop.eup %8667 }
 0x83a   :  { %1529 = vrot.lane.b32.xlu1 %v8668_v43, %s8951_s0 }
 0x8aa   :  { %v1637_v47 = vpop.permute.xlu0 %1636 }
 0x8ab   :  { %v10206_v29 = vmul.f32 %v8662_v42, %v1637_v47 }
 0x8ac   :  { %v1530_v44 = vpop.permute.xlu1 %1529 }
 0x8ad   :  { %v1748_v62 = vrot.slane %v10206_v29, 2  ;;  %v1532_v57 = vmul.f32 %v8664_v13, %v1530_v44 }
 0x8af   :  { %1749 = vrot.lane.b32.xlu0 %v1748_v62, %s8952_s5  ;;  %v1641_v45 = vrot.slane %v1532_v57, 4  ;;  %v10214_v54 = vsel %vm2701_vm3, %v2700_v31, %v1532_v57 }
 0x8b1   :  { %1642 = vrot.lane.b32.xlu1 %v1641_v45, %s8952_s5 }
 0x921   :  { %v1750_v42 = vpop.permute.xlu0 %1749 }
 0x922   :  { %7831 = vmatmul.mubr.msk.f32.vlgmr.msra.gmra.mrb[8].mxu1 %vm844_vm0, %v1750_v42 }
 0x923   :  { %8186 = vmatpush3.bf16.msra.mxu1 %v10064_v56  ;;  %7848 = vmatprep.mubr.msk.f32.mxu1 %vm8950_vm1, %v11475_v48  ;;  %v1643_v13 = vpop.permute.xlu1 %1642 }
 0x924   :  { %7846 = vmatprep.subr.mxu1 %v11475_v48  ;;  %7822 = vmatmul.mubr.msk.f32.vlgmr.msra.gmra.mrb[8].mxu0 %vm844_vm0, %v1643_v13 }
 0x925   :  { %8183 = vmatpush3.bf16.msra.mxu0 %v10070_v53  ;;  %7839 = vmatprep.mubr.msk.f32.mxu0 %vm8950_vm1, %v11475_v48 }
 0x926   :  { %7837 = vmatprep.subr.mxu0 %v11475_v48 }
 0x927   :  { %7847 = vmatpush3.msra.mxu1 %v10075_v51 }
 0x928   :  { %8190 = vmatprep.subr.bf16.mxu1 %v11476_v40 }
 0x929   :  { %7838 = vmatpush3.msra.mxu0 %v10087_v49 }
 0x92a   :  { %8187 = vmatprep.subr.bf16.mxu0 %v11476_v40 }
 0x9f5   :  { %v1819_v59 = vpop.f32.mrb[8].mxu1 }
 0x9f6   :  { %v1823_v63 = vadd.f32 %v1819_v59, %v10114_v46  ;;  %v7832_v14 = vpop.f32.mrb[9].mxu1 }
 0x9f7   :  { %v1712_v58 = vpop.f32.mrb[8].mxu0 }
 0x9f8   :  { %8669 = vtanh.f32 %v1823_v63  ;;  %v1717_v15 = vrot.slane %v1712_v58, 2  ;;  %v7823_v55 = vpop.f32.mrb[9].mxu0  ;;  %v7190_v44 = vmul.f32 -1.442695, %v1823_v63  ;;  %v1832_v63 = vrot.slane %v10198_v28, 2 }
 0x9fa   :  { %v1719_v43 = vadd.f32 %v1717_v15, %v10112_v52 }
 0x9fc   :  { %8671 = vtanh.f32 %v1719_v43  ;;  %v7188_v57 = vmul.f32 -1.442695, %v1719_v43 }
 0x9fd   :  { %8673 = vpow2.f32 %v7190_v44 }
 0x9fe   :  { %8675 = vpow2.f32 %v7188_v57 }
 0xa02   :  { %v8670_v47 = vpop.eup %8669 }
 0xa03   :  { %1836 = vrot.lane.b32.xlu0 %v8670_v47, %s8951_s0 }
 0xa06   :  { %v8672_v62 = vpop.eup %8671 }
 0xa07   :  { %1732 = vrot.lane.b32.xlu1 %v8672_v62, %s8951_s0  ;;  %v8674_v31 = vpop.eup %8673  ;;  %v1728_v62 = vrot.slane %v10201_v12, 6 }
 0xa08   :  { %v1827_v46 = vadd.f32 1.0, %v8674_v31  ;;  %v8676_v45 = vpop.eup %8675 }
 0xa09   :  { %v1723_v42 = vadd.f32 1.0, %v8676_v45 }
 0xa0a   :  { %8677 = vrcp.f32 %v1827_v46 }
 0xa0b   :  { %8679 = vrcp.f32 %v1723_v42 }
 0xa14   :  { %v8678_v13 = vpop.eup %8677 }
 0xa15   :  { %v8680_v14 = vpop.eup %8679  ;;  %v1834_v55 = vmul.f32 %v8678_v13, %v1832_v63 }
 0xa16   :  { %v1730_v44 = vmul.f32 %v8680_v14, %v1728_v62 }
 0xa75   :  { %v1837_v59 = vpop.permute.xlu0 %1836 }
 0xa76   :  { %v1839_v52 = vmul.f32 %v8678_v13, %v1837_v59 }
 0xa78   :  { %1841 = vrot.lane.b32.xlu0 %v1839_v52, %s8951_s0 }
 0xa79   :  { %v1733_v58 = vpop.permute.xlu1 %1732 }
 0xa7a   :  { %v1735_v15 = vmul.f32 %v8680_v14, %v1733_v58 }
 0xa7c   :  { %1737 = vrot.lane.b32.xlu1 %v1735_v15, %s8951_s0 }
 0xaea   :  { %v1842_v43 = vpop.permute.xlu0 %1841 }
 0xaeb   :  { %v10238_v47 = vadd.f32 %v1842_v43, %v1834_v55 }
 0xaed   :  { %8681 = vtanh.f32 %v10238_v47 }
 0xaee   :  { %v1738_v57 = vpop.permute.xlu1 %1737 }
 0xaef   :  { %v10242_v31 = vadd.f32 %v1738_v57, %v1730_v44 }
 0xaf1   :  { %8683 = vtanh.f32 %v10242_v31 }
 0xaf7   :  { %v8682_v46 = vpop.eup %8681 }
 0xaf8   :  { %1847 = vrot.lane.b32.xlu0 %v8682_v46, %s8951_s0 }
 0xafb   :  { %v8684_v45 = vpop.eup %8683 }
 0xafc   :  { %1743 = vrot.lane.b32.xlu1 %v8684_v45, %s8951_s0 }
 0xb6a   :  { %v1848_v28 = vpop.permute.xlu0 %1847 }
 0xb6b   :  { %v10247_v42 = vmul.f32 %v8678_v13, %v1848_v28 }
 0xb6d   :  { %1956 = vrot.lane.b32.xlu0 %v10247_v42, %s8952_s5 }
 0xb6e   :  { %v1744_v12 = vpop.permute.xlu1 %1743 }
 0xb6f   :  { %v1746_v59 = vmul.f32 %v8680_v14, %v1744_v12 }
 0xb71   :  { %v1852_v52 = vrot.slane %v1746_v59, 6  ;;  %v10253_v58 = vsel %vm2703_vm4, %v10214_v54, %v1746_v59 }
 0xb73   :  { %1853 = vrot.lane.b32.xlu1 %v1852_v52, %s8952_s5 }
 0xbdf   :  { %v1957_v15 = vpop.permute.xlu0 %1956 }
 0xbe0   :  { %7849 = vmatmul.mubr.msk.f32.vlgmr.msra.gmra.mrb[10].mxu1 %vm844_vm0, %v1957_v15 }
 0xbe1   :  { %8192 = vmatpush3.bf16.msra.mxu1 %v10064_v56  ;;  %7866 = vmatprep.mubr.msk.f32.mxu1 %vm8950_vm1, %v11475_v48 }
 0xbe2   :  { %7864 = vmatprep.subr.mxu1 %v11475_v48 }
 0xbe5   :  { %7865 = vmatpush3.msra.mxu1 %v10075_v51  ;;  %v1854_v13 = vpop.permute.xlu1 %1853 }
 0xbe6   :  { %8196 = vmatprep.subr.bf16.mxu1 %v11476_v40  ;;  %7840 = vmatmul.mubr.msk.f32.vlgmr.msra.gmra.mrb[10].mxu0 %vm844_vm0, %v1854_v13 }
 0xbe7   :  { %8189 = vmatpush3.bf16.msra.mxu0 %v10070_v53  ;;  %7857 = vmatprep.mubr.msk.f32.mxu0 %vm8950_vm1, %v11475_v48 }
 0xbe8   :  { %7855 = vmatprep.subr.mxu0 %v11475_v48 }
 0xbeb   :  { %7856 = vmatpush3.msra.mxu0 %v10087_v49 }
 0xbec   :  { %8193 = vmatprep.subr.bf16.mxu0 %v11476_v40 }
 0xcb3   :  { %v2026_v54 = vpop.f32.mrb[10].mxu1 }
 0xcb4   :  { %v2031_v14 = vrot.slane %v2026_v54, 2  ;;  %v7850_v63 = vpop.f32.mrb[11].mxu1 }
 0xcb6   :  { %v2033_v55 = vadd.f32 %v2031_v14, %v10107_v61 }
 0xcb8   :  { %8685 = vtanh.f32 %v2033_v55  ;;  %v7194_v45 = vmul.f32 -1.442695, %v2033_v55  ;;  %v2042_v55 = vrot.slane %v10238_v47, 2 }
 0xcb9   :  { %v1923_v43 = vpop.f32.mrb[10].mxu0 }
 0xcba   :  { %v1927_v62 = vadd.f32 %v1923_v43, %v10110_v60  ;;  %v7841_v44 = vpop.f32.mrb[11].mxu0 }
 0xcbc   :  { %8687 = vtanh.f32 %v1927_v62  ;;  %v7192_v28 = vmul.f32 -1.442695, %v1927_v62 }
 0xcbd   :  { %8689 = vpow2.f32 %v7194_v45  ;;  %v1936_v45 = vrot.slane %v10242_v31, 6 }
 0xcbe   :  { %8691 = vpow2.f32 %v7192_v28 }
 0xcc2   :  { %v8686_v57 = vpop.eup %8685 }
 0xcc3   :  { %2046 = vrot.lane.b32.xlu0 %v8686_v57, %s8951_s0 }
 0xcc6   :  { %v8688_v46 = vpop.eup %8687 }
 0xcc7   :  { %1940 = vrot.lane.b32.xlu1 %v8688_v46, %s8951_s0  ;;  %v8690_v12 = vpop.eup %8689 }
 0xcc8   :  { %v2037_v59 = vadd.f32 1.0, %v8690_v12  ;;  %v8692_v52 = vpop.eup %8691 }
 0xcc9   :  { %v1931_v15 = vadd.f32 1.0, %v8692_v52 }
 0xcca   :  { %8693 = vrcp.f32 %v2037_v59 }
 0xccb   :  { %8695 = vrcp.f32 %v1931_v15 }
 0xcd4   :  { %v8694_v13 = vpop.eup %8693 }
 0xcd5   :  { %v8696_v63 = vpop.eup %8695  ;;  %v2044_v62 = vmul.f32 %v8694_v13, %v2042_v55 }
 0xcd6   :  { %v1938_v28 = vmul.f32 %v8696_v63, %v1936_v45 }
 0xd35   :  { %v2047_v54 = vpop.permute.xlu0 %2046 }
 0xd36   :  { %v2049_v14 = vmul.f32 %v8694_v13, %v2047_v54 }
 0xd38   :  { %2051 = vrot.lane.b32.xlu0 %v2049_v14, %s8951_s0 }
 0xd39   :  { %v1941_v43 = vpop.permute.xlu1 %1940 }
 0xd3a   :  { %v1943_v44 = vmul.f32 %v8696_v63, %v1941_v43 }
 0xd3c   :  { %1945 = vrot.lane.b32.xlu1 %v1943_v44, %s8951_s0 }
 0xdaa   :  { %v2052_v57 = vpop.permute.xlu0 %2051 }
 0xdab   :  { %v10277_v46 = vadd.f32 %v2052_v57, %v2044_v62 }
 0xdad   :  { %8697 = vtanh.f32 %v10277_v46 }
 0xdae   :  { %v1946_v12 = vpop.permute.xlu1 %1945 }
 0xdaf   :  { %v10281_v59 = vadd.f32 %v1946_v12, %v1938_v28 }
 0xdb1   :  { %8699 = vtanh.f32 %v10281_v59 }
 0xdb7   :  { %v8698_v52 = vpop.eup %8697 }
 0xdb8   :  { %2057 = vrot.lane.b32.xlu0 %v8698_v52, %s8951_s0 }
 0xdbb   :  { %v8700_v15 = vpop.eup %8699 }
 0xdbc   :  { %1951 = vrot.lane.b32.xlu1 %v8700_v15, %s8951_s0 }
 0xe2a   :  { %v2058_v47 = vpop.permute.xlu0 %2057 }
 0xe2b   :  { %v10286_v54 = vmul.f32 %v8694_v13, %v2058_v47 }
 0xe2d   :  { %v2168_v14 = vrot.slane %v10286_v54, 6 }
 0xe2e   :  { %v1952_v31 = vpop.permute.xlu1 %1951 }
 0xe2f   :  { %2169 = vrot.lane.b32.xlu0 %v2168_v14, %s8952_s5  ;;  %v10290_v43 = vmul.f32 %v8696_v63, %v1952_v31 }
 0xe31   :  { %2062 = vrot.lane.b32.xlu1 %v10290_v43, %s8952_s5 }
 0xea1   :  { %v2170_v44 = vpop.permute.xlu0 %2169 }
 0xea2   :  { %7867 = vmatmul.mubr.msk.f32.vlgmr.msra.gmra.mrb[12].mxu1 %vm844_vm0, %v2170_v44 }
 0xea3   :  { %8198 = vmatpush3.bf16.msra.mxu1 %v10064_v56  ;;  %7884 = vmatprep.mubr.msk.f32.mxu1 %vm8950_vm1, %v11475_v48  ;;  %v2063_v13 = vpop.permute.xlu1 %2062 }
 0xea4   :  { %7882 = vmatprep.subr.mxu1 %v11475_v48  ;;  %7858 = vmatmul.mubr.msk.f32.vlgmr.msra.gmra.mrb[12].mxu0 %vm844_vm0, %v2063_v13 }
 0xea5   :  { %8195 = vmatpush3.bf16.msra.mxu0 %v10070_v53  ;;  %7875 = vmatprep.mubr.msk.f32.mxu0 %vm8950_vm1, %v11475_v48 }
 0xea6   :  { %7873 = vmatprep.subr.mxu0 %v11475_v48 }
 0xea7   :  { %7883 = vmatpush3.msra.mxu1 %v10075_v51 }
 0xea8   :  { %8202 = vmatprep.subr.bf16.mxu1 %v11476_v40 }
 0xea9   :  { %7874 = vmatpush3.msra.mxu0 %v10087_v49 }
 0xeaa   :  { %8199 = vmatprep.subr.bf16.mxu0 %v11476_v40 }
 0xf75   :  { %v2239_v63 = vpop.f32.mrb[12].mxu1 }
 0xf76   :  { %v2244_v55 = vrot.slane %v2239_v63, 4  ;;  %v7868_v62 = vpop.f32.mrb[13].mxu1 }
 0xf77   :  { %v2132_v45 = vpop.f32.mrb[12].mxu0 }
 0xf78   :  { %v2246_v57 = vadd.f32 %v2244_v55, %v10107_v61  ;;  %v2137_v28 = vrot.slane %v2132_v45, 6  ;;  %v7859_v12 = vpop.f32.mrb[13].mxu0 }
 0xf7a   :  { %8701 = vtanh.f32 %v2246_v57  ;;  %v2139_v52 = vadd.f32 %v2137_v28, %v10110_v60  ;;  %v7198_v14 = vmul.f32 -1.442695, %v2246_v57  ;;  %v2255_v57 = vrot.slane %v10277_v46, 2 }
 0xf7c   :  { %8703 = vtanh.f32 %v2139_v52  ;;  %v7196_v31 = vmul.f32 -1.442695, %v2139_v52 }
 0xf7d   :  { %8705 = vpow2.f32 %v7198_v14 }
 0xf7e   :  { %8707 = vpow2.f32 %v7196_v31 }
 0xf84   :  { %v8702_v15 = vpop.eup %8701 }
 0xf85   :  { %2259 = vrot.lane.b32.xlu0 %v8702_v15, %s8951_s0 }
 0xf86   :  { %v8704_v47 = vpop.eup %8703 }
 0xf87   :  { %2152 = vrot.lane.b32.xlu1 %v8704_v47, %s8951_s0  ;;  %v8706_v44 = vpop.eup %8705  ;;  %v2148_v47 = vrot.slane %v10281_v59, 6 }
 0xf88   :  { %v8708_v13 = vpop.eup %8707  ;;  %v2250_v63 = vadd.f32 1.0, %v8706_v44 }
 0xf89   :  { %v2143_v55 = vadd.f32 1.0, %v8708_v13 }
 0xf8a   :  { %8709 = vrcp.f32 %v2250_v63 }
 0xf8b   :  { %8711 = vrcp.f32 %v2143_v55 }
 0xf94   :  { %v8710_v62 = vpop.eup %8709 }
 0xf95   :  { %v8712_v12 = vpop.eup %8711  ;;  %v2257_v52 = vmul.f32 %v8710_v62, %v2255_v57 }
 0xf96   :  { %v2150_v44 = vmul.f32 %v8712_v12, %v2148_v47 }
 0xff7   :  { %v2260_v45 = vpop.permute.xlu0 %2259 }
 0xff8   :  { %v2262_v28 = vmul.f32 %v8710_v62, %v2260_v45 }
 0xff9   :  { %v2153_v41 = vpop.permute.xlu1 %2152 }
 0xffa   :  { %2264 = vrot.lane.b32.xlu0 %v2262_v28, %s8951_s0  ;;  %v2155_v15 = vmul.f32 %v8712_v12, %v2153_v41 }
 0xffc   :  { %2157 = vrot.lane.b32.xlu1 %v2155_v15, %s8951_s0 }
0x106c   :  { %v2265_v14 = vpop.permute.xlu0 %2264 }
0x106d   :  { %v10316_v31 = vadd.f32 %v2265_v14, %v2257_v52 }
0x106e   :  { %v2158_v13 = vpop.permute.xlu1 %2157 }
0x106f   :  { %8713 = vtanh.f32 %v10316_v31  ;;  %v10319_v63 = vadd.f32 %v2158_v13, %v2150_v44 }
0x1071   :  { %8715 = vtanh.f32 %v10319_v63 }
0x1079   :  { %v8714_v55 = vpop.eup %8713 }
0x107a   :  { %2270 = vrot.lane.b32.xlu0 %v8714_v55, %s8951_s0 }
0x107b   :  { %v8716_v41 = vpop.eup %8715 }
0x107c   :  { %2163 = vrot.lane.b32.xlu1 %v8716_v41, %s8951_s0 }
0x10ec   :  { %v2271_v46 = vpop.permute.xlu0 %2270 }
0x10ed   :  { %v10324_v45 = vmul.f32 %v8710_v62, %v2271_v46 }
0x10ee   :  { %v2164_v28 = vpop.permute.xlu1 %2163 }
0x10ef   :  { %v2382_v59 = vrot.slane %v10324_v45, 4  ;;  %v10327_v15 = vmul.f32 %v8712_v12, %v2164_v28 }
0x10f1   :  { %2383 = vrot.lane.b32.xlu0 %v2382_v59, %s8952_s5  ;;  %v2275_v57 = vrot.slane %v10327_v15, 2 }
0x10f3   :  { %2276 = vrot.lane.b32.xlu1 %v2275_v57, %s8952_s5 }
0x1163   :  { %v2384_v52 = vpop.permute.xlu0 %2383 }
0x1164   :  { %7885 = vmatmul.mubr.msk.f32.vlgmr.msra.gmra.mrb[14].mxu1 %vm844_vm0, %v2384_v52 }
0x1165   :  { %8204 = vmatpush3.bf16.msra.mxu1 %v10064_v56  ;;  %7902 = vmatprep.mubr.msk.f32.mxu1 %vm8950_vm1, %v11475_v48  ;;  %v2277_v62 = vpop.permute.xlu1 %2276 }
0x1166   :  { %7900 = vmatprep.subr.mxu1 %v11475_v48  ;;  %7876 = vmatmul.mubr.msk.f32.vlgmr.msra.gmra.mrb[14].mxu0 %vm844_vm0, %v2277_v62 }
0x1167   :  { %8201 = vmatpush3.bf16.msra.mxu0 %v10070_v53  ;;  %7893 = vmatprep.mubr.msk.f32.mxu0 %vm8950_vm1, %v11475_v48 }
0x1168   :  { %7891 = vmatprep.subr.mxu0 %v11475_v48 }
0x1169   :  { %7901 = vmatpush3.msra.mxu1 %v10075_v51 }
0x116b   :  { %7892 = vmatpush3.msra.mxu0 %v10087_v49 }
0x1237   :  { %v2453_v56 = vpop.f32.mrb[14].mxu1 }
0x1238   :  { %v2458_v12 = vrot.slane %v2453_v56, 6  ;;  %v7886_v47 = vpop.f32.mrb[15].mxu1 }
0x1239   :  { %v2346_v44 = vpop.f32.mrb[14].mxu0 }
0x123a   :  { %v2460_v14 = vadd.f32 %v2458_v12, %v10107_v61  ;;  %v2351_v13 = vrot.slane %v2346_v44, 4  ;;  %v7877_v55 = vpop.f32.mrb[15].mxu0 }
0x123c   :  { %8717 = vtanh.f32 %v2460_v14  ;;  %v2353_v53 = vadd.f32 %v2351_v13, %v10110_v60  ;;  %v7202_v46 = vmul.f32 -1.442695, %v2460_v14  ;;  %v2469_v14 = vrot.slane %v10316_v31, 2 }
0x123e   :  { %8719 = vtanh.f32 %v2353_v53  ;;  %v7200_v49 = vmul.f32 -1.442695, %v2353_v53  ;;  %v2362_v53 = vrot.slane %v10319_v63, 6 }
0x123f   :  { %8721 = vpow2.f32 %v7202_v46 }
0x1240   :  { %8723 = vpow2.f32 %v7200_v49 }
0x1246   :  { %v8718_v41 = vpop.eup %8717 }
0x1247   :  { %2473 = vrot.lane.b32.xlu0 %v8718_v41, %s8951_s0 }
0x1248   :  { %v8720_v51 = vpop.eup %8719 }
0x1249   :  { %2366 = vrot.lane.b32.xlu1 %v8720_v51, %s8951_s0  ;;  %v8722_v59 = vpop.eup %8721 }
0x124a   :  { %v8724_v28 = vpop.eup %8723  ;;  %v2464_v57 = vadd.f32 1.0, %v8722_v59 }
0x124b   :  { %v2357_v52 = vadd.f32 1.0, %v8724_v28 }
0x124c   :  { %8725 = vrcp.f32 %v2464_v57 }
0x124d   :  { %8727 = vrcp.f32 %v2357_v52 }
0x1256   :  { %v8726_v62 = vpop.eup %8725 }
0x1257   :  { %v8728_v47 = vpop.eup %8727  ;;  %v2471_v55 = vmul.f32 %v8726_v62, %v2469_v14 }
0x1258   :  { %v2364_v46 = vmul.f32 %v8728_v47, %v2362_v53 }
0x12b9   :  { %v2474_v56 = vpop.permute.xlu0 %2473 }
0x12ba   :  { %v2476_v12 = vmul.f32 %v8726_v62, %v2474_v56 }
0x12bb   :  { %v2367_v44 = vpop.permute.xlu1 %2366 }
0x12bc   :  { %2478 = vrot.lane.b32.xlu0 %v2476_v12, %s8951_s0  ;;  %v2369_v13 = vmul.f32 %v8728_v47, %v2367_v44  ;;  %v2705_v44 = vsel %vm2699_vm2, %v10290_v43, %v10327_v15 }
0x12be   :  { %2371 = vrot.lane.b32.xlu1 %v2369_v13, %s8951_s0 }
0x132e   :  { %v2479_v41 = vpop.permute.xlu0 %2478 }
0x132f   :  { %v2481_v51 = vadd.f32 %v2479_v41, %v2471_v55 }
0x1330   :  { %v2372_v49 = vpop.permute.xlu1 %2371 }
0x1331   :  { %8729 = vtanh.f32 %v2481_v51  ;;  %v2374_v59 = vadd.f32 %v2372_v49, %v2364_v46 }
0x1333   :  { %8731 = vtanh.f32 %v2374_v59 }
0x133b   :  { %v8730_v28 = vpop.eup %8729 }
0x133c   :  { %2484 = vrot.lane.b32.xlu0 %v8730_v28, %s8951_s0 }
0x133d   :  { %v8732_v57 = vpop.eup %8731 }
0x133e   :  { %2377 = vrot.lane.b32.xlu1 %v8732_v57, %s8951_s0 }
0x13ae   :  { %v2485_v52 = vpop.permute.xlu0 %2484 }
0x13af   :  { %v10354_v56 = vmul.f32 %v8726_v62, %v2485_v52 }
0x13b0   :  { %v2378_v12 = vpop.permute.xlu1 %2377 }
0x13b1   :  { %v2596_v31 = vrot.slane %v10354_v56, 2  ;;  %v2380_v63 = vmul.f32 %v8728_v47, %v2378_v12 }
0x13b3   :  { %2597 = vrot.lane.b32.xlu0 %v2596_v31, %s8952_s5  ;;  %v2489_v13 = vrot.slane %v2380_v63, 4  ;;  %v10362_v14 = vsel %vm2701_vm3, %v2705_v44, %v2380_v63 }
0x13b5   :  { %2490 = vrot.lane.b32.xlu1 %v2489_v13, %s8952_s5 }
0x1425   :  { %v2598_v55 = vpop.permute.xlu0 %2597 }
0x1426   :  { %7903 = vmatmul.mubr.msk.f32.vlgmr.msra.gmra.mrb[16].mxu1 %vm844_vm0, %v2598_v55 }
0x1427   :  { %v2491_v62 = vpop.permute.xlu1 %2490 }
0x1428   :  { %7894 = vmatmul.mubr.msk.f32.vlgmr.msra.gmra.mrb[16].mxu0 %vm844_vm0, %v2491_v62 }
0x14f9   :  { %v2667_v53 = vpop.f32.mrb[16].mxu1 }
0x14fa   :  { %v2671_v47 = vadd.f32 %v2667_v53, %v10107_v61  ;;  %v7904_v41 = vpop.f32.mrb[17].mxu1 }
0x14fb   :  { %v2560_v43 = vpop.f32.mrb[16].mxu0  ;;  %v2680_v41 = vrot.slane %v2481_v51, 2  ;;  %v2904_v51 = vld [vmem:[%s9023_s30 + $0x10] sm:$0xff] }
0x14fc   :  { %8733 = vtanh.f32 %v2671_v47  ;;  %v2565_v15 = vrot.slane %v2560_v43, 2  ;;  %v7895_v46 = vpop.f32.mrb[17].mxu0  ;;  %v7206_v52 = vmul.f32 -1.442695, %v2671_v47 }
0x14fe   :  { %v2567_v49 = vadd.f32 %v2565_v15, %v10110_v60 }
0x1500   :  { %8735 = vtanh.f32 %v2567_v49  ;;  %v7204_v31 = vmul.f32 -1.442695, %v2567_v49  ;;  %v2576_v49 = vrot.slane %v2374_v59, 6  ;;  %v2711_v59 = vsel %vm2699_vm2, %v10247_v42, %v10206_v29  ;;  %v2715_v42 = vld [vmem:[%s8998_s3 + $0x8] sm:$0xff] }
0x1501   :  { %8737 = vpow2.f32 %v7206_v52 }
0x1502   :  { %8739 = vpow2.f32 %v7204_v31  ;;  %v2717_v31 = vld [vmem:[%s9003_s8] sm:$0xff] }
0x1506   :  { %v8734_v28 = vpop.eup %8733 }
0x1507   :  { %2684 = vrot.lane.b32.xlu0 %v8734_v28, %s8951_s0 }
0x150a   :  { %v8736_v57 = vpop.eup %8735 }
0x150b   :  { %2580 = vrot.lane.b32.xlu1 %v8736_v57, %s8951_s0  ;;  %v8738_v12 = vpop.eup %8737 }
0x150c   :  { %v2675_v61 = vadd.f32 1.0, %v8738_v12  ;;  %v8740_v63 = vpop.eup %8739  ;;  %v2718_v12 = vld [vmem:[%s9003_s8 + $0x8] sm:$0xff] }
0x150d   :  { %v2571_v44 = vadd.f32 1.0, %v8740_v63  ;;  %v8205_v63 = vpack.c.bf16 %v2718_v12, %v2717_v31 }
0x150e   :  { %8741 = vrcp.f32 %v2675_v61  ;;  %v2902_v61 = vld [vmem:[%s9023_s30] sm:$0xff] }
0x150f   :  { %8743 = vrcp.f32 %v2571_v44  ;;  %v2903_v44 = vld [vmem:[%s9023_s30 + $0x8] sm:$0xff]  ;;  %8206 = vmatprep.subr.bf16.mxu0 %v8205_v63  ;;  %s11487_s30 = sld [smem:[#allocation22_spill]] }
0x1510   :  { %8208 = vmatpush3.bf16.msra.mxu0 %v8205_v63 }
0x1518   :  { %v8742_v13 = vpop.eup %8741 }
0x1519   :  { %v8744_v62 = vpop.eup %8743  ;;  %v2682_v43 = vmul.f32 %v8742_v13, %v2680_v41 }
0x151a   :  { %v2578_v28 = vmul.f32 %v8744_v62, %v2576_v49  ;;  %v2714_v49 = vld [vmem:[%s8998_s3] sm:$0xff] }
0x1579   :  { %v2685_v55 = vpop.permute.xlu0 %2684 }
0x157a   :  { %v2687_v60 = vmul.f32 %v8742_v13, %v2685_v55  ;;  %v8213_v55 = vpack.c.bf16 %v2903_v44, %v2902_v61 }
0x157c   :  { %2689 = vrot.lane.b32.xlu0 %v2687_v60, %s8951_s0  ;;  %8214 = vmatprep.subr.bf16.mxu1 %v8213_v55 }
0x157d   :  { %v2581_v53 = vpop.permute.xlu1 %2580  ;;  %8216 = vmatpush3.bf16.msra.mxu1 %v8213_v55  ;;  %v2716_v55 = vld [vmem:[%s8998_s3 + $0x10] sm:$0xff]  ;;  %s11483_s3 = sld [smem:[#allocation18_spill]] }
0x157e   :  { %v2583_v47 = vmul.f32 %v8744_v62, %v2581_v53  ;;  %7927 = vmatprep.subr.mxu1 %v2904_v51 }
0x1580   :  { %2585 = vrot.lane.b32.xlu1 %v2583_v47, %s8951_s0  ;;  %v2712_v47 = vsel %vm2701_vm3, %v2711_v59, %v10168_v50  ;;  %v3068_v59 = vld [vmem:[%s11477_s9 + $0x8] sm:$0xff] }
0x1581   :  { %7928 = vmatpush3.msra.mxu1 %v2904_v51  ;;  %v2713_v41 = vsel %vm2703_vm4, %v2712_v47, %v10130_v30  ;;  %v3067_v51 = vld [vmem:[%s11477_s9] sm:$0xff] }
0x1582   :  { %v10422_v47 = vpack.c.bf16 %v3068_v59, %v3067_v51 }
0x15ee   :  { %v2690_v15 = vpop.permute.xlu0 %2689 }
0x15ef   :  { %v2692_v46 = vadd.f32 %v2690_v15, %v2682_v43  ;;  %v2719_v43 = vld [vmem:[%s9003_s8 + $0x10] sm:$0xff]  ;;  %v2899_v15 = vld [vmem:[%s9018_s24] sm:$0xff]  ;;  %s11484_s8 = sld [smem:[#allocation16_spill]] }
0x15f0   :  { %7909 = vmatprep.subr.mxu0 %v2719_v43 }
0x15f1   :  { %8745 = vtanh.f32 %v2692_v46  ;;  %v2900_v46 = vld [vmem:[%s9018_s24 + $0x8] sm:$0xff]  ;;  %7910 = vmatpush3.msra.mxu0 %v2719_v43  ;;  %v10433_v43 = vld [vmem:[%s9008_s14 + $0x10] sm:$0xff] }
0x15f2   :  { %v2586_v57 = vpop.permute.xlu1 %2585  ;;  %v8217_v29 = vpack.c.bf16 %v2900_v46, %v2899_v15  ;;  %v10436_v15 = vld [vmem:[%s11477_s9 + $0x10] sm:$0xff]  ;;  %v7211_v46 = vld [vmem:[%s11478_s13] ss:$0 sm:$0xff] }
0x15f3   :  { %v2588_v52 = vadd.f32 %v2586_v57, %v2578_v28  ;;  %v8209_v28 = vpack.c.bf16 %v2715_v42, %v2714_v49  ;;  %v7216_v49 = vld [vmem:[%s11479_s17] ss:$0 sm:$0xff] }
0x15f4   :  { %8218 = vmatprep.subr.bf16.mxu1 %v8217_v29 }
0x15f5   :  { %8747 = vtanh.f32 %v2588_v52  ;;  %8210 = vmatprep.subr.bf16.mxu0 %v8209_v28 }
0x15fb   :  { %v8746_v60 = vpop.eup %8745 }
0x15fc   :  { %2695 = vrot.lane.b32.xlu0 %v8746_v60, %s8951_s0 }
0x15ff   :  { %v8748_v53 = vpop.eup %8747 }
0x1600   :  { %2591 = vrot.lane.b32.xlu1 %v8748_v53, %s8951_s0 }
0x1604   :  { %2724 = vrot.lane.b32.xlu1 %v2713_v41, %s8952_s5 }
0x166e   :  { %v2696_v57 = vpop.permute.xlu0 %2695 }
0x166f   :  { %v2698_v52 = vmul.f32 %v8742_v13, %v2696_v57 }
0x1671   :  { %v2708_v50 = vsel %vm2699_vm2, %v2698_v52, %v10354_v56  ;;  %v4753_v63 = vrot.slane %v2698_v52, 6 }
0x1672   :  { %v2709_v30 = vsel %vm2701_vm3, %v2708_v50, %v10324_v45  ;;  %v2592_v31 = vpop.permute.xlu1 %2591 }
0x1673   :  { %v2710_v12 = vsel %vm2703_vm4, %v2709_v30, %v10286_v54  ;;  %v2594_v61 = vmul.f32 %v8744_v62, %v2592_v31  ;;  %v2901_v62 = vld [vmem:[%s9018_s24 + $0x10] sm:$0xff]  ;;  %s11486_s24 = sld [smem:[#allocation21_spill]] }
0x1674   :  { %2722 = vrot.lane.b32.xlu0 %v2710_v12, %s8952_s5 }
0x1675   :  { %v4750_v44 = vrot.slane %v2594_v61, 6  ;;  %v2707_v13 = vsel %vm2703_vm4, %v10362_v14, %v2594_v61  ;;  %v3064_v14 = vld [vmem:[%s9008_s14] sm:$0xff] }
0x1676   :  { %2809 = vrot.lane.b32.xlu1 %v2707_v13, %s8952_s5  ;;  %v2725_v45 = vpop.permute.xlu1 %2724 }
0x1677   :  { %v10404_v56 = vsel %vm2699_vm2, %v4750_v44, %v4753_v63 }
0x1678   :  { %2807 = vrot.lane.b32.xlu0 %v10253_v58, %s8952_s5  ;;  %v3065_v58 = vld [vmem:[%s9008_s14 + $0x8] sm:$0xff]  ;;  %s11485_s14 = sld [smem:[#allocation20_spill]] }
0x1679   :  { %v10420_v53 = vpack.c.bf16 %v3065_v58, %v3064_v14 }
0x16e6   :  { %v2723_v54 = vpop.permute.xlu0 %2722 }
0x16e7   :  { %7911 = vmatprep.mubr.msk.f32.mxu0 %vm844_vm0, %v2723_v54  ;;  %7929 = vmatprep.mubr.msk.f32.mxu1 %vm844_vm0, %v2723_v54 }
0x16e8   :  { %7912 = vmatmul.mubr.msk.f32.vlgmr.msra.gmra.mrb[18].mxu0 %vm844_vm0, %v2725_v45  ;;  %7930 = vmatmul.mubr.msk.f32.vlgmr.msra.gmra.mrb[18].mxu1 %vm844_vm0, %v2725_v45  ;;  %v2810_v41 = vpop.permute.xlu1 %2809 }
0x16e9   :  { %8220 = vmatpush3.bf16.msra.mxu1 %v8217_v29  ;;  %8212 = vmatpush3.bf16.msra.mxu0 %v8209_v28 }
0x16ea   :  { %v2808_v60 = vpop.permute.xlu0 %2807  ;;  %7936 = vmatprep.subr.mxu1 %v2901_v62  ;;  %7918 = vmatprep.subr.mxu0 %v2716_v55 }
0x16eb   :  { %7920 = vmatprep.mubr.msk.f32.mxu0 %vm844_vm0, %v2808_v60  ;;  %7938 = vmatprep.mubr.msk.f32.mxu1 %vm844_vm0, %v2808_v60 }
0x16ed   :  { %7937 = vmatpush3.msra.mxu1 %v2901_v62  ;;  %7919 = vmatpush3.msra.mxu0 %v2716_v55 }
0x16ee   :  { %8221 = vmatprep.subr.bf16.mxu0 %v11476_v40  ;;  %8224 = vmatprep.subr.bf16.mxu1 %v11476_v40 }
0x16f0   :  { %7921 = vmatmul.mubr.msk.f32.vlgmr.msra.gmra.mrb[18].mxu0 %vm844_vm0, %v2810_v41  ;;  %7939 = vmatmul.mubr.msk.f32.vlgmr.msra.gmra.mrb[18].mxu1 %vm844_vm0, %v2810_v41 }
0x16f1   :  { %8223 = vmatpush3.bf16.msra.mxu0 %v10420_v53  ;;  %8226 = vmatpush3.bf16.msra.mxu1 %v10422_v47 }
0x16f2   :  { %7945 = vmatprep.subr.mxu0 %v11475_v48  ;;  %7954 = vmatprep.subr.mxu1 %v11475_v48 }
0x16f3   :  { %7947 = vmatprep.mubr.msk.f32.mxu0 %vm8950_vm1, %v11475_v48  ;;  %7956 = vmatprep.mubr.msk.f32.mxu1 %vm8950_vm1, %v11475_v48 }
0x16f5   :  { %7946 = vmatpush3.msra.mxu0 %v10433_v43  ;;  %7955 = vmatpush3.msra.mxu1 %v10436_v15 }
0x16f6   :  { %7948 = vmatmul.mubr.f32.vlgmr.msra.gmra.mrb[20].mxu0 %v11475_v48  ;;  %7957 = vmatmul.mubr.f32.vlgmr.msra.gmra.mrb[20].mxu1 %v11475_v48 }
0x16f7   :  { %8227 = vmatprep.subr.bf16.mxu0 %v11476_v40  ;;  %8230 = vmatprep.subr.bf16.mxu1 %v11476_v40 }
0x16f8   :  { %8229 = vmatpush3.bf16.msra.mxu0 %v10420_v53  ;;  %7965 = vmatprep.mubr.msk.f32.mxu0 %vm8950_vm1, %v11475_v48 }
0x16f9   :  { %7963 = vmatprep.subr.mxu0 %v11475_v48  ;;  %8232 = vmatpush3.bf16.msra.mxu1 %v10422_v47 }
0x16fa   :  { %7972 = vmatprep.subr.mxu1 %v11475_v48  ;;  %7974 = vmatprep.mubr.msk.f32.mxu1 %vm8950_vm1, %v11475_v48 }
0x16fc   :  { %7964 = vmatpush3.msra.mxu0 %v10433_v43 }
0x16fd   :  { %7973 = vmatpush3.msra.mxu1 %v10436_v15  ;;  %8233 = vmatprep.subr.bf16.mxu0 %v11476_v40 }
0x16fe   :  { %8236 = vmatprep.subr.bf16.mxu1 %v11476_v40 }
0x17c3   :  { %v7922_v29 = vpop.f32.mrb[18].mxu0  ;;  %v7940_v42 = vpop.f32.mrb[18].mxu1 }
0x17c4   :  { %v10462_v28 = vadd.f32 %v7922_v29, %v7211_v46  ;;  %v2881_v57 = vpop.f32.mrb[19].mxu0  ;;  %v3046_v52 = vpop.f32.mrb[19].mxu1  ;;  %v10468_v61 = vadd.f32 %v7940_v42, %v7216_v49 }
0x17c5   :  { %v10464_v50 = vadd.f32 %v7216_v49, %v3046_v52  ;;  %v10466_v30 = vadd.f32 %v7211_v46, %v2881_v57 }
0x17c9   :  { %v3136_v31 = vpop.f32.mrb[20].mxu0  ;;  %v3231_v12 = vpop.f32.mrb[20].mxu1 }
0x17ca   :  { %v3140_v63 = vadd.f32 %v3136_v31, %v10466_v30  ;;  %v3236_v44 = vrot.slane %v3231_v12, 2  ;;  %v7949_v13 = vpop.f32.mrb[21].mxu0  ;;  %v7958_v54 = vpop.f32.mrb[21].mxu1 }
0x17cc   :  { %8749 = vtanh.f32 %v3140_v63  ;;  %v3238_v45 = vadd.f32 %v3236_v44, %v10468_v61  ;;  %v7217_v14 = vmul.f32 -1.442695, %v3140_v63 }
0x17ce   :  { %8751 = vtanh.f32 %v3238_v45  ;;  %v7218_v60 = vmul.f32 -1.442695, %v3238_v45 }
0x17cf   :  { %8753 = vpow2.f32 %v7217_v14 }
0x17d0   :  { %8755 = vpow2.f32 %v7218_v60 }
0x17d6   :  { %v8750_v62 = vpop.eup %8749 }
0x17d7   :  { %3150 = vrot.lane.b32.xlu0 %v8750_v62, %s8951_s0 }
0x17d8   :  { %v8752_v55 = vpop.eup %8751 }
0x17d9   :  { %3248 = vrot.lane.b32.xlu1 %v8752_v55, %s8951_s0  ;;  %v8754_v58 = vpop.eup %8753 }
0x17da   :  { %v8756_v51 = vpop.eup %8755  ;;  %v3144_v59 = vadd.f32 1.0, %v8754_v58 }
0x17db   :  { %v3242_v41 = vadd.f32 1.0, %v8756_v51 }
0x17dc   :  { %8757 = vrcp.f32 %v3144_v59 }
0x17dd   :  { %8759 = vrcp.f32 %v3242_v41 }
0x17e6   :  { %v8758_v46 = vpop.eup %8757 }
0x17e7   :  { %v8760_v42 = vpop.eup %8759  ;;  %v3148_v31 = vmul.f32 0.0, %v8758_v46 }
0x17e8   :  { %v3246_v44 = vmul.f32 0.0, %v8760_v42 }
0x1849   :  { %v3151_v49 = vpop.permute.xlu0 %3150 }
0x184a   :  { %v3153_v29 = vmul.f32 %v8758_v46, %v3151_v49 }
0x184b   :  { %v3249_v57 = vpop.permute.xlu1 %3248 }
0x184c   :  { %3155 = vrot.lane.b32.xlu0 %v3153_v29, %s8951_s0  ;;  %v3251_v52 = vmul.f32 %v8760_v42, %v3249_v57 }
0x184e   :  { %3253 = vrot.lane.b32.xlu1 %v3251_v52, %s8951_s0 }
0x18be   :  { %v3156_v12 = vpop.permute.xlu0 %3155 }
0x18bf   :  { %v10476_v63 = vadd.f32 %v3156_v12, %v3148_v31 }
0x18c0   :  { %v3254_v13 = vpop.permute.xlu1 %3253 }
0x18c1   :  { %8761 = vtanh.f32 %v10476_v63  ;;  %v10479_v54 = vadd.f32 %v3254_v13, %v3246_v44 }
0x18c3   :  { %8763 = vtanh.f32 %v10479_v54 }
0x18cb   :  { %v8762_v45 = vpop.eup %8761 }
0x18cc   :  { %3161 = vrot.lane.b32.xlu0 %v8762_v45, %s8951_s0 }
0x18cd   :  { %v8764_v62 = vpop.eup %8763 }
0x18ce   :  { %3259 = vrot.lane.b32.xlu1 %v8764_v62, %s8951_s0 }
0x193e   :  { %v3162_v55 = vpop.permute.xlu0 %3161 }
0x193f   :  { %v3164_v14 = vmul.f32 %v8758_v46, %v3162_v55 }
0x1940   :  { %v3260_v60 = vpop.permute.xlu1 %3259 }
0x1941   :  { %3264 = vrot.lane.b32.xlu0 %v3164_v14, %s8952_s5  ;;  %v3262_v58 = vmul.f32 %v8760_v42, %v3260_v60 }
0x1943   :  { %v3370_v51 = vrot.slane %v3262_v58, 6 }
0x1945   :  { %3371 = vrot.lane.b32.xlu1 %v3370_v51, %s8952_s5 }
0x19b3   :  { %v3265_v59 = vpop.permute.xlu0 %3264 }
0x19b4   :  { %7966 = vmatmul.mubr.msk.f32.vlgmr.msra.gmra.mrb[22].mxu0 %vm844_vm0, %v3265_v59 }
0x19b5   :  { %8235 = vmatpush3.bf16.msra.mxu0 %v10420_v53  ;;  %7983 = vmatprep.mubr.msk.f32.mxu0 %vm8950_vm1, %v11475_v48 }
0x19b6   :  { %7981 = vmatprep.subr.mxu0 %v11475_v48 }
0x19b7   :  { %v3372_v41 = vpop.permute.xlu1 %3371 }
0x19b8   :  { %7975 = vmatmul.mubr.msk.f32.vlgmr.msra.gmra.mrb[22].mxu1 %vm844_vm0, %v3372_v41 }
0x19b9   :  { %7982 = vmatpush3.msra.mxu0 %v10433_v43  ;;  %8238 = vmatpush3.bf16.msra.mxu1 %v10422_v47 }
0x19ba   :  { %7992 = vmatprep.mubr.msk.f32.mxu1 %vm8950_vm1, %v11475_v48  ;;  %7990 = vmatprep.subr.mxu1 %v11475_v48 }
0x19bb   :  { %8239 = vmatprep.subr.bf16.mxu0 %v11476_v40 }
0x19bd   :  { %7991 = vmatpush3.msra.mxu1 %v10436_v15 }
0x19be   :  { %8242 = vmatprep.subr.bf16.mxu1 %v11476_v40 }
0x1a87   :  { %v3334_v46 = vpop.f32.mrb[22].mxu0 }
0x1a88   :  { %v3339_v49 = vrot.slane %v3334_v46, 6  ;;  %v7967_v29 = vpop.f32.mrb[23].mxu0 }
0x1a8a   :  { %v3341_v42 = vadd.f32 %v3339_v49, %v10466_v30 }
0x1a8b   :  { %v3441_v57 = vpop.f32.mrb[22].mxu1 }
0x1a8c   :  { %8765 = vtanh.f32 %v3341_v42  ;;  %v3446_v52 = vrot.slane %v3441_v57, 4  ;;  %v7976_v31 = vpop.f32.mrb[23].mxu1  ;;  %v7220_v45 = vmul.f32 -1.442695, %v3341_v42  ;;  %v3350_v42 = vrot.slane %v10476_v63, 6 }
0x1a8e   :  { %v3448_v12 = vadd.f32 %v3446_v52, %v10468_v61 }
0x1a90   :  { %8767 = vtanh.f32 %v3448_v12  ;;  %v7222_v62 = vmul.f32 -1.442695, %v3448_v12  ;;  %v3457_v12 = vrot.slane %v10479_v54, 2 }
0x1a91   :  { %8769 = vpow2.f32 %v7220_v45 }
0x1a92   :  { %8771 = vpow2.f32 %v7222_v62 }
0x1a96   :  { %v8766_v44 = vpop.eup %8765 }
0x1a97   :  { %3354 = vrot.lane.b32.xlu0 %v8766_v44, %s8951_s0 }
0x1a9a   :  { %v8768_v13 = vpop.eup %8767 }
0x1a9b   :  { %3461 = vrot.lane.b32.xlu1 %v8768_v13, %s8951_s0  ;;  %v8770_v55 = vpop.eup %8769 }
0x1a9c   :  { %v3345_v14 = vadd.f32 1.0, %v8770_v55  ;;  %v8772_v60 = vpop.eup %8771 }
0x1a9d   :  { %v3452_v58 = vadd.f32 1.0, %v8772_v60 }
0x1a9e   :  { %8773 = vrcp.f32 %v3345_v14 }
0x1a9f   :  { %8775 = vrcp.f32 %v3452_v58 }
0x1aa8   :  { %v8774_v51 = vpop.eup %8773 }
0x1aa9   :  { %v8776_v46 = vpop.eup %8775  ;;  %v3352_v57 = vmul.f32 %v8774_v51, %v3350_v42 }
0x1aaa   :  { %v3459_v44 = vmul.f32 %v8776_v46, %v3457_v12 }
0x1b09   :  { %v3355_v59 = vpop.permute.xlu0 %3354 }
0x1b0a   :  { %v3357_v41 = vmul.f32 %v8774_v51, %v3355_v59 }
0x1b0c   :  { %3359 = vrot.lane.b32.xlu0 %v3357_v41, %s8951_s0 }
0x1b0d   :  { %v3462_v49 = vpop.permute.xlu1 %3461 }
0x1b0e   :  { %v3464_v29 = vmul.f32 %v8776_v46, %v3462_v49 }
0x1b10   :  { %3466 = vrot.lane.b32.xlu1 %v3464_v29, %s8951_s0 }
0x1b7e   :  { %v3360_v52 = vpop.permute.xlu0 %3359 }
0x1b7f   :  { %v10507_v31 = vadd.f32 %v3360_v52, %v3352_v57 }
0x1b81   :  { %8777 = vtanh.f32 %v10507_v31 }
0x1b82   :  { %v3467_v13 = vpop.permute.xlu1 %3466 }
0x1b83   :  { %v10511_v45 = vadd.f32 %v3467_v13, %v3459_v44 }
0x1b85   :  { %8779 = vtanh.f32 %v10511_v45 }
0x1b8b   :  { %v8778_v62 = vpop.eup %8777 }
0x1b8c   :  { %3365 = vrot.lane.b32.xlu0 %v8778_v62, %s8951_s0 }
0x1b8f   :  { %v8780_v55 = vpop.eup %8779 }
0x1b90   :  { %3472 = vrot.lane.b32.xlu1 %v8780_v55, %s8951_s0 }
0x1bfe   :  { %v3366_v63 = vpop.permute.xlu0 %3365 }
0x1bff   :  { %v3368_v14 = vmul.f32 %v8774_v51, %v3366_v63 }
0x1c01   :  { %v3477_v60 = vrot.slane %v3368_v14, 2 }
0x1c02   :  { %v3473_v58 = vpop.permute.xlu1 %3472 }
0x1c03   :  { %3478 = vrot.lane.b32.xlu0 %v3477_v60, %s8952_s5  ;;  %v3475_v54 = vmul.f32 %v8776_v46, %v3473_v58 }
0x1c05   :  { %v3584_v59 = vrot.slane %v3475_v54, 4 }
0x1c07   :  { %3585 = vrot.lane.b32.xlu1 %v3584_v59, %s8952_s5 }
0x1c75   :  { %v3479_v41 = vpop.permute.xlu0 %3478 }
0x1c76   :  { %7984 = vmatmul.mubr.msk.f32.vlgmr.msra.gmra.mrb[24].mxu0 %vm844_vm0, %v3479_v41 }
0x1c77   :  { %8241 = vmatpush3.bf16.msra.mxu0 %v10420_v53  ;;  %8001 = vmatprep.mubr.msk.f32.mxu0 %vm8950_vm1, %v11475_v48 }
0x1c78   :  { %7999 = vmatprep.subr.mxu0 %v11475_v48 }
0x1c79   :  { %v3586_v49 = vpop.permute.xlu1 %3585 }
0x1c7a   :  { %7993 = vmatmul.mubr.msk.f32.vlgmr.msra.gmra.mrb[24].mxu1 %vm844_vm0, %v3586_v49 }
0x1c7b   :  { %8000 = vmatpush3.msra.mxu0 %v10433_v43  ;;  %8244 = vmatpush3.bf16.msra.mxu1 %v10422_v47 }
0x1c7c   :  { %8010 = vmatprep.mubr.msk.f32.mxu1 %vm8950_vm1, %v11475_v48  ;;  %8008 = vmatprep.subr.mxu1 %v11475_v48 }
0x1c7d   :  { %8245 = vmatprep.subr.bf16.mxu0 %v11476_v40 }
0x1c7f   :  { %8009 = vmatpush3.msra.mxu1 %v10436_v15 }
0x1c80   :  { %8248 = vmatprep.subr.bf16.mxu1 %v11476_v40 }
0x1d49   :  { %v3548_v51 = vpop.f32.mrb[24].mxu0 }
0x1d4a   :  { %v3553_v46 = vrot.slane %v3548_v51, 4  ;;  %v7985_v29 = vpop.f32.mrb[25].mxu0 }
0x1d4c   :  { %v3555_v42 = vadd.f32 %v3553_v46, %v10466_v30 }
0x1d4d   :  { %v3655_v57 = vpop.f32.mrb[24].mxu1 }
0x1d4e   :  { %8781 = vtanh.f32 %v3555_v42  ;;  %v3660_v52 = vrot.slane %v3655_v57, 6  ;;  %v7994_v12 = vpop.f32.mrb[25].mxu1  ;;  %v7224_v55 = vmul.f32 -1.442695, %v3555_v42  ;;  %v3564_v42 = vrot.slane %v10507_v31, 6 }
0x1d50   :  { %v3662_v44 = vadd.f32 %v3660_v52, %v10468_v61 }
0x1d52   :  { %8783 = vtanh.f32 %v3662_v44  ;;  %v7226_v63 = vmul.f32 -1.442695, %v3662_v44  ;;  %v3671_v44 = vrot.slane %v10511_v45, 2 }
0x1d53   :  { %8785 = vpow2.f32 %v7224_v55 }
0x1d54   :  { %8787 = vpow2.f32 %v7226_v63 }
0x1d58   :  { %v8782_v13 = vpop.eup %8781 }
0x1d59   :  { %3568 = vrot.lane.b32.xlu0 %v8782_v13, %s8951_s0 }
0x1d5c   :  { %v8784_v62 = vpop.eup %8783 }
0x1d5d   :  { %3675 = vrot.lane.b32.xlu1 %v8784_v62, %s8951_s0  ;;  %v8786_v14 = vpop.eup %8785 }
0x1d5e   :  { %v3559_v60 = vadd.f32 1.0, %v8786_v14  ;;  %v8788_v58 = vpop.eup %8787 }
0x1d5f   :  { %v3666_v54 = vadd.f32 1.0, %v8788_v58 }
0x1d60   :  { %8789 = vrcp.f32 %v3559_v60 }
0x1d61   :  { %8791 = vrcp.f32 %v3666_v54 }
0x1d6a   :  { %v8790_v59 = vpop.eup %8789 }
0x1d6b   :  { %v8792_v51 = vpop.eup %8791  ;;  %v3566_v57 = vmul.f32 %v8790_v59, %v3564_v42 }
0x1d6c   :  { %v3673_v13 = vmul.f32 %v8792_v51, %v3671_v44 }
0x1dcb   :  { %v3569_v41 = vpop.permute.xlu0 %3568 }
0x1dcc   :  { %v3571_v49 = vmul.f32 %v8790_v59, %v3569_v41 }
0x1dce   :  { %3573 = vrot.lane.b32.xlu0 %v3571_v49, %s8951_s0 }
0x1dcf   :  { %v3676_v46 = vpop.permute.xlu1 %3675 }
0x1dd0   :  { %v3678_v29 = vmul.f32 %v8792_v51, %v3676_v46 }
0x1dd2   :  { %3680 = vrot.lane.b32.xlu1 %v3678_v29, %s8951_s0 }
0x1e40   :  { %v3574_v52 = vpop.permute.xlu0 %3573 }
0x1e41   :  { %v10539_v12 = vadd.f32 %v3574_v52, %v3566_v57 }
0x1e43   :  { %8793 = vtanh.f32 %v10539_v12 }
0x1e44   :  { %v3681_v62 = vpop.permute.xlu1 %3680 }
0x1e45   :  { %v10543_v55 = vadd.f32 %v3681_v62, %v3673_v13 }
0x1e47   :  { %8795 = vtanh.f32 %v10543_v55 }
0x1e4d   :  { %v8794_v63 = vpop.eup %8793 }
0x1e4e   :  { %3579 = vrot.lane.b32.xlu0 %v8794_v63, %s8951_s0 }
0x1e51   :  { %v8796_v14 = vpop.eup %8795 }
0x1e52   :  { %3686 = vrot.lane.b32.xlu1 %v8796_v14, %s8951_s0 }
0x1ec0   :  { %v3580_v31 = vpop.permute.xlu0 %3579 }
0x1ec1   :  { %v3582_v60 = vmul.f32 %v8790_v59, %v3580_v31 }
0x1ec3   :  { %v3691_v58 = vrot.slane %v3582_v60, 4 }
0x1ec4   :  { %v3687_v54 = vpop.permute.xlu1 %3686 }
0x1ec5   :  { %3692 = vrot.lane.b32.xlu0 %v3691_v58, %s8952_s5  ;;  %v3689_v45 = vmul.f32 %v8792_v51, %v3687_v54 }
0x1ec7   :  { %v3798_v41 = vrot.slane %v3689_v45, 2 }
0x1ec9   :  { %3799 = vrot.lane.b32.xlu1 %v3798_v41, %s8952_s5 }
0x1f37   :  { %v3693_v49 = vpop.permute.xlu0 %3692 }
0x1f38   :  { %8002 = vmatmul.mubr.msk.f32.vlgmr.msra.gmra.mrb[26].mxu0 %vm844_vm0, %v3693_v49 }
0x1f39   :  { %8247 = vmatpush3.bf16.msra.mxu0 %v10420_v53  ;;  %8019 = vmatprep.mubr.msk.f32.mxu0 %vm8950_vm1, %v11475_v48 }
0x1f3a   :  { %8017 = vmatprep.subr.mxu0 %v11475_v48 }
0x1f3b   :  { %v3800_v46 = vpop.permute.xlu1 %3799 }
0x1f3c   :  { %8011 = vmatmul.mubr.msk.f32.vlgmr.msra.gmra.mrb[26].mxu1 %vm844_vm0, %v3800_v46 }
0x1f3d   :  { %8018 = vmatpush3.msra.mxu0 %v10433_v43  ;;  %8250 = vmatpush3.bf16.msra.mxu1 %v10422_v47 }
0x1f3e   :  { %8028 = vmatprep.mubr.msk.f32.mxu1 %vm8950_vm1, %v11475_v48  ;;  %8026 = vmatprep.subr.mxu1 %v11475_v48 }
0x1f3f   :  { %8251 = vmatprep.subr.bf16.mxu0 %v11476_v40 }
0x1f41   :  { %8027 = vmatpush3.msra.mxu1 %v10436_v15 }
0x1f42   :  { %8254 = vmatprep.subr.bf16.mxu1 %v11476_v40 }
0x200b   :  { %v3762_v59 = vpop.f32.mrb[26].mxu0 }
0x200c   :  { %v3767_v51 = vrot.slane %v3762_v59, 2  ;;  %v8003_v29 = vpop.f32.mrb[27].mxu0  ;;  %v3778_v59 = vrot.slane %v10539_v12, 6 }
0x200d   :  { %v3882_v29 = vrot.slane %v10543_v55, 2 }
0x200e   :  { %v3769_v42 = vadd.f32 %v3767_v51, %v10466_v30 }
0x200f   :  { %v3869_v57 = vpop.f32.mrb[26].mxu1 }
0x2010   :  { %8797 = vtanh.f32 %v3769_v42  ;;  %v3873_v52 = vadd.f32 %v3869_v57, %v10468_v61  ;;  %v8012_v44 = vpop.f32.mrb[27].mxu1  ;;  %v7228_v63 = vmul.f32 -1.442695, %v3769_v42 }
0x2012   :  { %8799 = vtanh.f32 %v3873_v52  ;;  %v7230_v14 = vmul.f32 -1.442695, %v3873_v52 }
0x2013   :  { %8801 = vpow2.f32 %v7228_v63 }
0x2014   :  { %8803 = vpow2.f32 %v7230_v14 }
0x201a   :  { %v8798_v13 = vpop.eup %8797 }
0x201b   :  { %3782 = vrot.lane.b32.xlu0 %v8798_v13, %s8951_s0 }
0x201c   :  { %v8800_v62 = vpop.eup %8799 }
0x201d   :  { %3886 = vrot.lane.b32.xlu1 %v8800_v62, %s8951_s0  ;;  %v8802_v31 = vpop.eup %8801 }
0x201e   :  { %v8804_v60 = vpop.eup %8803  ;;  %v3773_v58 = vadd.f32 1.0, %v8802_v31 }
0x201f   :  { %v3877_v30 = vadd.f32 1.0, %v8804_v60 }
0x2020   :  { %8805 = vrcp.f32 %v3773_v58 }
0x2021   :  { %8807 = vrcp.f32 %v3877_v30 }
0x202a   :  { %v8806_v54 = vpop.eup %8805 }
0x202b   :  { %v8808_v41 = vpop.eup %8807  ;;  %v3780_v51 = vmul.f32 %v8806_v54, %v3778_v59 }
0x202c   :  { %v3884_v52 = vmul.f32 %v8808_v41, %v3882_v29 }
0x208d   :  { %v3783_v61 = vpop.permute.xlu0 %3782 }
0x208e   :  { %v3785_v45 = vmul.f32 %v8806_v54, %v3783_v61 }
0x208f   :  { %v3887_v49 = vpop.permute.xlu1 %3886 }
0x2090   :  { %3787 = vrot.lane.b32.xlu0 %v3785_v45, %s8951_s0  ;;  %v3889_v46 = vmul.f32 %v8808_v41, %v3887_v49 }
0x2092   :  { %3891 = vrot.lane.b32.xlu1 %v3889_v46, %s8951_s0 }
0x2102   :  { %v3788_v42 = vpop.permute.xlu0 %3787 }
0x2103   :  { %v10572_v57 = vadd.f32 %v3788_v42, %v3780_v51 }
0x2104   :  { %v3892_v44 = vpop.permute.xlu1 %3891 }
0x2105   :  { %8809 = vtanh.f32 %v10572_v57  ;;  %v10575_v13 = vadd.f32 %v3892_v44, %v3884_v52 }
0x2107   :  { %8811 = vtanh.f32 %v10575_v13 }
0x210f   :  { %v8810_v62 = vpop.eup %8809 }
0x2110   :  { %3793 = vrot.lane.b32.xlu0 %v8810_v62, %s8951_s0 }
0x2111   :  { %v8812_v63 = vpop.eup %8811 }
0x2112   :  { %3897 = vrot.lane.b32.xlu1 %v8812_v63, %s8951_s0 }
0x2182   :  { %v3794_v12 = vpop.permute.xlu0 %3793 }
0x2183   :  { %v3796_v14 = vmul.f32 %v8806_v54, %v3794_v12 }
0x2184   :  { %v3898_v31 = vpop.permute.xlu1 %3897 }
0x2185   :  { %v3902_v55 = vrot.slane %v3796_v14, 6  ;;  %v3900_v60 = vmul.f32 %v8808_v41, %v3898_v31 }
0x2187   :  { %3903 = vrot.lane.b32.xlu1 %v3902_v55, %s8952_s5  ;;  %4006 = vrot.lane.b32.xlu0 %v3900_v60, %s8952_s5 }
0x21f9   :  { %v3904_v58 = vpop.permute.xlu1 %3903  ;;  %v4007_v30 = vpop.permute.xlu0 %4006 }
0x21fa   :  { %8020 = vmatmul.mubr.msk.f32.vlgmr.msra.gmra.mrb[28].mxu0 %vm844_vm0, %v3904_v58  ;;  %8029 = vmatmul.mubr.msk.f32.vlgmr.msra.gmra.mrb[28].mxu1 %vm844_vm0, %v4007_v30 }
0x21fb   :  { %8253 = vmatpush3.bf16.msra.mxu0 %v10420_v53  ;;  %8037 = vmatprep.mubr.msk.f32.mxu0 %vm8950_vm1, %v11475_v48 }
0x21fc   :  { %8035 = vmatprep.subr.mxu0 %v11475_v48  ;;  %8256 = vmatpush3.bf16.msra.mxu1 %v10422_v47 }
0x21fd   :  { %8046 = vmatprep.mubr.msk.f32.mxu1 %vm8950_vm1, %v11475_v48  ;;  %8044 = vmatprep.subr.mxu1 %v11475_v48 }
0x21ff   :  { %8036 = vmatpush3.msra.mxu0 %v10433_v43 }
0x2200   :  { %8257 = vmatprep.subr.bf16.mxu0 %v11476_v40  ;;  %8045 = vmatpush3.msra.mxu1 %v10436_v15 }
0x2201   :  { %8260 = vmatprep.subr.bf16.mxu1 %v11476_v40 }
0x22cd   :  { %v3973_v54 = vpop.f32.mrb[28].mxu0  ;;  %v4076_v45 = vpop.f32.mrb[28].mxu1 }
0x22ce   :  { %v3977_v61 = vadd.f32 %v3973_v54, %v10462_v28  ;;  %v8021_v41 = vpop.f32.mrb[29].mxu0  ;;  %v4081_v49 = vrot.slane %v4076_v45, 2  ;;  %v8030_v46 = vpop.f32.mrb[29].mxu1  ;;  %v3986_v54 = vrot.slane %v10572_v57, 6  ;;  %v4092_v45 = vrot.slane %v10575_v13, 2 }
0x22d0   :  { %8813 = vtanh.f32 %v3977_v61  ;;  %v4083_v59 = vadd.f32 %v4081_v49, %v10464_v50  ;;  %v7232_v42 = vmul.f32 -1.442695, %v3977_v61 }
0x22d2   :  { %8815 = vtanh.f32 %v4083_v59  ;;  %v7234_v52 = vmul.f32 -1.442695, %v4083_v59 }
0x22d3   :  { %8817 = vpow2.f32 %v7232_v42 }
0x22d4   :  { %8819 = vpow2.f32 %v7234_v52 }
0x22da   :  { %v8814_v51 = vpop.eup %8813 }
0x22db   :  { %3990 = vrot.lane.b32.xlu0 %v8814_v51, %s8951_s0 }
0x22dc   :  { %v8816_v29 = vpop.eup %8815 }
0x22dd   :  { %4096 = vrot.lane.b32.xlu1 %v8816_v29, %s8951_s0  ;;  %v8818_v44 = vpop.eup %8817 }
0x22de   :  { %v8820_v62 = vpop.eup %8819  ;;  %v3981_v63 = vadd.f32 1.0, %v8818_v44 }
0x22df   :  { %v4087_v12 = vadd.f32 1.0, %v8820_v62 }
0x22e0   :  { %8821 = vrcp.f32 %v3981_v63 }
0x22e1   :  { %8823 = vrcp.f32 %v4087_v12 }
0x22ea   :  { %v8822_v14 = vpop.eup %8821 }
0x22eb   :  { %v8824_v60 = vpop.eup %8823  ;;  %v3988_v61 = vmul.f32 %v8822_v14, %v3986_v54 }
0x22ec   :  { %v4094_v46 = vmul.f32 %v8824_v60, %v4092_v45 }
0x234d   :  { %v3991_v55 = vpop.permute.xlu0 %3990 }
0x234e   :  { %v3993_v31 = vmul.f32 %v8822_v14, %v3991_v55 }
0x234f   :  { %v4097_v58 = vpop.permute.xlu1 %4096 }
0x2350   :  { %3995 = vrot.lane.b32.xlu0 %v3993_v31, %s8951_s0  ;;  %v4099_v30 = vmul.f32 %v8824_v60, %v4097_v58 }
0x2352   :  { %4101 = vrot.lane.b32.xlu1 %v4099_v30, %s8951_s0 }
0x23c2   :  { %v3996_v41 = vpop.permute.xlu0 %3995 }
0x23c3   :  { %v10604_v49 = vadd.f32 %v3996_v41, %v3988_v61 }
0x23c4   :  { %v4102_v59 = vpop.permute.xlu1 %4101 }
0x23c5   :  { %8825 = vtanh.f32 %v10604_v49  ;;  %v10607_v51 = vadd.f32 %v4102_v59, %v4094_v46 }
0x23c7   :  { %8827 = vtanh.f32 %v10607_v51 }
0x23cf   :  { %v8826_v29 = vpop.eup %8825 }
0x23d0   :  { %4001 = vrot.lane.b32.xlu0 %v8826_v29, %s8951_s0 }
0x23d1   :  { %v8828_v42 = vpop.eup %8827 }
0x23d2   :  { %4107 = vrot.lane.b32.xlu1 %v8828_v42, %s8951_s0 }
0x2442   :  { %v4002_v57 = vpop.permute.xlu0 %4001 }
0x2443   :  { %v4004_v52 = vmul.f32 %v8822_v14, %v4002_v57 }
0x2444   :  { %v4108_v13 = vpop.permute.xlu1 %4107 }
0x2445   :  { %4112 = vrot.lane.b32.xlu0 %v4004_v52, %s8952_s5  ;;  %v4110_v44 = vmul.f32 %v8824_v60, %v4108_v13 }
0x2447   :  { %v4218_v62 = vrot.slane %v4110_v44, 6 }
0x2449   :  { %4219 = vrot.lane.b32.xlu1 %v4218_v62, %s8952_s5 }
0x24b7   :  { %v4113_v63 = vpop.permute.xlu0 %4112 }
0x24b8   :  { %8038 = vmatmul.mubr.msk.f32.vlgmr.msra.gmra.mrb[30].mxu0 %vm844_vm0, %v4113_v63 }
0x24b9   :  { %8259 = vmatpush3.bf16.msra.mxu0 %v10420_v53  ;;  %8055 = vmatprep.mubr.msk.f32.mxu0 %vm8950_vm1, %v11475_v48 }
0x24ba   :  { %8053 = vmatprep.subr.mxu0 %v11475_v48 }
0x24bb   :  { %v4220_v12 = vpop.permute.xlu1 %4219 }
0x24bc   :  { %8047 = vmatmul.mubr.msk.f32.vlgmr.msra.gmra.mrb[30].mxu1 %vm844_vm0, %v4220_v12 }
0x24bd   :  { %8054 = vmatpush3.msra.mxu0 %v10433_v43  ;;  %8262 = vmatpush3.bf16.msra.mxu1 %v10422_v47 }
0x24be   :  { %8064 = vmatprep.mubr.msk.f32.mxu1 %vm8950_vm1, %v11475_v48  ;;  %8062 = vmatprep.subr.mxu1 %v11475_v48 }
0x24bf   :  { %8263 = vmatprep.subr.bf16.mxu0 %v11476_v40 }
0x24c1   :  { %8063 = vmatpush3.msra.mxu1 %v10436_v15 }
0x24c2   :  { %8266 = vmatprep.subr.bf16.mxu1 %v11476_v40 }
0x258b   :  { %v4182_v14 = vpop.f32.mrb[30].mxu0 }
0x258c   :  { %v4187_v55 = vrot.slane %v4182_v14, 6  ;;  %v8039_v31 = vpop.f32.mrb[31].mxu0 }
0x258e   :  { %v4189_v60 = vadd.f32 %v4187_v55, %v10462_v28  ;;  %v4198_v55 = vrot.slane %v10604_v49, 6 }
0x258f   :  { %v4289_v58 = vpop.f32.mrb[30].mxu1 }
0x2590   :  { %8829 = vtanh.f32 %v4189_v60  ;;  %v4294_v30 = vrot.slane %v4289_v58, 4  ;;  %v8048_v54 = vpop.f32.mrb[31].mxu1  ;;  %v7236_v46 = vmul.f32 -1.442695, %v4189_v60 }
0x2592   :  { %v4296_v61 = vadd.f32 %v4294_v30, %v10464_v50  ;;  %v4305_v30 = vrot.slane %v10607_v51, 2 }
0x2594   :  { %8831 = vtanh.f32 %v4296_v61  ;;  %v7238_v59 = vmul.f32 -1.442695, %v4296_v61 }
0x2595   :  { %8833 = vpow2.f32 %v7236_v46 }
0x2596   :  { %8835 = vpow2.f32 %v7238_v59 }
0x259a   :  { %v8830_v45 = vpop.eup %8829 }
0x259b   :  { %4202 = vrot.lane.b32.xlu0 %v8830_v45, %s8951_s0 }
0x259e   :  { %v8832_v41 = vpop.eup %8831 }
0x259f   :  { %4309 = vrot.lane.b32.xlu1 %v8832_v41, %s8951_s0  ;;  %v8834_v29 = vpop.eup %8833 }
0x25a0   :  { %v4193_v42 = vadd.f32 1.0, %v8834_v29  ;;  %v8836_v57 = vpop.eup %8835 }
0x25a1   :  { %v4300_v52 = vadd.f32 1.0, %v8836_v57 }
0x25a2   :  { %8837 = vrcp.f32 %v4193_v42 }
0x25a3   :  { %8839 = vrcp.f32 %v4300_v52 }
0x25ac   :  { %v8838_v13 = vpop.eup %8837 }
0x25ad   :  { %v8840_v63 = vpop.eup %8839  ;;  %v4200_v31 = vmul.f32 %v8838_v13, %v4198_v55 }
0x25ae   :  { %v4307_v54 = vmul.f32 %v8840_v63, %v4305_v30 }
0x260d   :  { %v4203_v44 = vpop.permute.xlu0 %4202 }
0x260e   :  { %v4205_v62 = vmul.f32 %v8838_v13, %v4203_v44 }
0x2610   :  { %4207 = vrot.lane.b32.xlu0 %v4205_v62, %s8951_s0 }
0x2611   :  { %v4310_v12 = vpop.permute.xlu1 %4309 }
0x2612   :  { %v4312_v14 = vmul.f32 %v8840_v63, %v4310_v12 }
0x2614   :  { %4314 = vrot.lane.b32.xlu1 %v4312_v14, %s8951_s0 }
0x2682   :  { %v4208_v60 = vpop.permute.xlu0 %4207 }
0x2683   :  { %v10635_v58 = vadd.f32 %v4208_v60, %v4200_v31 }
0x2685   :  { %8841 = vtanh.f32 %v10635_v58 }
0x2686   :  { %v4315_v61 = vpop.permute.xlu1 %4314 }
0x2687   :  { %v10639_v45 = vadd.f32 %v4315_v61, %v4307_v54 }
0x2689   :  { %8843 = vtanh.f32 %v10639_v45 }
0x268f   :  { %v8842_v41 = vpop.eup %8841 }
0x2690   :  { %4213 = vrot.lane.b32.xlu0 %v8842_v41, %s8951_s0 }
0x2693   :  { %v8844_v46 = vpop.eup %8843 }
0x2694   :  { %4320 = vrot.lane.b32.xlu1 %v8844_v46, %s8951_s0 }
0x2702   :  { %v4214_v49 = vpop.permute.xlu0 %4213 }
0x2703   :  { %v4216_v59 = vmul.f32 %v8838_v13, %v4214_v49 }
0x2705   :  { %v4325_v29 = vrot.slane %v4216_v59, 2 }
0x2706   :  { %v4321_v42 = vpop.permute.xlu1 %4320 }
0x2707   :  { %4326 = vrot.lane.b32.xlu0 %v4325_v29, %s8952_s5  ;;  %v4323_v51 = vmul.f32 %v8840_v63, %v4321_v42 }
0x2709   :  { %v4432_v57 = vrot.slane %v4323_v51, 4 }
0x270b   :  { %4433 = vrot.lane.b32.xlu1 %v4432_v57, %s8952_s5  ;;  %v4412_v57 = vrot.slane %v10635_v58, 6 }
0x2779   :  { %v4327_v52 = vpop.permute.xlu0 %4326 }
0x277a   :  { %8056 = vmatmul.mubr.msk.f32.vlgmr.msra.gmra.mrb[32].mxu0 %vm844_vm0, %v4327_v52 }
0x277b   :  { %8265 = vmatpush3.bf16.msra.mxu0 %v10420_v53  ;;  %8073 = vmatprep.mubr.msk.f32.mxu0 %vm8950_vm1, %v11475_v48 }
0x277c   :  { %8071 = vmatprep.subr.mxu0 %v11475_v48 }
0x277d   :  { %v4434_v44 = vpop.permute.xlu1 %4433 }
0x277e   :  { %8065 = vmatmul.mubr.msk.f32.vlgmr.msra.gmra.mrb[32].mxu1 %vm844_vm0, %v4434_v44 }
0x277f   :  { %8072 = vmatpush3.msra.mxu0 %v10433_v43  ;;  %8268 = vmatpush3.bf16.msra.mxu1 %v10422_v47 }
0x2780   :  { %8082 = vmatprep.mubr.msk.f32.mxu1 %vm8950_vm1, %v11475_v48  ;;  %8080 = vmatprep.subr.mxu1 %v11475_v48 }
0x2781   :  { %8269 = vmatprep.subr.bf16.mxu0 %v11476_v40 }
0x2783   :  { %8081 = vmatpush3.msra.mxu1 %v10436_v15 }
0x2784   :  { %8272 = vmatprep.subr.bf16.mxu1 %v11476_v40 }
0x284d   :  { %v4396_v53 = vpop.f32.mrb[32].mxu0 }
0x284e   :  { %v4401_v13 = vrot.slane %v4396_v53, 4  ;;  %v8057_v62 = vpop.f32.mrb[33].mxu0 }
0x2850   :  { %v4403_v63 = vadd.f32 %v4401_v13, %v10462_v28  ;;  %v4519_v13 = vrot.slane %v10639_v45, 2 }
0x2851   :  { %v4503_v43 = vpop.f32.mrb[32].mxu1 }
0x2852   :  { %8845 = vtanh.f32 %v4403_v63  ;;  %v4508_v12 = vrot.slane %v4503_v43, 6  ;;  %v8066_v47 = vpop.f32.mrb[33].mxu1  ;;  %v7240_v15 = vmul.f32 -1.442695, %v4403_v63 }
0x2854   :  { %v4510_v14 = vadd.f32 %v4508_v12, %v10464_v50 }
0x2856   :  { %8847 = vtanh.f32 %v4510_v14  ;;  %v7242_v60 = vmul.f32 -1.442695, %v4510_v14 }
0x2857   :  { %8849 = vpow2.f32 %v7240_v15 }
0x2858   :  { %8851 = vpow2.f32 %v7242_v60 }
0x285c   :  { %v8846_v55 = vpop.eup %8845 }
0x285d   :  { %4416 = vrot.lane.b32.xlu0 %v8846_v55, %s8951_s0 }
0x2860   :  { %v8848_v31 = vpop.eup %8847 }
0x2861   :  { %4523 = vrot.lane.b32.xlu1 %v8848_v31, %s8951_s0  ;;  %v8850_v30 = vpop.eup %8849 }
0x2862   :  { %v4407_v54 = vadd.f32 1.0, %v8850_v30  ;;  %v8852_v61 = vpop.eup %8851 }
0x2863   :  { %v4514_v41 = vadd.f32 1.0, %v8852_v61 }
0x2864   :  { %8853 = vrcp.f32 %v4407_v54 }
0x2865   :  { %8855 = vrcp.f32 %v4514_v41 }
0x286e   :  { %v8854_v46 = vpop.eup %8853 }
0x286f   :  { %v8856_v29 = vpop.eup %8855  ;;  %v4414_v52 = vmul.f32 %v8854_v46, %v4412_v57 }
0x2870   :  { %v4521_v62 = vmul.f32 %v8856_v29, %v4519_v13 }
0x28cf   :  { %v4417_v49 = vpop.permute.xlu0 %4416 }
0x28d0   :  { %v4419_v59 = vmul.f32 %v8854_v46, %v4417_v49 }
0x28d2   :  { %4421 = vrot.lane.b32.xlu0 %v4419_v59, %s8951_s0 }
0x28d3   :  { %v4524_v42 = vpop.permute.xlu1 %4523 }
0x28d4   :  { %v4526_v51 = vmul.f32 %v8856_v29, %v4524_v42 }
0x28d6   :  { %4528 = vrot.lane.b32.xlu1 %v4526_v51, %s8951_s0 }
0x2944   :  { %v4422_v44 = vpop.permute.xlu0 %4421 }
0x2945   :  { %v4424_v53 = vadd.f32 %v4422_v44, %v4414_v52 }
0x2947   :  { %8857 = vtanh.f32 %v4424_v53 }
0x2948   :  { %v4529_v63 = vpop.permute.xlu1 %4528 }
0x2949   :  { %v4531_v43 = vadd.f32 %v4529_v63, %v4521_v62 }
0x294b   :  { %8859 = vtanh.f32 %v4531_v43 }
0x2951   :  { %v8858_v12 = vpop.eup %8857 }
0x2952   :  { %4427 = vrot.lane.b32.xlu0 %v8858_v12, %s8951_s0 }
0x2955   :  { %v8860_v47 = vpop.eup %8859 }
0x2956   :  { %4534 = vrot.lane.b32.xlu1 %v8860_v47, %s8951_s0 }
0x29c4   :  { %v4428_v14 = vpop.permute.xlu0 %4427 }
0x29c5   :  { %v4430_v55 = vmul.f32 %v8854_v46, %v4428_v14 }
0x29c7   :  { %v4539_v31 = vrot.slane %v4430_v55, 4 }
0x29c8   :  { %v4535_v58 = vpop.permute.xlu1 %4534 }
0x29c9   :  { %4540 = vrot.lane.b32.xlu0 %v4539_v31, %s8952_s5  ;;  %v4537_v15 = vmul.f32 %v8856_v29, %v4535_v58  ;;  %v4626_v31 = vrot.slane %v4424_v53, 6  ;;  %v4785_v53 = vld [vmem:[%s11480_s21 + $0x10] sm:$0xff] }
0x29cb   :  { %v4646_v60 = vrot.slane %v4537_v15, 2  ;;  %v4730_v15 = vrot.slane %v4531_v43, 2  ;;  %v4870_v43 = vld [vmem:[%s11481_s25 + $0x10] sm:$0xff] }
0x29cd   :  { %4647 = vrot.lane.b32.xlu1 %v4646_v60, %s8952_s5 }
0x2a3b   :  { %v4541_v45 = vpop.permute.xlu0 %4540 }
0x2a3c   :  { %8074 = vmatmul.mubr.msk.f32.vlgmr.msra.gmra.mrb[34].mxu0 %vm844_vm0, %v4541_v45 }
0x2a3d   :  { %8091 = vmatprep.mubr.msk.f32.mxu0 %vm8950_vm1, %v11475_v48 }
0x2a3f   :  { %v4648_v30 = vpop.permute.xlu1 %4647 }
0x2a40   :  { %8083 = vmatmul.mubr.msk.f32.vlgmr.msra.gmra.mrb[34].mxu1 %vm844_vm0, %v4648_v30 }
0x2a41   :  { %8100 = vmatprep.mubr.msk.f32.mxu1 %vm8950_vm1, %v11475_v48 }
0x2b0f   :  { %v4610_v54 = vpop.f32.mrb[34].mxu0 }
0x2b10   :  { %v4615_v61 = vrot.slane %v4610_v54, 2  ;;  %v8075_v41 = vpop.f32.mrb[35].mxu0 }
0x2b11   :  { %v4783_v41 = vld [vmem:[%s11480_s21] sm:$0xff] }
0x2b12   :  { %v4617_v46 = vadd.f32 %v4615_v61, %v10462_v28 }
0x2b13   :  { %v4717_v49 = vpop.f32.mrb[34].mxu1 }
0x2b14   :  { %8861 = vtanh.f32 %v4617_v46  ;;  %v4721_v59 = vadd.f32 %v4717_v49, %v10464_v50  ;;  %v8084_v29 = vpop.f32.mrb[35].mxu1  ;;  %v7244_v57 = vmul.f32 -1.442695, %v4617_v46  ;;  %v4784_v46 = vld [vmem:[%s11480_s21 + $0x8] sm:$0xff]  ;;  %v4868_v49 = vld [vmem:[%s11481_s25] sm:$0xff] }
0x2b15   :  { %v4869_v29 = vld [vmem:[%s11481_s25 + $0x8] sm:$0xff] }
0x2b16   :  { %8863 = vtanh.f32 %v4721_v59  ;;  %v7246_v52 = vmul.f32 -1.442695, %v4721_v59  ;;  %v8270_v59 = vpack.c.bf16 %v4784_v46, %v4783_v41  ;;  %v7251_v46 = vld [vmem:[%s11485_s14] ss:$0 sm:$0xff] }
0x2b17   :  { %8865 = vpow2.f32 %v7244_v57 }
0x2b18   :  { %8867 = vpow2.f32 %v7246_v52  ;;  %8271 = vmatpush3.bf16.msra.mxu0 %v8270_v59 }
0x2b19   :  { %8089 = vmatprep.subr.mxu0 %v11475_v48 }
0x2b1c   :  { %8090 = vmatpush3.msra.mxu0 %v4785_v53 }
0x2b1d   :  { %8275 = vmatprep.subr.bf16.mxu0 %v11476_v40 }
0x2b1e   :  { %v8862_v42 = vpop.eup %8861 }
0x2b1f   :  { %4630 = vrot.lane.b32.xlu0 %v8862_v42, %s8951_s0  ;;  %v8273_v42 = vpack.c.bf16 %v4869_v29, %v4868_v49 }
0x2b20   :  { %v8864_v51 = vpop.eup %8863 }
0x2b21   :  { %4734 = vrot.lane.b32.xlu1 %v8864_v51, %s8951_s0  ;;  %v8866_v44 = vpop.eup %8865  ;;  %8274 = vmatpush3.bf16.msra.mxu1 %v8273_v42  ;;  %v4764_v42 = vlaneseq }
0x2b22   :  { %v8868_v13 = vpop.eup %8867  ;;  %v4621_v62 = vadd.f32 1.0, %v8866_v44  ;;  %8098 = vmatprep.subr.mxu1 %v11475_v48 }
0x2b23   :  { %v4725_v28 = vadd.f32 1.0, %v8868_v13  ;;  %v4767_v53 = vand.u32 127, %v4764_v42 }
0x2b24   :  { %8869 = vrcp.f32 %v4621_v62 }
0x2b25   :  { %8871 = vrcp.f32 %v4725_v28  ;;  %8099 = vmatpush3.msra.mxu1 %v4870_v43 }
0x2b26   :  { %8112 = vmatprep.subr.mxu1 %v11475_v48 }
0x2b2e   :  { %v8870_v63 = vpop.eup %8869 }
0x2b2f   :  { %v8872_v47 = vpop.eup %8871  ;;  %v4628_v58 = vmul.f32 %v8870_v63, %v4626_v31  ;;  %v4949_v31 = vld [vmem:[%s11482_s29 + $0x8] sm:$0xff] }
0x2b30   :  { %v4732_v30 = vmul.f32 %v8872_v47, %v4730_v15 }
0x2b91   :  { %v4631_v50 = vpop.permute.xlu0 %4630 }
0x2b92   :  { %v4633_v12 = vmul.f32 %v8870_v63, %v4631_v50 }
0x2b93   :  { %v4735_v14 = vpop.permute.xlu1 %4734 }
0x2b94   :  { %4635 = vrot.lane.b32.xlu0 %v4633_v12, %s8951_s0  ;;  %v4737_v55 = vmul.f32 %v8872_v47, %v4735_v14 }
0x2b96   :  { %4739 = vrot.lane.b32.xlu1 %v4737_v55, %s8951_s0  ;;  %v4948_v55 = vld [vmem:[%s11482_s29] sm:$0xff] }
0x2c06   :  { %v4636_v60 = vpop.permute.xlu0 %4635 }
0x2c07   :  { %v4638_v45 = vadd.f32 %v4636_v60, %v4628_v58  ;;  %v8276_v58 = vpack.c.bf16 %v4949_v31, %v4948_v55 }
0x2c08   :  { %v4740_v54 = vpop.permute.xlu1 %4739 }
0x2c09   :  { %8873 = vtanh.f32 %v4638_v45  ;;  %v4742_v61 = vadd.f32 %v4740_v54, %v4732_v30  ;;  %v7247_v45 = vld [vmem:[%s11484_s8] ss:$0 sm:$0xff] }
0x2c0b   :  { %8875 = vtanh.f32 %v4742_v61 }
0x2c13   :  { %v8874_v51 = vpop.eup %8873 }
0x2c14   :  { %4641 = vrot.lane.b32.xlu0 %v8874_v51, %s8951_s0  ;;  %v10725_v51 = vshrl.u32 %v4764_v42, 7 }
0x2c15   :  { %v8876_v57 = vpop.eup %8875 }
0x2c16   :  { %4745 = vrot.lane.b32.xlu1 %v8876_v57, %s8951_s0  ;;  %v4768_v43 = vsub.s32 %v10725_v51, %v4767_v53  ;;  %v8953_v57 = vmov -1e+30  }
0x2c18   :  { %vm4770_vm5 = vcmp.eq.s32.totalorder %v4768_v43, 2  ;;  %vm4771_vm6 = vcmp.eq.s32.totalorder %v4768_v43, 4294967294  ;;  %vm4769_vm7 = vcmp.eq.s32.totalorder %v4768_v43, 0  ;;  %vm4774_vm9 = vcmp.eq.s32.totalorder %v4768_v43, 4 }
0x2c19   :  { %vm4772_vm8 = vmor %vm4770_vm5, %vm4771_vm6  ;;  %vm4775_vm10 = vcmp.eq.s32.totalorder %v4768_v43, 4294967292  ;;  %vm4778_vm13 = vcmp.eq.s32.totalorder %v4768_v43, 6  ;;  %vm4779_vm14 = vcmp.eq.s32.totalorder %v4768_v43, 4294967290 }
0x2c1a   :  { %vm4773_vm11 = vmor %vm4769_vm7, %vm4772_vm8 }
0x2c1b   :  { %vm4776_vm12 = vmor %vm4774_vm9, %vm4775_vm10 }
0x2c1c   :  { %vm4777_vm15 = vmor %vm4773_vm11, %vm4776_vm12 }
0x2c1d   :  { %vm4780_vm2 = vmor %vm4778_vm13, %vm4779_vm14 }
0x2c86   :  { %v4642_v52 = vpop.permute.xlu0 %4641 }
0x2c87   :  { %v4644_v44 = vmul.f32 %v8870_v63, %v4642_v52 }
0x2c88   :  { %v4746_v62 = vpop.permute.xlu1 %4745 }
0x2c89   :  { %v4756_v13 = vrot.slane %v4644_v44, 2  ;;  %v4748_v28 = vmul.f32 %v8872_v47, %v4746_v62  ;;  %v7249_v47 = vld [vmem:[%s11483_s3] ss:$0 sm:$0xff] }
0x2c8b   :  { %v4762_v50 = vsel %vm2701_vm3, %v10404_v56, %v4756_v13  ;;  %v4759_v12 = vrot.slane %v4748_v28, 2  ;;  %v4950_v56 = vld [vmem:[%s11482_s29 + $0x10] sm:$0xff]  ;;  %vm4781_vm3 = vmor %vm4777_vm15, %vm4780_vm2 }
0x2c8c   :  { %v4782_v52 = vsel %vm4781_vm3, 0.0, %v8953_v57 }
0x2c8d   :  { %v10699_v14 = vsel %vm2703_vm4, %v4762_v50, %v4759_v12  ;;  %vm5106_vm4 = vcmask 64512  }
0x2c8e   :  { %4794 = vrot.lane.b32.xlu0 %v10699_v14, %s8952_s5 }
0x2d00   :  { %v4795_v63 = vpop.permute.xlu0 %4794 }
0x2d01   :  { %8092 = vmatmul.mubr.msk.f32.vlgmr.msra.gmra.mrb[36].mxu0 %vm844_vm0, %v4795_v63  ;;  %8101 = vmatmul.mubr.msk.f32.vlgmr.msra.gmra.mrb[36].mxu1 %vm844_vm0, %v4795_v63 }
0x2d02   :  { %8277 = vmatpush3.bf16.msra.mxu0 %v8276_v58  ;;  %8109 = vmatprep.mubr.msk.f32.mxu0 %vm8950_vm1, %v11475_v48 }
0x2d03   :  { %8107 = vmatprep.subr.mxu0 %v11475_v48  ;;  %8114 = vmatprep.mubr.msk.f32.mxu1 %vm8950_vm1, %v11475_v48 }
0x2d06   :  { %8108 = vmatpush3.msra.mxu0 %v4950_v56  ;;  %v5191_v56 = vld [vmem:[%s11486_s24] sm:$0xff] }
0x2d07   :  { %8110 = vmatmul.mubr.msk.f32.vlgmr.msra.gmra.mrb[38].mxu0 %vm844_vm0, %v4795_v63  ;;  %8278 = vmatprep.subr.bf16.mxu0 %v11476_v40 }
0x2d08   :  { %8128 = vmatprep.mubr.msk.f32.mxu0 %vm8950_vm1, %v11475_v48 }
0x2dd4   :  { %v4864_v15 = vpop.f32.mrb[36].mxu0  ;;  %v4944_v60 = vpop.f32.mrb[36].mxu1 }
0x2dd5   :  { %v4945_v30 = vadd.f32 %v7249_v47, %v4944_v60  ;;  %v8093_v54 = vpop.f32.mrb[37].mxu0  ;;  %v8102_v61 = vpop.f32.mrb[37].mxu1  ;;  %v4865_v41 = vadd.f32 %v7247_v45, %v4864_v15  ;;  %v5192_v47 = vld [vmem:[%s11486_s24 + $0x8] sm:$0xff] }
0x2dd6   :  { %v8279_v15 = vpack.c.bf16 %v5192_v47, %v5191_v56  ;;  %v5193_v54 = vld [vmem:[%s11486_s24 + $0x10] sm:$0xff] }
0x2dd7   :  { %8113 = vmatpush3.xpose.msk.msra.mxu1 %vm844_vm0, %v4945_v30 }
0x2dd8   :  { %8117 = vmatprep.subr.mxu1 %v11475_v48  ;;  %8280 = vmatpush3.bf16.msra.mxu0 %v8279_v15 }
0x2dd9   :  { %8126 = vmatprep.subr.mxu0 %v11475_v48 }
0x2dda   :  { %v5024_v49 = vpop.f32.mrb[38].mxu0  ;;  %8115 = vmatmul.mubr.msk.f32.vlgmr.msra.gmra.mrb[38].mxu1 %vm844_vm0, %v4865_v41 }
0x2ddb   :  { %v5025_v59 = vadd.f32 %v7251_v46, %v5024_v49  ;;  %v8111_v29 = vpop.f32.mrb[39].mxu0  ;;  %8119 = vmatprep.mubr.msk.f32.mxu1 %vm8950_vm1, %v11475_v48  ;;  %v7256_v46 = vld [vmem:[%s11487_s30] ss:$0 sm:$0xff] }
0x2ddc   :  { %8127 = vmatpush3.msra.mxu0 %v5193_v54 }
0x2ddd   :  { %8118 = vmatpush3.msra.mxu1 %v5025_v59 }
0x2ead   :  { %v5100_v44 = vpop.f32.mrb[38].mxu1 }
0x2eae   :  { %v5104_v13 = vmul.f32 0.20412415, %v5100_v44  ;;  %v8116_v62 = vpop.f32.mrb[39].mxu1 }
0x2eb0   :  { %v5105_v28 = vadd.f32 %v5104_v13, %v4782_v52  ;;  %v7258_v52 = vld [vmem:[%s11488_s20] ss:$0 sm:$0xff] }
0x2eb2   :  { %v5107_v50 = vsel %vm5106_vm4, %v5105_v28, -inf }
0x2eb3   :  { %5108 = vmax.xlane.f32.xlu1 %v5107_v50 }
0x2f40   :  { %v5109_v12 = vpop.xlane.xlu1 %5108 }
0x2f41   :  { %v5110_v55 = vsub.f32 %v5105_v28, %v5109_v12 }
0x2f43   :  { %v5111_v31 = vmul.f32 1.442695, %v5110_v55 }
0x2f45   :  { %8877 = vpow2.f32 %v5111_v31 }
0x2f4f   :  { %v8878_v58 = vpop.eup %8877 }
0x2f50   :  { %v5113_v63 = vsel %vm5106_vm4, %v8878_v58, 0.0 }
0x2f51   :  { %5114 = vadd.xlane.f32.xlu0 %v5113_v63 }
0x2fde   :  { %v5115_v60 = vpop.xlane.xlu0 %5114 }
0x2fdf   :  { %8879 = vrcp.f32 %v5115_v60 }
0x2fe9   :  { %v8880_v45 = vpop.eup %8879 }
0x2fea   :  { %v5117_v30 = vmul.f32 %v8880_v45, %v8878_v58 }
0x2fec   :  { %8120 = vmatmul.mubr.msk.f32.vlgmr.msra.gmra.mrb[40].mxu1 %vm5106_vm4, %v5117_v30 }
0x30bf   :  { %v5187_v61 = vpop.f32.mrb[40].mxu1 }
0x30c0   :  { %v8121_v41 = vpop.f32.mrb[41].mxu1  ;;  %8129 = vmatmul.mubr.msk.f32.vlgmr.msra.gmra.mrb[40].mxu0 %vm844_vm0, %v5187_v61 }
0x3193   :  { %v5270_v49 = vpop.f32.mrb[40].mxu0 }
0x3194   :  { %v5271_v59 = vadd.f32 %v7256_v46, %v5270_v49  ;;  %v8130_v29 = vpop.f32.mrb[41].mxu0 }
0x3196   :  { %5275 = vrot.lane.b32.xlu0 %v5271_v59, %s8952_s5 }
0x3208   :  { %v5276_v42 = vpop.permute.xlu0 %5275 }
0x3209   :  { %v5278_v53 = vadd.f32 %v5276_v42, %v10699_v14  ;;  %v7259_v14 = vld [vmem:[%s11489_s4] ss:$0 sm:$0xff] }
0x320b   :  { %5280 = vrot.lane.b32.xlu1 %v5278_v53, %s8952_s5 }
0x327d   :  { %v5281_v43 = vpop.permute.xlu1 %5280 }
0x327e   :  { %v5283_v57 = vsel %vm844_vm0, %v5281_v43, 0.0 }
0x327f   :  { %5284 = vadd.xlane.f32.xlu1 %v5283_v57 }
0x3290   :  { %5307 = vrot.lane.b32.xlu1 %v7258_v52, %s8952_s5 }
0x330c   :  { %v5285_v44 = vpop.xlane.xlu1 %5284 }
0x330d   :  { %v5287_v13 = vmul.f32 0.041666668, %v5285_v44 }
0x330f   :  { %v5288_v62 = vsub.f32 %v5278_v53, %v5287_v13 }
0x3310   :  { %v5308_v56 = vpop.permute.xlu1 %5307 }
0x3311   :  { %v5289_v28 = vmul.f32 %v5288_v62, %v5288_v62 }
0x3313   :  { %5291 = vrot.lane.b32.xlu0 %v5289_v28, %s8952_s5 }
0x3385   :  { %v5292_v50 = vpop.permute.xlu0 %5291 }
0x3386   :  { %v5294_v12 = vsel %vm844_vm0, %v5292_v50, 0.0 }
0x3387   :  { %5295 = vadd.xlane.f32.xlu0 %v5294_v12 }
0x339d   :  { %5317 = vrot.lane.b32.xlu0 %v7259_v14, %s8952_s5 }
0x3414   :  { %v5296_v55 = vpop.xlane.xlu0 %5295 }
0x3415   :  { %v5297_v31 = vmul.f32 0.041666668, %v5296_v55 }
0x3417   :  { %v5298_v58 = vadd.f32 1e-05, %v5297_v31 }
0x3418   :  { %v5318_v15 = vpop.permute.xlu0 %5317 }
0x3419   :  { %8881 = vrsqrt.f32 %v5298_v58 }
0x3423   :  { %v8882_v63 = vpop.eup %8881 }
0x3424   :  { %v5300_v47 = vmul.f32 %v8882_v63, %v5288_v62 }
0x3426   :  { %v5310_v60 = vmul.f32 %v5308_v56, %v5300_v47 }
0x3428   :  { %v10747_v45 = vadd.f32 %v5318_v15, %v5310_v60 }
0x3429   :  { %8907 = dma.done.wait [#allocation4], 6144 }
0x342a   :  { %8908 = vsyncadd [#allocation4], 4294961152  ;;  %v5461_v30 = vrot.slane %v10747_v45, 6  ;;  %v8281_v54 = vpack.c.bf16 %v9192_v17, %v9144_v1  ;;  %v8285_v61 = vpack.c.bf16 %v9198_v19, %v9150_v3  ;;  %v8283_v41 = vpack.c.bf16 %v9189_v16, %v9141_v0  ;;  %5530 = vmatprep.mubr.f32.mxu1 %v11475_v48  ;;  %5601 = vmatprep.mubr.f32.mxu0 %v11475_v48 }
0x342b   :  { %8909 = dma.done.wait [#allocation4 + $0x1], 32768 }
0x342c   :  { %8910 = vsyncadd [#allocation4 + $0x1], 4294934528  ;;  %v8287_v46 = vpack.c.bf16 %v9195_v18, %v9147_v2  ;;  %5462 = vrot.lane.b32.xlu0 %v5461_v30, %s8952_s5  ;;  %8282 = vmatprep.subr.bf16.mxu1 %v8281_v54  ;;  %v8289_v0 = vpack.c.bf16 %v9204_v21, %v9156_v5  ;;  %v8293_v1 = vpack.c.bf16 %v9210_v23, %v9162_v7  ;;  %v11494_v18 = vld [vmem:[#allocation33_spill] sm:$0xff]  ;;  %v11496_v21 = vld [vmem:[#allocation30_spill] sm:$0xff]  ;;  %s11562_s22 = sld [smem:[#allocation25_spill]]  ;;  %s11761_s23 = sld [smem:[#allocation26_spill]] }
0x342d   :  { %8286 = vmatprep.subr.bf16.mxu0 %v8285_v61  ;;  %8284 = vmatpush1.bf16.msra.mxu1 %v8283_v41  ;;  %v8291_v2 = vpack.c.bf16 %v9201_v20, %v9153_v4  ;;  %v8295_v3 = vpack.c.bf16 %v9207_v22, %v9159_v6  ;;  %v8297_v4 = vpack.c.bf16 %v9216_v25, %v9168_v9  ;;  %v11490_v9 = vld [vmem:[#allocation39_spill] sm:$0xff]  ;;  %v11495_v19 = vld [vmem:[#allocation37_spill] sm:$0xff]  ;;  %v11497_v22 = vld [vmem:[#allocation34_spill] sm:$0xff]  ;;  %s11764_s26 = sld [smem:[#allocation27_spill]]  ;;  %s11765_s28 = sld [smem:[#allocation28_spill]]  ;;  %vm7091_vm5 = vcmask 9216  }
0x342e   :  { %8288 = vmatpush1.bf16.msra.mxu0 %v8287_v46  ;;  %5470 = vmatprep.subr.mxu1 %v9240_v33  ;;  %v8301_v5 = vpack.c.bf16 %v9222_v27, %v9174_v11  ;;  %v8299_v6 = vpack.c.bf16 %v9213_v24, %v9165_v8  ;;  %v8303_v7 = vpack.c.bf16 %v9219_v26, %v9171_v10  ;;  %v11491_v11 = vld [vmem:[#allocation41_spill] sm:$0xff]  ;;  %v11492_v8 = vld [vmem:[#allocation31_spill] sm:$0xff]  ;;  %v11498_v24 = vld [vmem:[#allocation32_spill] sm:$0xff]  ;;  %s11766_s1 = sld [smem:[#allocation29_spill]]  ;;  %s8954_s2 = smov [#allocation5]  }
0x342f   :  { %5541 = vmatprep.subr.mxu0 %v9246_v35  ;;  %v11493_v10 = vld [vmem:[#allocation35_spill] sm:$0xff]  ;;  %v8309_v20 = vpack.c.bf16 %v11495_v19, %v11494_v18  ;;  %v8307_v23 = vpack.c.bf16 %v11497_v22, %v11496_v21  ;;  %v11499_v25 = vld [vmem:[#allocation36_spill] sm:$0xff]  ;;  %v11500_v27 = vld [vmem:[#allocation38_spill] sm:$0xff]  ;;  %s7099_s7 = sshll.u32 %s8954_s2, 4  ;;  %s7100_s7 = int_to_ptr.vmem [resolvable:$true] %s7099_s7 }
0x3430   :  { %v8305_v17 = vpack.c.bf16 %v11493_v10, %v11492_v8  ;;  %v8311_v26 = vpack.c.bf16 %v11499_v25, %v11498_v24  ;;  %v11502_v33 = vld [vmem:[#allocation43_spill] sm:$0xff]  ;;  %v11504_v35 = vld [vmem:[#allocation62_spill] sm:$0xff]  ;;  %v11513_v44 = vld [vmem:[#allocation44_spill] sm:$0xff]  ;;  %s8885_s10 = scalar_lea.vmem %s7100_s7, 32  ;;  %p8890_p1 = scmp.lt.s32.totalorder %s7100_s7, %s7100_s7 }
0x3431   :  { %5471 = vmatpush1.msra.mxu1 %v9237_v32  ;;  %v11501_v32 = vld [vmem:[#allocation40_spill] sm:$0xff]  ;;  %v11508_v59 = vld [vmem:[#allocation46_spill] sm:$0xff]  ;;  %v11509_v29 = vld [vmem:[#allocation47_spill] sm:$0xff]  ;;  %p8886_p0 = scmp.ne.s32.totalorder %s7100_s7, %s8885_s10  ;;  %p8891_p2 = scmp.lt.s32.totalorder %s8885_s10, %s8885_s10 }
0x3432   :  { %5542 = vmatpush1.msra.mxu0 %v9243_v34  ;;  %8290 = vmatprep.subr.bf16.mxu1 %v8289_v0  ;;  %v11503_v34 = vld [vmem:[#allocation45_spill] sm:$0xff]  ;;  %v8315_v42 = vpack.c.bf16 %v11509_v29, %v11508_v59  ;;  %v11510_v53 = vld [vmem:[#allocation78_spill] sm:$0xff]  ;;  %v11511_v43 = vld [vmem:[#allocation79_spill] sm:$0xff] }
0x3433   :  { %8294 = vmatprep.subr.bf16.mxu0 %v8293_v1  ;;  %v8347_v57 = vpack.c.bf16 %v11511_v43, %v11510_v53  ;;  %v11512_v52 = vld [vmem:[#allocation42_spill] sm:$0xff]  ;;  %v11514_v13 = vld [vmem:[#allocation64_spill] sm:$0xff]  ;;  %v11515_v62 = vld [vmem:[#allocation65_spill] sm:$0xff]  ;;  %p8892_p3 = por %p8891_p2, %p8890_p1 }
0x3434   :  { %v8317_v28 = vpack.c.bf16 %v11515_v62, %v11514_v13  ;;  %v11516_v50 = vld [vmem:[#allocation96_spill] sm:$0xff]  ;;  %v11517_v12 = vld [vmem:[#allocation97_spill] sm:$0xff]  ;;  %v11522_v15 = vld [vmem:[#allocation66_spill] sm:$0xff] }
0x3435   :  { %v8349_v14 = vpack.c.bf16 %v11517_v12, %v11516_v50  ;;  %v11518_v55 = vld [vmem:[#allocation48_spill] sm:$0xff]  ;;  %v11519_v31 = vld [vmem:[#allocation49_spill] sm:$0xff]  ;;  %v11523_v60 = vld [vmem:[#allocation67_spill] sm:$0xff]  ;;  %p8893_p4 = pnand %p8892_p3, %p8886_p0 }
0x3436   :  { %v8319_v58 = vpack.c.bf16 %v11519_v31, %v11518_v55  ;;  %v11520_v63 = vld [vmem:[#allocation80_spill] sm:$0xff]  ;;  %v11521_v56 = vld [vmem:[#allocation81_spill] sm:$0xff]  ;;  %v8321_v30 = vpack.c.bf16 %v11523_v60, %v11522_v15  ;;  %v11524_v54 = vld [vmem:[#allocation98_spill] sm:$0xff] }
0x3437   :  { %v8351_v47 = vpack.c.bf16 %v11521_v56, %v11520_v63  ;;  %v11525_v61 = vld [vmem:[#allocation99_spill] sm:$0xff]  ;;  %v11526_v46 = vld [vmem:[#allocation50_spill] sm:$0xff]  ;;  %v11534_v8 = vld [vmem:[#allocation52_spill] sm:$0xff] }
0x3438   :  { %v8353_v41 = vpack.c.bf16 %v11525_v61, %v11524_v54  ;;  %v11527_v0 = vld [vmem:[#allocation51_spill] sm:$0xff]  ;;  %v11535_v10 = vld [vmem:[#allocation53_spill] sm:$0xff]  ;;  %v11536_v18 = vld [vmem:[#allocation84_spill] sm:$0xff] }
0x3439   :  { %v8323_v1 = vpack.c.bf16 %v11527_v0, %v11526_v46  ;;  %v11537_v19 = vld [vmem:[#allocation85_spill] sm:$0xff]  ;;  %v11538_v21 = vld [vmem:[#allocation70_spill] sm:$0xff]  ;;  %v11539_v22 = vld [vmem:[#allocation71_spill] sm:$0xff] }
0x343a   :  { %v11540_v24 = vld [vmem:[#allocation102_spill] sm:$0xff]  ;;  %v11541_v25 = vld [vmem:[#allocation103_spill] sm:$0xff]  ;;  %v11549_v59 = vld [vmem:[#allocation105_spill] sm:$0xff] }
0x343b   :  { %v11551_v53 = vld [vmem:[#allocation57_spill] sm:$0xff]  ;;  %v11554_v13 = vld [vmem:[#allocation74_spill] sm:$0xff]  ;;  %v11555_v62 = vld [vmem:[#allocation75_spill] sm:$0xff] }
0x343c   :  { %v11556_v50 = vld [vmem:[#allocation106_spill] sm:$0xff]  ;;  %v11557_v12 = vld [vmem:[#allocation107_spill] sm:$0xff]  ;;  %v11563_v15 = vld [vmem:[#allocation76_spill] sm:$0xff] }
0x343d   :  { %v11558_v55 = vld [vmem:[#allocation58_spill] sm:$0xff]  ;;  %v11559_v31 = vld [vmem:[#allocation59_spill] sm:$0xff]  ;;  %v11564_v60 = vld [vmem:[#allocation77_spill] sm:$0xff] }
0x343e   :  { %v11560_v63 = vld [vmem:[#allocation90_spill] sm:$0xff]  ;;  %v11561_v56 = vld [vmem:[#allocation91_spill] sm:$0xff]  ;;  %v11565_v54 = vld [vmem:[#allocation108_spill] sm:$0xff] }
0x343f   :  { %v11566_v61 = vld [vmem:[#allocation109_spill] sm:$0xff]  ;;  %v11567_v46 = vld [vmem:[#allocation60_spill] sm:$0xff] }
0x3440   :  { %v11568_v0 = vld [vmem:[#allocation61_spill] sm:$0xff] }
0x349e   :  { %v5463_v16 = vpop.permute.xlu0 %5462 }
0x349f   :  { %7260 = vmatmul.mubr.msk.f32.vlgmr.msra.gmra.mrb[42].mxu1 %vm844_vm0, %v5463_v16  ;;  %7261 = vmatmul.mubr.msk.f32.vlgmr.msra.gmra.mrb[42].mxu0 %vm844_vm0, %v5463_v16 }
0x34a0   :  { %8292 = vmatpush1.bf16.msra.mxu1 %v8291_v2  ;;  %8296 = vmatpush1.bf16.msra.mxu0 %v8295_v3  ;;  %v11528_v2 = vld [vmem:[#allocation82_spill] sm:$0xff]  ;;  %v11529_v3 = vld [vmem:[#allocation83_spill] sm:$0xff] }
0x34a1   :  { %5612 = vmatprep.subr.mxu1 %v9252_v37  ;;  %5683 = vmatprep.subr.mxu0 %v9258_v39  ;;  %v11507_v39 = vld [vmem:[#allocation95_spill] sm:$0xff] }
0x34a2   :  { %5672 = vmatprep.mubr.f32.mxu1 %v11475_v48  ;;  %5743 = vmatprep.mubr.f32.mxu0 %v11475_v48 }
0x34a4   :  { %5613 = vmatpush1.msra.mxu1 %v9249_v36  ;;  %5684 = vmatpush1.msra.mxu0 %v9255_v38  ;;  %v11505_v36 = vld [vmem:[#allocation63_spill] sm:$0xff]  ;;  %v11506_v38 = vld [vmem:[#allocation94_spill] sm:$0xff] }
0x34a5   :  { %7262 = vmatmul.mubr.msk.f32.vlgmr.msra.gmra.mrb[44].mxu1 %vm844_vm0, %v5463_v16  ;;  %7263 = vmatmul.mubr.msk.f32.vlgmr.msra.gmra.mrb[44].mxu0 %vm844_vm0, %v5463_v16  ;;  %v8313_v37 = vpack.c.bf16 %v11505_v36, %v11504_v35  ;;  %v8345_v49 = vpack.c.bf16 %v11507_v39, %v11506_v38  ;;  %v11545_v35 = vld [vmem:[#allocation87_spill] sm:$0xff]  ;;  %v11547_v38 = vld [vmem:[#allocation73_spill] sm:$0xff] }
0x34a6   :  { %8298 = vmatprep.subr.bf16.mxu1 %v8297_v4  ;;  %8302 = vmatprep.subr.bf16.mxu0 %v8301_v5  ;;  %v11530_v4 = vld [vmem:[#allocation68_spill] sm:$0xff]  ;;  %v11531_v5 = vld [vmem:[#allocation69_spill] sm:$0xff] }
0x34a7   :  { %8300 = vmatpush1.bf16.msra.mxu1 %v8299_v6  ;;  %8304 = vmatpush1.bf16.msra.mxu0 %v8303_v7  ;;  %v8325_v6 = vpack.c.bf16 %v11531_v5, %v11530_v4  ;;  %v11532_v7 = vld [vmem:[#allocation100_spill] sm:$0xff]  ;;  %v11571_v4 = vld [vmem:[#allocation126_spill] sm:$0xff]  ;;  %v11572_v5 = vld [vmem:[#allocation127_spill] sm:$0xff] }
0x34a8   :  { %5754 = vmatprep.subr.mxu1 %v11490_v9  ;;  %5825 = vmatprep.subr.mxu0 %v11491_v11  ;;  %v11533_v9 = vld [vmem:[#allocation101_spill] sm:$0xff] }
0x34a9   :  { %5814 = vmatprep.mubr.f32.mxu1 %v11475_v48  ;;  %5885 = vmatprep.mubr.f32.mxu0 %v11475_v48  ;;  %v8357_v11 = vpack.c.bf16 %v11533_v9, %v11532_v7  ;;  %v11573_v7 = vld [vmem:[#allocation158_spill] sm:$0xff]  ;;  %v11574_v9 = vld [vmem:[#allocation159_spill] sm:$0xff] }
0x34ab   :  { %5755 = vmatpush1.msra.mxu1 %v11500_v27  ;;  %5826 = vmatpush1.msra.mxu0 %v11501_v32  ;;  %v11542_v27 = vld [vmem:[#allocation54_spill] sm:$0xff]  ;;  %v11543_v32 = vld [vmem:[#allocation55_spill] sm:$0xff] }
0x34ac   :  { %7264 = vmatmul.mubr.msk.f32.vlgmr.msra.gmra.mrb[46].mxu1 %vm844_vm0, %v5463_v16  ;;  %7265 = vmatmul.mubr.msk.f32.vlgmr.msra.gmra.mrb[46].mxu0 %vm844_vm0, %v5463_v16 }
0x34ad   :  { %8306 = vmatprep.subr.bf16.mxu1 %v8305_v17  ;;  %8310 = vmatprep.subr.bf16.mxu0 %v8309_v20  ;;  %v8327_v17 = vpack.c.bf16 %v11535_v10, %v11534_v8  ;;  %v8359_v20 = vpack.c.bf16 %v11537_v19, %v11536_v18  ;;  %v5382_v8 = vsub.s32 0, %v10725_v51  ;;  %v5390_v10 = vsub.s32 2, %v10725_v51 }
0x34ae   :  { %8308 = vmatpush1.bf16.msra.mxu1 %v8307_v23  ;;  %8312 = vmatpush1.bf16.msra.mxu0 %v8311_v26  ;;  %v8329_v23 = vpack.c.bf16 %v11539_v22, %v11538_v21  ;;  %v8361_v26 = vpack.c.bf16 %v11541_v25, %v11540_v24  ;;  %v5386_v18 = vsub.s32 1, %v10725_v51  ;;  %v5394_v19 = vsub.s32 3, %v10725_v51 }
0x34af   :  { %5896 = vmatprep.subr.mxu1 %v11502_v33  ;;  %5967 = vmatprep.subr.mxu0 %v11503_v34  ;;  %v8331_v33 = vpack.c.bf16 %v11543_v32, %v11542_v27  ;;  %v11544_v34 = vld [vmem:[#allocation86_spill] sm:$0xff]  ;;  %v5402_v24 = vsub.s32 5, %v10725_v51  ;;  %v5410_v25 = vsub.s32 7, %v10725_v51 }
0x34b0   :  { %5956 = vmatprep.mubr.f32.mxu1 %v11475_v48  ;;  %6027 = vmatprep.mubr.f32.mxu0 %v11475_v48  ;;  %v8363_v36 = vpack.c.bf16 %v11545_v35, %v11544_v34 }
0x34b2   :  { %5897 = vmatpush1.msra.mxu1 %v11512_v52  ;;  %5968 = vmatpush1.msra.mxu0 %v11513_v44  ;;  %v11553_v52 = vld [vmem:[#allocation89_spill] sm:$0xff] }
0x34b3   :  { %7266 = vmatmul.mubr.msk.f32.vlgmr.msra.gmra.mrb[48].mxu1 %vm844_vm0, %v5463_v16  ;;  %7267 = vmatmul.mubr.msk.f32.vlgmr.msra.gmra.mrb[48].mxu0 %vm844_vm0, %v5463_v16  ;;  %v8355_v16 = vpack.c.bf16 %v11529_v3, %v11528_v2  ;;  %v11569_v2 = vld [vmem:[#allocation92_spill] sm:$0xff]  ;;  %v11570_v3 = vld [vmem:[#allocation93_spill] sm:$0xff] }
0x34b4   :  { %8314 = vmatprep.subr.bf16.mxu1 %v8313_v37  ;;  %8346 = vmatprep.subr.bf16.mxu0 %v8345_v49  ;;  %v11546_v37 = vld [vmem:[#allocation72_spill] sm:$0xff] }
0x34b5   :  { %8316 = vmatpush3.bf16.msra.mxu1 %v8315_v42  ;;  %8348 = vmatpush3.bf16.msra.mxu0 %v8347_v57  ;;  %v8333_v39 = vpack.c.bf16 %v11547_v38, %v11546_v37  ;;  %v11548_v49 = vld [vmem:[#allocation104_spill] sm:$0xff] }
0x34b6   :  { %8318 = vmatprep.subr.bf16.mxu1 %v8317_v28  ;;  %8350 = vmatprep.subr.bf16.mxu0 %v8349_v14  ;;  %v8365_v29 = vpack.c.bf16 %v11549_v59, %v11548_v49  ;;  %v11550_v42 = vld [vmem:[#allocation56_spill] sm:$0xff]  ;;  %v8337_v28 = vpack.c.bf16 %v11555_v62, %v11554_v13  ;;  %v8369_v14 = vpack.c.bf16 %v11557_v12, %v11556_v50 }
0x34b7   :  { %v8335_v43 = vpack.c.bf16 %v11551_v53, %v11550_v42  ;;  %v11552_v57 = vld [vmem:[#allocation88_spill] sm:$0xff]  ;;  %v11576_v42 = vld [vmem:[#allocation111_spill] sm:$0xff] }
0x34b8   :  { %v8367_v44 = vpack.c.bf16 %v11553_v52, %v11552_v57  ;;  %v11578_v57 = vld [vmem:[#allocation143_spill] sm:$0xff]  ;;  %v11579_v62 = vld [vmem:[#allocation128_spill] sm:$0xff] }
0x34b9   :  { %8320 = vmatpush3.bf16.msra.mxu1 %v8319_v58  ;;  %8352 = vmatpush3.bf16.msra.mxu0 %v8351_v47  ;;  %v8339_v58 = vpack.c.bf16 %v11559_v31, %v11558_v55  ;;  %v8371_v47 = vpack.c.bf16 %v11561_v56, %v11560_v63  ;;  %v11581_v12 = vld [vmem:[#allocation160_spill] sm:$0xff]  ;;  %v10919_v63 = vld [vmem:[%s11562_s22 + $0x8] sm:$0xff] }
0x34ba   :  { %8322 = vmatprep.subr.bf16.mxu1 %v8321_v30  ;;  %8354 = vmatprep.subr.bf16.mxu0 %v8353_v41  ;;  %v8341_v30 = vpack.c.bf16 %v11564_v60, %v11563_v15  ;;  %v8373_v41 = vpack.c.bf16 %v11566_v61, %v11565_v54  ;;  %v11584_v54 = vld [vmem:[#allocation113_spill] sm:$0xff] }
0x34bd   :  { %8324 = vmatpush3.bf16.msra.mxu1 %v8323_v1  ;;  %8356 = vmatpush3.bf16.msra.mxu0 %v8355_v16  ;;  %v8343_v1 = vpack.c.bf16 %v11568_v0, %v11567_v46  ;;  %v8375_v16 = vpack.c.bf16 %v11570_v3, %v11569_v2  ;;  %v5423_v46 = vrot.slane %v10919_v63, %v5390_v10  ;;  %v11585_v0 = vld [vmem:[#allocation144_spill] sm:$0xff] }
0x34be   :  { %8326 = vmatprep.subr.bf16.mxu1 %v8325_v6  ;;  %8358 = vmatprep.subr.bf16.mxu0 %v8357_v11  ;;  %v8377_v6 = vpack.c.bf16 %v11572_v5, %v11571_v4  ;;  %v8409_v11 = vpack.c.bf16 %v11574_v9, %v11573_v7  ;;  %v11587_v4 = vld [vmem:[#allocation130_spill] sm:$0xff]  ;;  %v11588_v5 = vld [vmem:[#allocation131_spill] sm:$0xff] }
0x34bf   :  { %v11589_v7 = vld [vmem:[#allocation162_spill] sm:$0xff]  ;;  %v11590_v9 = vld [vmem:[#allocation163_spill] sm:$0xff] }
0x34c1   :  { %8328 = vmatpush3.bf16.msra.mxu1 %v8327_v17  ;;  %8360 = vmatpush3.bf16.msra.mxu0 %v8359_v20  ;;  %v10886_v17 = vld [vmem:[%s11562_s22] sm:$0xff] }
0x34c2   :  { %8330 = vmatprep.subr.bf16.mxu1 %v8329_v23  ;;  %8362 = vmatprep.subr.bf16.mxu0 %v8361_v26  ;;  %v5383_v20 = vrot.slane %v10886_v17, %v5382_v8  ;;  %v5391_v21 = vrot.slane %v10886_v17, %v5390_v10  ;;  %v5387_v22 = vrot.slane %v10886_v17, %v5386_v18  ;;  %v11593_v10 = vld [vmem:[#allocation146_spill] sm:$0xff] }
0x34c3   :  { %v5395_v23 = vrot.slane %v10886_v17, %v5394_v19  ;;  %v5403_v38 = vrot.slane %v10886_v17, %v5402_v24 }
0x34c5   :  { %8332 = vmatpush3.bf16.msra.mxu1 %v8331_v33  ;;  %8364 = vmatpush3.bf16.msra.mxu0 %v8363_v36 }
0x34c6   :  { %8334 = vmatprep.subr.bf16.mxu1 %v8333_v39  ;;  %8366 = vmatprep.subr.bf16.mxu0 %v8365_v29  ;;  %v5411_v39 = vrot.slane %v10886_v17, %v5410_v25  ;;  %v11575_v29 = vld [vmem:[#allocation110_spill] sm:$0xff] }
0x34c7   :  { %v8379_v53 = vpack.c.bf16 %v11576_v42, %v11575_v29  ;;  %v5406_v42 = vsub.s32 6, %v10725_v51 }
0x34c9   :  { %8336 = vmatpush3.bf16.msra.mxu1 %v8335_v43  ;;  %8368 = vmatpush3.bf16.msra.mxu0 %v8367_v44  ;;  %v11577_v43 = vld [vmem:[#allocation142_spill] sm:$0xff] }
0x34ca   :  { %8338 = vmatprep.subr.bf16.mxu1 %v8337_v28  ;;  %8370 = vmatprep.subr.bf16.mxu0 %v8369_v14  ;;  %v8411_v52 = vpack.c.bf16 %v11578_v57, %v11577_v43  ;;  %v11580_v28 = vld [vmem:[#allocation129_spill] sm:$0xff]  ;;  %v11599_v43 = vld [vmem:[#allocation116_spill] sm:$0xff] }
0x34cb   :  { %v8381_v50 = vpack.c.bf16 %v11580_v28, %v11579_v62  ;;  %v11582_v14 = vld [vmem:[#allocation161_spill] sm:$0xff] }
0x34cc   :  { %v8413_v55 = vpack.c.bf16 %v11582_v14, %v11581_v12  ;;  %v11600_v57 = vld [vmem:[#allocation117_spill] sm:$0xff]  ;;  %v11604_v12 = vld [vmem:[#allocation135_spill] sm:$0xff] }
0x34cd   :  { %8340 = vmatpush3.bf16.msra.mxu1 %v8339_v58  ;;  %8372 = vmatpush3.bf16.msra.mxu0 %v8371_v47  ;;  %v11602_v62 = vld [vmem:[#allocation149_spill] sm:$0xff] }
0x34ce   :  { %8342 = vmatprep.subr.bf16.mxu1 %v8341_v30  ;;  %8374 = vmatprep.subr.bf16.mxu0 %v8373_v41  ;;  %v11583_v30 = vld [vmem:[#allocation112_spill] sm:$0xff]  ;;  %v5415_v41 = vrot.slane %v10919_v63, %v5382_v8 }
0x34cf   :  { %v8383_v61 = vpack.c.bf16 %v11584_v54, %v11583_v30  ;;  %v11607_v30 = vld [vmem:[#allocation118_spill] sm:$0xff]  ;;  %v11608_v54 = vld [vmem:[#allocation119_spill] sm:$0xff] }
0x34d1   :  { %8344 = vmatpush3.bf16.msra.mxu1 %v8343_v1  ;;  %8376 = vmatpush3.bf16.msra.mxu0 %v8375_v16  ;;  %v11586_v1 = vld [vmem:[#allocation145_spill] sm:$0xff] }
0x34d2   :  { %8378 = vmatprep.subr.bf16.mxu1 %v8377_v6  ;;  %8410 = vmatprep.subr.bf16.mxu0 %v8409_v11  ;;  %v8415_v2 = vpack.c.bf16 %v11586_v1, %v11585_v0  ;;  %v8385_v6 = vpack.c.bf16 %v11588_v5, %v11587_v4  ;;  %v8417_v11 = vpack.c.bf16 %v11590_v9, %v11589_v7  ;;  %v11611_v4 = vld [vmem:[#allocation136_spill] sm:$0xff]  ;;  %v11612_v5 = vld [vmem:[#allocation137_spill] sm:$0xff] }
0x34d3   :  { %v11613_v7 = vld [vmem:[#allocation168_spill] sm:$0xff]  ;;  %v11614_v9 = vld [vmem:[#allocation169_spill] sm:$0xff] }
0x3572   :  { %v5532_v26 = vpop.f32.mrb[42].mxu1  ;;  %v5603_v27 = vpop.f32.mrb[42].mxu0 }
0x3573   :  { %v5533_v32 = vadd.f32 %v5532_v26, %v5383_v20  ;;  %v5604_v33 = vadd.f32 %v5603_v27, %v5391_v21  ;;  %v5534_v34 = vpop.f32.mrb[43].mxu1  ;;  %v5605_v35 = vpop.f32.mrb[43].mxu0  ;;  %v11591_v20 = vld [vmem:[#allocation114_spill] sm:$0xff]  ;;  %v11592_v21 = vld [vmem:[#allocation115_spill] sm:$0xff] }
0x3574   :  { %v5535_v36 = vadd.f32 %v5534_v34, %v5387_v22  ;;  %v5606_v37 = vadd.f32 %v5605_v35, %v5395_v23  ;;  %v8387_v22 = vpack.c.bf16 %v11592_v21, %v11591_v20  ;;  %v11594_v26 = vld [vmem:[#allocation147_spill] sm:$0xff]  ;;  %v5398_v35 = vsub.s32 4, %v10725_v51  ;;  %v11615_v20 = vld [vmem:[#allocation120_spill] sm:$0xff]  ;;  %v11616_v21 = vld [vmem:[#allocation121_spill] sm:$0xff] }
0x3575   :  { %v6034_v44 = vmax.f32 %v5533_v32, 0.0  ;;  %v6036_v13 = vmax.f32 %v5604_v33, 0.0  ;;  %v8419_v27 = vpack.c.bf16 %v11594_v26, %v11593_v10  ;;  %v11595_v32 = vld [vmem:[#allocation132_spill] sm:$0xff]  ;;  %v11596_v33 = vld [vmem:[#allocation133_spill] sm:$0xff]  ;;  %v11619_v26 = vld [vmem:[#allocation138_spill] sm:$0xff] }
0x3576   :  { %v6035_v49 = vmax.f32 %v5535_v36, 0.0  ;;  %v6037_v59 = vmax.f32 %v5606_v37, 0.0  ;;  %v8389_v34 = vpack.c.bf16 %v11596_v33, %v11595_v32  ;;  %v11621_v33 = vld [vmem:[#allocation170_spill] sm:$0xff] }
0x3578   :  { %v10914_v31 = vpop.f32.mrb[44].mxu1  ;;  %v10916_v58 = vpop.f32.mrb[44].mxu0  ;;  %6377 = vmatprep.mubr.f32.mxu1 %v6035_v49  ;;  %6447 = vmatprep.mubr.f32.mxu0 %v6037_v59  ;;  %v11597_v49 = vld [vmem:[#allocation164_spill] sm:$0xff]  ;;  %v11598_v59 = vld [vmem:[#allocation165_spill] sm:$0xff] }
0x3579   :  { %v5676_v56 = vpop.f32.mrb[45].mxu1  ;;  %v5747_v47 = vpop.f32.mrb[45].mxu0  ;;  %6378 = vmatmul.mubr.f32.vlgmr.msra.gmra.mrb[50].mxu1 %v6034_v44  ;;  %6448 = vmatmul.mubr.f32.vlgmr.msra.gmra.mrb[50].mxu0 %v6036_v13  ;;  %v8421_v29 = vpack.c.bf16 %v11598_v59, %v11597_v49  ;;  %v5439_v44 = vrot.slane %v10919_v63, %v5406_v42  ;;  %v11601_v13 = vld [vmem:[#allocation148_spill] sm:$0xff]  ;;  %v11623_v59 = vld [vmem:[#allocation122_spill] sm:$0xff] }
0x357a   :  { %v5677_v15 = vadd.f32 %v5676_v56, %v5403_v38  ;;  %v5748_v60 = vadd.f32 %v5747_v47, %v5411_v39  ;;  %8380 = vmatpush3.bf16.msra.mxu1 %v8379_v53  ;;  %8412 = vmatpush3.bf16.msra.mxu0 %v8411_v52  ;;  %v5431_v53 = vrot.slane %v10919_v63, %v5398_v35  ;;  %v11606_v56 = vld [vmem:[#allocation167_spill] sm:$0xff] }
0x357b   :  { %8382 = vmatprep.subr.bf16.mxu1 %v8381_v50  ;;  %8414 = vmatprep.subr.bf16.mxu0 %v8413_v55  ;;  %v8391_v52 = vpack.c.bf16 %v11600_v57, %v11599_v43  ;;  %v8423_v28 = vpack.c.bf16 %v11602_v62, %v11601_v13  ;;  %v11603_v50 = vld [vmem:[#allocation134_spill] sm:$0xff]  ;;  %v5399_v43 = vrot.slane %v10886_v17, %v5398_v35  ;;  %v11627_v13 = vld [vmem:[#allocation140_spill] sm:$0xff]  ;;  %v11628_v62 = vld [vmem:[#allocation141_spill] sm:$0xff] }
0x357c   :  { %v6039_v3 = vmax.f32 %v5677_v15, 0.0  ;;  %v6041_v16 = vmax.f32 %v5748_v60, 0.0  ;;  %v8393_v14 = vpack.c.bf16 %v11604_v12, %v11603_v50  ;;  %v11605_v55 = vld [vmem:[#allocation166_spill] sm:$0xff]  ;;  %v5407_v50 = vrot.slane %v10886_v17, %v5406_v42  ;;  %v11629_v12 = vld [vmem:[#allocation172_spill] sm:$0xff]  ;;  %v11634_v42 = vld [vmem:[#allocation157_spill] sm:$0xff] }
0x357d   :  { %v8425_v47 = vpack.c.bf16 %v11606_v56, %v11605_v55  ;;  %v11625_v57 = vld [vmem:[#allocation154_spill] sm:$0xff]  ;;  %v5419_v56 = vrot.slane %v10919_v63, %v5386_v18  ;;  %v5427_v35 = vrot.slane %v10919_v63, %v5394_v19  ;;  %v11633_v17 = vld [vmem:[#allocation156_spill] sm:$0xff] }
0x357e   :  { %8384 = vmatpush3.bf16.msra.mxu1 %v8383_v61  ;;  %6517 = vmatprep.mubr.f32.mxu1 %v6039_v3  ;;  %v8395_v61 = vpack.c.bf16 %v11608_v54, %v11607_v30  ;;  %v5675_v30 = vadd.f32 %v10914_v31, %v5399_v43  ;;  %v8439_v54 = vpack.c.bf16 %v11634_v42, %v11633_v17  ;;  %v11651_v43 = vld [vmem:[#allocation194_spill] sm:$0xff]  ;;  %v11663_v42 = vld [vmem:[#allocation180_spill] sm:$0xff] }
0x357f   :  { %v5816_v23 = vpop.f32.mrb[46].mxu1  ;;  %v5887_v8 = vpop.f32.mrb[46].mxu0  ;;  %8416 = vmatpush3.bf16.msra.mxu0 %v8415_v2  ;;  %6587 = vmatprep.mubr.f32.mxu0 %v6041_v16  ;;  %v5746_v18 = vadd.f32 %v10916_v58, %v5407_v50  ;;  %v11644_v58 = vld [vmem:[#allocation193_spill] sm:$0xff]  ;;  %v11656_v50 = vld [vmem:[#allocation179_spill] sm:$0xff] }
0x3580   :  { %v10938_v36 = vadd.f32 %v5816_v23, %v5415_v41  ;;  %v10940_v37 = vadd.f32 %v5887_v8, %v5423_v46  ;;  %v5818_v38 = vpop.f32.mrb[47].mxu1  ;;  %v5889_v39 = vpop.f32.mrb[47].mxu0  ;;  %8386 = vmatprep.subr.bf16.mxu1 %v8385_v6  ;;  %8418 = vmatprep.subr.bf16.mxu0 %v8417_v11  ;;  %v11609_v41 = vld [vmem:[#allocation150_spill] sm:$0xff]  ;;  %v11610_v46 = vld [vmem:[#allocation151_spill] sm:$0xff]  ;;  %v8397_v6 = vpack.c.bf16 %v11612_v5, %v11611_v4  ;;  %v11617_v23 = vld [vmem:[#allocation152_spill] sm:$0xff] }
0x3581   :  { %v8427_v0 = vpack.c.bf16 %v11610_v46, %v11609_v41  ;;  %v8429_v11 = vpack.c.bf16 %v11614_v9, %v11613_v7  ;;  %v11618_v8 = vld [vmem:[#allocation153_spill] sm:$0xff]  ;;  %v11636_v41 = vld [vmem:[#allocation191_spill] sm:$0xff]  ;;  %v5819_v5 = vadd.f32 %v5818_v38, %v5419_v56  ;;  %v11639_v7 = vld [vmem:[#allocation174_spill] sm:$0xff] }
0x3582   :  { %8388 = vmatpush3.bf16.msra.mxu1 %v8387_v22  ;;  %v8399_v22 = vpack.c.bf16 %v11616_v21, %v11615_v20  ;;  %v8431_v10 = vpack.c.bf16 %v11618_v8, %v11617_v23  ;;  %v11638_v4 = vld [vmem:[#allocation223_spill] sm:$0xff]  ;;  %v11641_v20 = vld [vmem:[#allocation206_spill] sm:$0xff]  ;;  %v6040_v23 = vmax.f32 %v5746_v18, 0.0  ;;  %v11643_v8 = vld [vmem:[#allocation192_spill] sm:$0xff] }
0x3583   :  { %8420 = vmatpush3.bf16.msra.mxu0 %v8419_v27  ;;  %8390 = vmatprep.subr.bf16.mxu1 %v8389_v34  ;;  %v11620_v27 = vld [vmem:[#allocation139_spill] sm:$0xff]  ;;  %v11646_v38 = vld [vmem:[#allocation225_spill] sm:$0xff] }
0x3584   :  { %8422 = vmatprep.subr.bf16.mxu0 %v8421_v29  ;;  %v8401_v32 = vpack.c.bf16 %v11620_v27, %v11619_v26  ;;  %v11622_v34 = vld [vmem:[#allocation171_spill] sm:$0xff]  ;;  %v6043_v26 = vmax.f32 %v5819_v5, 0.0  ;;  %v11645_v27 = vld [vmem:[#allocation224_spill] sm:$0xff]  ;;  %v11669_v5 = vld [vmem:[#allocation230_spill] sm:$0xff] }
0x3585   :  { %v8433_v49 = vpack.c.bf16 %v11622_v34, %v11621_v33  ;;  %v11624_v29 = vld [vmem:[#allocation123_spill] sm:$0xff]  ;;  %v11647_v33 = vld [vmem:[#allocation176_spill] sm:$0xff]  ;;  %v11648_v34 = vld [vmem:[#allocation177_spill] sm:$0xff] }
0x3586   :  { %v5958_v15 = vpop.f32.mrb[48].mxu1  ;;  %v6029_v60 = vpop.f32.mrb[48].mxu0  ;;  %8392 = vmatpush3.bf16.msra.mxu1 %v8391_v52  ;;  %v11626_v52 = vld [vmem:[#allocation155_spill] sm:$0xff] }
0x3587   :  { %v10959_v1 = vadd.f32 %v5958_v15, %v5431_v53  ;;  %v10961_v2 = vadd.f32 %v6029_v60, %v5439_v44  ;;  %v10963_v3 = vpop.f32.mrb[49].mxu1  ;;  %v10965_v16 = vpop.f32.mrb[49].mxu0  ;;  %8424 = vmatpush3.bf16.msra.mxu0 %v8423_v28  ;;  %8394 = vmatprep.subr.bf16.mxu1 %v8393_v14  ;;  %v8403_v53 = vpack.c.bf16 %v11624_v29, %v11623_v59  ;;  %v11630_v14 = vld [vmem:[#allocation173_spill] sm:$0xff]  ;;  %v11640_v9 = vld [vmem:[#allocation175_spill] sm:$0xff]  ;;  %v11649_v59 = vld [vmem:[#allocation208_spill] sm:$0xff] }
0x3588   :  { %8426 = vmatprep.subr.bf16.mxu0 %v8425_v47  ;;  %v8435_v44 = vpack.c.bf16 %v11626_v52, %v11625_v57  ;;  %v8405_v28 = vpack.c.bf16 %v11628_v62, %v11627_v13  ;;  %v8437_v55 = vpack.c.bf16 %v11630_v14, %v11629_v12  ;;  %v11631_v47 = vld [vmem:[#allocation124_spill] sm:$0xff]  ;;  %v11632_v15 = vld [vmem:[#allocation125_spill] sm:$0xff]  ;;  %v8443_v31 = vpack.c.bf16 %v11640_v9, %v11639_v7  ;;  %v11642_v21 = vld [vmem:[#allocation207_spill] sm:$0xff] }
0x3589   :  { %v8407_v60 = vpack.c.bf16 %v11632_v15, %v11631_v47  ;;  %v11650_v29 = vld [vmem:[#allocation209_spill] sm:$0xff]  ;;  %v11652_v57 = vld [vmem:[#allocation195_spill] sm:$0xff]  ;;  %v11657_v14 = vld [vmem:[#allocation210_spill] sm:$0xff] }
0x358a   :  { %8396 = vmatpush3.bf16.msra.mxu1 %v8395_v61  ;;  %v11635_v61 = vld [vmem:[#allocation190_spill] sm:$0xff]  ;;  %v8449_v52 = vpack.c.bf16 %v11652_v57, %v11651_v43  ;;  %v11654_v13 = vld [vmem:[#allocation227_spill] sm:$0xff]  ;;  %v11660_v47 = vld [vmem:[#allocation197_spill] sm:$0xff] }
0x358b   :  { %8428 = vmatpush3.bf16.msra.mxu0 %v8427_v0  ;;  %8398 = vmatprep.subr.bf16.mxu1 %v8397_v6  ;;  %v8441_v46 = vpack.c.bf16 %v11636_v41, %v11635_v61  ;;  %v11637_v0 = vld [vmem:[#allocation222_spill] sm:$0xff]  ;;  %v5890_v6 = vadd.f32 %v5889_v39, %v5427_v35  ;;  %v8477_v39 = vpack.c.bf16 %v11646_v38, %v11645_v27  ;;  %v11659_v35 = vld [vmem:[#allocation196_spill] sm:$0xff]  ;;  %v11686_v57 = vld [vmem:[#allocation235_spill] sm:$0xff] }
0x358c   :  { %8430 = vmatprep.subr.bf16.mxu0 %v8429_v11  ;;  %v8473_v19 = vpack.c.bf16 %v11638_v4, %v11637_v0  ;;  %v6038_v11 = vmax.f32 %v5675_v30, 0.0  ;;  %v8453_v15 = vpack.c.bf16 %v11660_v47, %v11659_v35  ;;  %v11662_v30 = vld [vmem:[#allocation229_spill] sm:$0xff]  ;;  %v11665_v41 = vld [vmem:[#allocation212_spill] sm:$0xff]  ;;  %v11667_v0 = vld [vmem:[#allocation198_spill] sm:$0xff] }
0x358d   :  { %v11668_v4 = vld [vmem:[#allocation199_spill] sm:$0xff]  ;;  %v11671_v9 = vld [vmem:[#allocation182_spill] sm:$0xff]  ;;  %v11679_v38 = vld [vmem:[#allocation184_spill] sm:$0xff] }
0x358e   :  { %8400 = vmatpush3.bf16.msra.mxu1 %v8399_v22  ;;  %v8475_v22 = vpack.c.bf16 %v11642_v21, %v11641_v20  ;;  %v11673_v20 = vld [vmem:[#allocation214_spill] sm:$0xff]  ;;  %v11674_v21 = vld [vmem:[#allocation215_spill] sm:$0xff]  ;;  %v11693_v35 = vld [vmem:[#allocation236_spill] sm:$0xff] }
0x358f   :  { %8432 = vmatpush3.bf16.msra.mxu0 %v8431_v10  ;;  %8402 = vmatprep.subr.bf16.mxu1 %v8401_v32  ;;  %v8445_v10 = vpack.c.bf16 %v11644_v58, %v11643_v8  ;;  %v6045_v32 = vmax.f32 %v5890_v6, 0.0  ;;  %v11670_v6 = vld [vmem:[#allocation231_spill] sm:$0xff]  ;;  %v11676_v8 = vld [vmem:[#allocation201_spill] sm:$0xff]  ;;  %v11685_v43 = vld [vmem:[#allocation234_spill] sm:$0xff] }
0x3590   :  { %8434 = vmatprep.subr.bf16.mxu0 %v8433_v49  ;;  %v8447_v49 = vpack.c.bf16 %v11648_v34, %v11647_v33  ;;  %v8489_v7 = vpack.c.bf16 %v11670_v6, %v11669_v5  ;;  %v11681_v33 = vld [vmem:[#allocation216_spill] sm:$0xff]  ;;  %v11682_v34 = vld [vmem:[#allocation217_spill] sm:$0xff]  ;;  %v11702_v5 = vld [vmem:[#allocation287_spill] sm:$0xff] }
0x3591   :  { %v11694_v47 = vld [vmem:[#allocation237_spill] sm:$0xff]  ;;  %v11704_v6 = vld [vmem:[#allocation239_spill] sm:$0xff] }
0x3592   :  { %8404 = vmatpush3.bf16.msra.mxu1 %v8403_v53  ;;  %v8479_v53 = vpack.c.bf16 %v11650_v29, %v11649_v59  ;;  %v11683_v59 = vld [vmem:[#allocation202_spill] sm:$0xff]  ;;  %v11684_v29 = vld [vmem:[#allocation203_spill] sm:$0xff] }
0x3593   :  { %8436 = vmatpush3.bf16.msra.mxu0 %v8435_v44  ;;  %8406 = vmatprep.subr.bf16.mxu1 %v8405_v28  ;;  %v11653_v44 = vld [vmem:[#allocation226_spill] sm:$0xff] }
0x3594   :  { %8438 = vmatprep.subr.bf16.mxu0 %v8437_v55  ;;  %v8481_v62 = vpack.c.bf16 %v11654_v13, %v11653_v44  ;;  %v11655_v28 = vld [vmem:[#allocation178_spill] sm:$0xff]  ;;  %v11658_v55 = vld [vmem:[#allocation211_spill] sm:$0xff] }
0x3595   :  { %v8451_v12 = vpack.c.bf16 %v11656_v50, %v11655_v28  ;;  %v8483_v56 = vpack.c.bf16 %v11658_v55, %v11657_v14  ;;  %v11687_v44 = vld [vmem:[#allocation186_spill] sm:$0xff]  ;;  %v11688_v13 = vld [vmem:[#allocation187_spill] sm:$0xff]  ;;  %v11691_v14 = vld [vmem:[#allocation204_spill] sm:$0xff] }
0x3596   :  { %8408 = vmatpush3.bf16.msra.mxu1 %v8407_v60  ;;  %v11661_v60 = vld [vmem:[#allocation228_spill] sm:$0xff]  ;;  %v11689_v28 = vld [vmem:[#allocation218_spill] sm:$0xff]  ;;  %v11690_v50 = vld [vmem:[#allocation219_spill] sm:$0xff] }
0x3597   :  { %8440 = vmatpush3.bf16.msra.mxu0 %v8439_v54  ;;  %8442 = vmatprep.subr.bf16.mxu1 %v8441_v46  ;;  %v8485_v17 = vpack.c.bf16 %v11662_v30, %v11661_v60  ;;  %v11664_v54 = vld [vmem:[#allocation181_spill] sm:$0xff]  ;;  %v5435_v60 = vrot.slane %v10919_v63, %v5402_v24  ;;  %v5443_v30 = vrot.slane %v10919_v63, %v5410_v25  ;;  %v11703_v63 = vld [vmem:[#allocation238_spill] sm:$0xff] }
0x3598   :  { %8474 = vmatprep.subr.bf16.mxu0 %v8473_v19  ;;  %v8455_v61 = vpack.c.bf16 %v11664_v54, %v11663_v42  ;;  %v11666_v46 = vld [vmem:[#allocation213_spill] sm:$0xff]  ;;  %v8457_v19 = vpack.c.bf16 %v11668_v4, %v11667_v0  ;;  %v11700_v0 = vld [vmem:[#allocation255_spill] sm:$0xff] }
0x3599   :  { %6518 = vmatmul.mubr.f32.vlgmr.msra.gmra.mrb[52].mxu1 %v6038_v11  ;;  %v8487_v18 = vpack.c.bf16 %v11666_v46, %v11665_v41  ;;  %v11692_v55 = vld [vmem:[#allocation205_spill] sm:$0xff]  ;;  %v5961_v51 = vadd.f32 %v10963_v3, %v5435_v60  ;;  %v6032_v25 = vadd.f32 %v10965_v16, %v5443_v30  ;;  %v11709_v16 = vld [vmem:[#allocation288_spill] sm:$0xff] }
0x359a   :  { %6588 = vmatmul.mubr.f32.vlgmr.msra.gmra.mrb[52].mxu0 %v6040_v23  ;;  %8444 = vmatpush3.bf16.msra.mxu1 %v8443_v31  ;;  %v11672_v31 = vld [vmem:[#allocation183_spill] sm:$0xff]  ;;  %v11675_v23 = vld [vmem:[#allocation200_spill] sm:$0xff]  ;;  %v11696_v42 = vld [vmem:[#allocation189_spill] sm:$0xff] }
0x359b   :  { %6657 = vmatprep.mubr.f32.mxu1 %v6043_v26  ;;  %8476 = vmatpush3.bf16.msra.mxu0 %v8475_v22  ;;  %v8459_v11 = vpack.c.bf16 %v11672_v31, %v11671_v9  ;;  %v8491_v22 = vpack.c.bf16 %v11674_v21, %v11673_v20  ;;  %v8461_v58 = vpack.c.bf16 %v11676_v8, %v11675_v23  ;;  %v11678_v26 = vld [vmem:[#allocation233_spill] sm:$0xff]  ;;  %v6042_v9 = vmax.f32 %v10938_v36, 0.0  ;;  %v11705_v31 = vld [vmem:[#allocation270_spill] sm:$0xff]  ;;  %v11711_v36 = vld [vmem:[#allocation240_spill] sm:$0xff] }
0x359c   :  { %6727 = vmatprep.mubr.f32.mxu0 %v6045_v32  ;;  %8446 = vmatprep.subr.bf16.mxu1 %v8445_v10  ;;  %v11677_v10 = vld [vmem:[#allocation232_spill] sm:$0xff]  ;;  %v11698_v41 = vld [vmem:[#allocation221_spill] sm:$0xff]  ;;  %v6044_v21 = vmax.f32 %v10940_v37, 0.0  ;;  %v6047_v3 = vmax.f32 %v5961_v51, 0.0 }
0x359d   :  { %8478 = vmatprep.subr.bf16.mxu0 %v8477_v39  ;;  %v8493_v27 = vpack.c.bf16 %v11678_v26, %v11677_v10  ;;  %v11680_v39 = vld [vmem:[#allocation185_spill] sm:$0xff]  ;;  %v6049_v26 = vmax.f32 %v6032_v25, 0.0  ;;  %v11729_v60 = vld [vmem:[#allocation276_spill] sm:$0xff] }
0x359e   :  { %8448 = vmatpush3.bf16.msra.mxu1 %v8447_v49  ;;  %v8463_v32 = vpack.c.bf16 %v11680_v39, %v11679_v38  ;;  %v8495_v49 = vpack.c.bf16 %v11682_v34, %v11681_v33  ;;  %v11708_v23 = vld [vmem:[#allocation257_spill] sm:$0xff]  ;;  %v11713_v39 = vld [vmem:[#allocation272_spill] sm:$0xff]  ;;  %v11715_v33 = vld [vmem:[#allocation258_spill] sm:$0xff] }
0x359f   :  { %8480 = vmatpush3.bf16.msra.mxu0 %v8479_v53  ;;  %8450 = vmatprep.subr.bf16.mxu1 %v8449_v52  ;;  %v8465_v53 = vpack.c.bf16 %v11684_v29, %v11683_v59  ;;  %v8497_v52 = vpack.c.bf16 %v11686_v57, %v11685_v43  ;;  %v11716_v34 = vld [vmem:[#allocation259_spill] sm:$0xff]  ;;  %v11717_v59 = vld [vmem:[#allocation290_spill] sm:$0xff]  ;;  %v11730_v30 = vld [vmem:[#allocation277_spill] sm:$0xff] }
0x35a0   :  { %8482 = vmatprep.subr.bf16.mxu0 %v8481_v62  ;;  %v8467_v62 = vpack.c.bf16 %v11688_v13, %v11687_v44  ;;  %v11718_v29 = vld [vmem:[#allocation291_spill] sm:$0xff]  ;;  %v11719_v43 = vld [vmem:[#allocation242_spill] sm:$0xff]  ;;  %v11739_v25 = vld [vmem:[#allocation264_spill] sm:$0xff] }
0x35a1   :  { %v11720_v57 = vld [vmem:[#allocation243_spill] sm:$0xff]  ;;  %v11721_v44 = vld [vmem:[#allocation274_spill] sm:$0xff] }
0x35a2   :  { %8452 = vmatpush3.bf16.msra.mxu1 %v8451_v12  ;;  %v8499_v12 = vpack.c.bf16 %v11690_v50, %v11689_v28  ;;  %v11722_v13 = vld [vmem:[#allocation275_spill] sm:$0xff]  ;;  %v11723_v28 = vld [vmem:[#allocation260_spill] sm:$0xff]  ;;  %v11724_v50 = vld [vmem:[#allocation261_spill] sm:$0xff] }
0x35a3   :  { %8484 = vmatpush3.bf16.msra.mxu0 %v8483_v56  ;;  %8454 = vmatprep.subr.bf16.mxu1 %v8453_v15  ;;  %v8469_v56 = vpack.c.bf16 %v11692_v55, %v11691_v14  ;;  %v8501_v15 = vpack.c.bf16 %v11694_v47, %v11693_v35  ;;  %v11725_v14 = vld [vmem:[#allocation292_spill] sm:$0xff]  ;;  %v11726_v55 = vld [vmem:[#allocation293_spill] sm:$0xff] }
0x35a4   :  { %8486 = vmatprep.subr.bf16.mxu0 %v8485_v17  ;;  %v11695_v17 = vld [vmem:[#allocation188_spill] sm:$0xff]  ;;  %v11728_v47 = vld [vmem:[#allocation245_spill] sm:$0xff] }
0x35a5   :  { %v8471_v54 = vpack.c.bf16 %v11696_v42, %v11695_v17  ;;  %v11727_v35 = vld [vmem:[#allocation244_spill] sm:$0xff]  ;;  %v8551_v17 = vpack.c.bf16 %v11730_v30, %v11729_v60  ;;  %v11731_v42 = vld [vmem:[#allocation262_spill] sm:$0xff] }
0x35a6   :  { %8456 = vmatpush3.bf16.msra.mxu1 %v8455_v61  ;;  %v11697_v61 = vld [vmem:[#allocation220_spill] sm:$0xff] }
0x35a7   :  { %8488 = vmatpush3.bf16.msra.mxu0 %v8487_v18  ;;  %8458 = vmatprep.subr.bf16.mxu1 %v8457_v19  ;;  %v8503_v46 = vpack.c.bf16 %v11698_v41, %v11697_v61  ;;  %v11699_v18 = vld [vmem:[#allocation254_spill] sm:$0xff] }
0x35a8   :  { %8490 = vmatprep.subr.bf16.mxu0 %v8489_v7  ;;  %v8505_v4 = vpack.c.bf16 %v11700_v0, %v11699_v18  ;;  %v11701_v19 = vld [vmem:[#allocation286_spill] sm:$0xff]  ;;  %v8507_v7 = vpack.c.bf16 %v11704_v6, %v11703_v63  ;;  %v11740_v63 = vld [vmem:[#allocation265_spill] sm:$0xff] }
0x35a9   :  { %v8537_v24 = vpack.c.bf16 %v11702_v5, %v11701_v19  ;;  %v11733_v41 = vld [vmem:[#allocation294_spill] sm:$0xff]  ;;  %v8525_v6 = vpack.c.bf16 %v11740_v63, %v11739_v25 }
0x35aa   :  { %8460 = vmatpush3.bf16.msra.mxu1 %v8459_v11  ;;  %v11706_v11 = vld [vmem:[#allocation271_spill] sm:$0xff]  ;;  %v11735_v0 = vld [vmem:[#allocation246_spill] sm:$0xff] }
0x35ab   :  { %8492 = vmatpush3.bf16.msra.mxu0 %v8491_v22  ;;  %8462 = vmatprep.subr.bf16.mxu1 %v8461_v58  ;;  %v8539_v20 = vpack.c.bf16 %v11706_v11, %v11705_v31  ;;  %v11707_v22 = vld [vmem:[#allocation256_spill] sm:$0xff]  ;;  %v11710_v58 = vld [vmem:[#allocation289_spill] sm:$0xff]  ;;  %v11737_v5 = vld [vmem:[#allocation278_spill] sm:$0xff] }
0x35ac   :  { %8494 = vmatprep.subr.bf16.mxu0 %v8493_v27  ;;  %v8509_v8 = vpack.c.bf16 %v11708_v23, %v11707_v22  ;;  %v8541_v10 = vpack.c.bf16 %v11710_v58, %v11709_v16  ;;  %v11712_v27 = vld [vmem:[#allocation241_spill] sm:$0xff]  ;;  %v11743_v11 = vld [vmem:[#allocation248_spill] sm:$0xff]  ;;  %v11748_v16 = vld [vmem:[#allocation267_spill] sm:$0xff] }
0x35ad   :  { %v8511_v38 = vpack.c.bf16 %v11712_v27, %v11711_v36  ;;  %v11745_v22 = vld [vmem:[#allocation280_spill] sm:$0xff]  ;;  %v11746_v23 = vld [vmem:[#allocation281_spill] sm:$0xff]  ;;  %v11751_v27 = vld [vmem:[#allocation250_spill] sm:$0xff] }
0x35ae   :  { %8464 = vmatpush3.bf16.msra.mxu1 %v8463_v32  ;;  %v11714_v32 = vld [vmem:[#allocation273_spill] sm:$0xff] }
0x35af   :  { %8496 = vmatpush3.bf16.msra.mxu0 %v8495_v49  ;;  %8466 = vmatprep.subr.bf16.mxu1 %v8465_v53  ;;  %v8543_v37 = vpack.c.bf16 %v11714_v32, %v11713_v39  ;;  %v8513_v49 = vpack.c.bf16 %v11716_v34, %v11715_v33  ;;  %v8545_v53 = vpack.c.bf16 %v11718_v29, %v11717_v59  ;;  %v11753_v32 = vld [vmem:[#allocation282_spill] sm:$0xff]  ;;  %v11755_v34 = vld [vmem:[#allocation268_spill] sm:$0xff] }
0x35b0   :  { %8498 = vmatprep.subr.bf16.mxu0 %v8497_v52  ;;  %v8515_v52 = vpack.c.bf16 %v11720_v57, %v11719_v43  ;;  %v11757_v29 = vld [vmem:[#allocation300_spill] sm:$0xff] }
0x35b1   :  { %v11759_v57 = vld [vmem:[#allocation252_spill] sm:$0xff] }
0x35b2   :  { %8468 = vmatpush3.bf16.msra.mxu1 %v8467_v62  ;;  %v8547_v62 = vpack.c.bf16 %v11722_v13, %v11721_v44  ;;  %v11762_v13 = vld [vmem:[#allocation284_spill] sm:$0xff] }
0x35b3   :  { %8500 = vmatpush3.bf16.msra.mxu0 %v8499_v12  ;;  %8470 = vmatprep.subr.bf16.mxu1 %v8469_v56  ;;  %v8517_v12 = vpack.c.bf16 %v11724_v50, %v11723_v28  ;;  %v8549_v56 = vpack.c.bf16 %v11726_v55, %v11725_v14  ;;  %v6046_v50 = vmax.f32 %v10959_v1, 0.0 }
0x35b4   :  { %8502 = vmatprep.subr.bf16.mxu0 %v8501_v15  ;;  %v8519_v15 = vpack.c.bf16 %v11728_v47, %v11727_v35 }
0x35b6   :  { %8472 = vmatpush3.bf16.msra.mxu1 %v8471_v54  ;;  %v11732_v54 = vld [vmem:[#allocation263_spill] sm:$0xff] }
0x35b7   :  { %8504 = vmatpush3.bf16.msra.mxu0 %v8503_v46  ;;  %8506 = vmatprep.subr.bf16.mxu1 %v8505_v4  ;;  %v8521_v61 = vpack.c.bf16 %v11732_v54, %v11731_v42  ;;  %v11734_v46 = vld [vmem:[#allocation295_spill] sm:$0xff] }
0x35b8   :  { %8538 = vmatprep.subr.bf16.mxu0 %v8537_v24  ;;  %v8553_v18 = vpack.c.bf16 %v11734_v46, %v11733_v41  ;;  %v11736_v4 = vld [vmem:[#allocation247_spill] sm:$0xff] }
0x35b9   :  { %6658 = vmatmul.mubr.f32.vlgmr.msra.gmra.mrb[54].mxu1 %v6042_v9  ;;  %v8523_v19 = vpack.c.bf16 %v11736_v4, %v11735_v0  ;;  %v11738_v24 = vld [vmem:[#allocation279_spill] sm:$0xff]  ;;  %v11742_v9 = vld [vmem:[#allocation297_spill] sm:$0xff] }
0x35ba   :  { %6728 = vmatmul.mubr.f32.vlgmr.msra.gmra.mrb[54].mxu0 %v6044_v21  ;;  %8508 = vmatpush3.bf16.msra.mxu1 %v8507_v7  ;;  %v8555_v51 = vpack.c.bf16 %v11738_v24, %v11737_v5  ;;  %v11741_v7 = vld [vmem:[#allocation296_spill] sm:$0xff] }
0x35bb   :  { %6797 = vmatprep.mubr.f32.mxu1 %v6047_v3  ;;  %8540 = vmatpush3.bf16.msra.mxu0 %v8539_v20  ;;  %v8557_v31 = vpack.c.bf16 %v11742_v9, %v11741_v7  ;;  %v11744_v20 = vld [vmem:[#allocation249_spill] sm:$0xff]  ;;  %v11747_v3 = vld [vmem:[#allocation266_spill] sm:$0xff] }
0x35bc   :  { %6867 = vmatprep.mubr.f32.mxu0 %v6049_v26  ;;  %8510 = vmatprep.subr.bf16.mxu1 %v8509_v8  ;;  %v8527_v21 = vpack.c.bf16 %v11744_v20, %v11743_v11  ;;  %v8559_v8 = vpack.c.bf16 %v11746_v23, %v11745_v22  ;;  %v8529_v58 = vpack.c.bf16 %v11748_v16, %v11747_v3  ;;  %v11750_v26 = vld [vmem:[#allocation299_spill] sm:$0xff] }
0x35bd   :  { %8542 = vmatprep.subr.bf16.mxu0 %v8541_v10  ;;  %v11749_v10 = vld [vmem:[#allocation298_spill] sm:$0xff] }
0x35be   :  { %8512 = vmatpush3.bf16.msra.mxu1 %v8511_v38  ;;  %v8561_v36 = vpack.c.bf16 %v11750_v26, %v11749_v10  ;;  %v11752_v38 = vld [vmem:[#allocation251_spill] sm:$0xff] }
0x35bf   :  { %8544 = vmatpush3.bf16.msra.mxu0 %v8543_v37  ;;  %8514 = vmatprep.subr.bf16.mxu1 %v8513_v49  ;;  %v8531_v39 = vpack.c.bf16 %v11752_v38, %v11751_v27  ;;  %v11754_v37 = vld [vmem:[#allocation283_spill] sm:$0xff]  ;;  %v11756_v49 = vld [vmem:[#allocation269_spill] sm:$0xff] }
0x35c0   :  { %8546 = vmatprep.subr.bf16.mxu0 %v8545_v53  ;;  %v8563_v33 = vpack.c.bf16 %v11754_v37, %v11753_v32  ;;  %v8533_v59 = vpack.c.bf16 %v11756_v49, %v11755_v34  ;;  %v11758_v53 = vld [vmem:[#allocation301_spill] sm:$0xff]  ;;  %v6922_v37 = vld [vmem:[%s11766_s1 + $0x8] sm:$0xff]  ;;  %v6923_v34 = vld [vmem:[%s11766_s1 + $0x10] sm:$0xff] }
0x35c1   :  { %v8565_v43 = vpack.c.bf16 %v11758_v53, %v11757_v29  ;;  %v6921_v32 = vld [vmem:[%s11766_s1] sm:$0xff] }
0x35c2   :  { %8516 = vmatpush3.bf16.msra.mxu1 %v8515_v52  ;;  %v11760_v52 = vld [vmem:[#allocation253_spill] sm:$0xff] }
0x35c3   :  { %8548 = vmatpush3.bf16.msra.mxu0 %v8547_v62  ;;  %8518 = vmatprep.subr.bf16.mxu1 %v8517_v12  ;;  %v8535_v44 = vpack.c.bf16 %v11760_v52, %v11759_v57  ;;  %v11763_v62 = vld [vmem:[#allocation285_spill] sm:$0xff]  ;;  %v6048_v12 = vmax.f32 %v10961_v2, 0.0 }
0x35c4   :  { %8550 = vmatprep.subr.bf16.mxu0 %v8549_v56  ;;  %v8567_v28 = vpack.c.bf16 %v11763_v62, %v11762_v13  ;;  %v7268_v56 = vld [vmem:[%s11761_s23] ss:$0 sm:$0xff] }
0x35c5   :  { %v7008_v53 = vld [vmem:[%s9128_s19] sm:$0xff] }
0x35c6   :  { %8520 = vmatpush3.bf16.msra.mxu1 %v8519_v15 }
0x35c7   :  { %8552 = vmatpush3.bf16.msra.mxu0 %v8551_v17  ;;  %8522 = vmatprep.subr.bf16.mxu1 %v8521_v61 }
0x35c8   :  { %8554 = vmatprep.subr.bf16.mxu0 %v8553_v18 }
0x35ca   :  { %8524 = vmatpush3.bf16.msra.mxu1 %v8523_v19 }
0x35cb   :  { %8556 = vmatpush3.bf16.msra.mxu0 %v8555_v51  ;;  %8526 = vmatprep.subr.bf16.mxu1 %v8525_v6 }
0x35cc   :  { %8558 = vmatprep.subr.bf16.mxu0 %v8557_v31 }
0x35ce   :  { %8528 = vmatpush3.bf16.msra.mxu1 %v8527_v21 }
0x35cf   :  { %8560 = vmatpush3.bf16.msra.mxu0 %v8559_v8  ;;  %8530 = vmatprep.subr.bf16.mxu1 %v8529_v58  ;;  %v7269_v58 = vld [vmem:[%s11764_s26] ss:$0 sm:$0xff] }
0x35d0   :  { %8562 = vmatprep.subr.bf16.mxu0 %v8561_v36 }
0x35d2   :  { %8532 = vmatpush3.bf16.msra.mxu1 %v8531_v39  ;;  %v7270_v39 = vld [vmem:[%s11765_s28] ss:$0 sm:$0xff] }
0x35d3   :  { %8564 = vmatpush3.bf16.msra.mxu0 %v8563_v33  ;;  %8534 = vmatprep.subr.bf16.mxu1 %v8533_v59  ;;  %v8570_v33 = vpack.c.bf16 %v6922_v37, %v6921_v32 }
0x35d4   :  { %8566 = vmatprep.subr.bf16.mxu0 %v8565_v43  ;;  %v7009_v43 = vld [vmem:[%s9128_s19 + $0x8] sm:$0xff] }
0x35d5   :  { %v8573_v57 = vpack.c.bf16 %v7009_v43, %v7008_v53 }
0x35d6   :  { %8536 = vmatpush3.bf16.msra.mxu1 %v8535_v44 }
0x35d7   :  { %8568 = vmatpush3.bf16.msra.mxu0 %v8567_v28  ;;  %8569 = vmatprep.subr.bf16.mxu1 %v11476_v40 }
0x35d8   :  { %8572 = vmatprep.subr.bf16.mxu0 %v11476_v40 }
0x35d9   :  { %6798 = vmatmul.mubr.f32.vlgmr.msra.gmra.mrb[56].mxu1 %v6046_v50 }
0x35da   :  { %6868 = vmatmul.mubr.f32.vlgmr.msra.gmra.mrb[56].mxu0 %v6048_v12  ;;  %8137 = vmatprep.mubr.msk.f32.mxu1 %vm8950_vm1, %v11475_v48 }
0x35db   :  { %8146 = vmatprep.mubr.msk.f32.mxu0 %vm8950_vm1, %v11475_v48  ;;  %vm6883_vm1 = vcmask 195590   ;;  %8571 = vmatpush3.bf16.msra.mxu1 %v8570_v33 }
0x35dc   :  { %8135 = vmatprep.subr.mxu1 %v11475_v48  ;;  %8574 = vmatpush3.bf16.msra.mxu0 %v8573_v57 }
0x35dd   :  { %8144 = vmatprep.subr.mxu0 %v11475_v48  ;;  %v7273_v48 = vld [vmem:[%s9133_s12] ss:$0 sm:$0xff] }
0x35df   :  { %8136 = vmatpush3.msra.mxu1 %v6923_v34 }
0x364c   :  { %v7487_v14 = vpop.f32.mrb[50].mxu1  ;;  %v7522_v55 = vpop.f32.mrb[50].mxu0 }
0x364d   :  { %v7488_v35 = vpop.f32.mrb[51].mxu1  ;;  %v7523_v1 = vpop.f32.mrb[51].mxu0 }
0x364e   :  { %v7489_v47 = vadd.f32 %v7488_v35, %v7487_v14  ;;  %v7524_v15 = vadd.f32 %v7523_v1, %v7522_v55  ;;  %v7010_v55 = vld [vmem:[%s9128_s19 + $0x10] sm:$0xff] }
0x364f   :  { %8145 = vmatpush3.msra.mxu0 %v7010_v55 }
0x3650   :  { %v6380_v60 = vadd.f32 %v7489_v47, %v7268_v56  ;;  %v7271_v56 = vld [vmem:[%s9123_s27] ss:$0 sm:$0xff] }
0x3652   :  { %v6450_v30 = vadd.f32 %v7524_v15, %v6380_v60 }
0x366c   :  { %v7557_v2 = vpop.f32.mrb[52].mxu1 }
0x366d   :  { %v7592_v17 = vpop.f32.mrb[52].mxu0  ;;  %v7558_v40 = vpop.f32.mrb[53].mxu1 }
0x366e   :  { %v7559_v42 = vadd.f32 %v7558_v40, %v7557_v2  ;;  %v7593_v54 = vpop.f32.mrb[53].mxu0 }
0x366f   :  { %v7594_v61 = vadd.f32 %v7593_v54, %v7592_v17 }
0x3670   :  { %v6520_v41 = vadd.f32 %v7559_v42, %v6450_v30 }
0x3672   :  { %v6590_v46 = vadd.f32 %v7594_v61, %v6520_v41 }
0x368c   :  { %v7627_v18 = vpop.f32.mrb[54].mxu1 }
0x368d   :  { %v7662_v0 = vpop.f32.mrb[54].mxu0  ;;  %v7628_v4 = vpop.f32.mrb[55].mxu1 }
0x368e   :  { %v7629_v19 = vadd.f32 %v7628_v4, %v7627_v18  ;;  %v7663_v5 = vpop.f32.mrb[55].mxu0 }
0x368f   :  { %v7664_v24 = vadd.f32 %v7663_v5, %v7662_v0 }
0x3690   :  { %v6660_v51 = vadd.f32 %v7629_v19, %v6590_v46 }
0x3692   :  { %v6730_v25 = vadd.f32 %v7664_v24, %v6660_v51 }
0x36ac   :  { %v7697_v63 = vpop.f32.mrb[56].mxu1 }
0x36ad   :  { %v7732_v6 = vpop.f32.mrb[56].mxu0  ;;  %v7698_v7 = vpop.f32.mrb[57].mxu1 }
0x36ae   :  { %v7699_v9 = vadd.f32 %v7698_v7, %v7697_v63  ;;  %v7733_v31 = vpop.f32.mrb[57].mxu0 }
0x36af   :  { %v7734_v11 = vadd.f32 %v7733_v31, %v7732_v6 }
0x36b0   :  { %v6800_v20 = vadd.f32 %v7699_v9, %v6730_v25 }
0x36b2   :  { %v6870_v21 = vadd.f32 %v7734_v11, %v6800_v20 }
0x36b4   :  { %v6874_v22 = vrot.slane %v6870_v21, 2 }
0x36b6   :  { %6875 = vrot.lane.b32.xlu0 %v6874_v22, %s8952_s5 }
0x3728   :  { %v6876_v23 = vpop.permute.xlu0 %6875 }
0x3729   :  { %v6878_v8 = vadd.f32 %v6876_v23, %v10747_v45 }
0x372b   :  { %6880 = vrot.lane.b32.xlu1 %v6878_v8, %s8952_s5 }
0x379d   :  { %v6881_v3 = vpop.permute.xlu1 %6880 }
0x379e   :  { %v6884_v16 = vsel %vm6883_vm1, %v6881_v3, 0.0 }
0x379f   :  { %6885 = vadd.xlane.f32.xlu1 %v6884_v16 }
0x37b0   :  { %6907 = vrot.lane.b32.xlu1 %v7269_v58, %s8952_s5 }
0x382c   :  { %v6886_v10 = vpop.xlane.xlu1 %6885 }
0x382d   :  { %v6887_v26 = vmul.f32 0.041666668, %v6886_v10 }
0x382f   :  { %v6888_v36 = vsub.f32 %v6878_v8, %v6887_v26 }
0x3830   :  { %v6908_v44 = vpop.permute.xlu1 %6907 }
0x3831   :  { %v6889_v27 = vmul.f32 %v6888_v36, %v6888_v36 }
0x3833   :  { %6891 = vrot.lane.b32.xlu0 %v6889_v27, %s8952_s5 }
0x38a5   :  { %v6892_v45 = vpop.permute.xlu0 %6891 }
0x38a6   :  { %v6894_v38 = vsel %vm6883_vm1, %v6892_v45, 0.0 }
0x38a7   :  { %6895 = vadd.xlane.f32.xlu0 %v6894_v38 }
0x38bd   :  { %6917 = vrot.lane.b32.xlu0 %v7270_v39, %s8952_s5 }
0x3934   :  { %v6896_v49 = vpop.xlane.xlu0 %6895 }
0x3935   :  { %v6897_v59 = vmul.f32 0.041666668, %v6896_v49 }
0x3937   :  { %v6898_v29 = vadd.f32 1e-05, %v6897_v59 }
0x3938   :  { %v6918_v62 = vpop.permute.xlu0 %6917 }
0x3939   :  { %8883 = vrsqrt.f32 %v6898_v29 }
0x3943   :  { %v8884_v52 = vpop.eup %8883 }
0x3944   :  { %v6900_v13 = vmul.f32 %v8884_v52, %v6888_v36 }
0x3946   :  { %v6910_v28 = vmul.f32 %v6908_v44, %v6900_v13 }
0x3948   :  { %v6920_v50 = vadd.f32 %v6918_v62, %v6910_v28 }
0x394a   :  { %v6932_v12 = vrot.slane %v6920_v50, 6 }
0x394c   :  { %6933 = vrot.lane.b32.xlu1 %v6932_v12, %s8952_s5 }
0x39be   :  { %v6934_v14 = vpop.permute.xlu1 %6933 }
0x39bf   :  { %8138 = vmatmul.mubr.msk.f32.vlgmr.msra.gmra.mrb[58].mxu1 %vm844_vm0, %v6934_v14 }
0x3a92   :  { %v7003_v35 = vpop.f32.mrb[58].mxu1 }
0x3a93   :  { %v7004_v1 = vadd.f32 %v7271_v56, %v7003_v35  ;;  %v8139_v47 = vpop.f32.mrb[59].mxu1 }
0x3a95   :  { %v7007_v15 = vmax.f32 %v7004_v1, 0.0 }
0x3a97   :  { %8147 = vmatmul.mubr.msk.f32.vlgmr.msra.gmra.mrb[58].mxu0 %vm844_vm0, %v7007_v15 }
0x3b6a   :  { %v7087_v60 = vpop.f32.mrb[58].mxu0 }
0x3b6b   :  { %v7088_v30 = vadd.f32 %v7273_v48, %v7087_v60  ;;  %v8148_v2 = vpop.f32.mrb[59].mxu0 }
0x3b6d   :  { %7092 = vst.msk [vmem:[#allocation5] sm:$0x3] %vm7091_vm5, %v7088_v30 }
0x3b6e   :  { %8896 = shalt.err (!%p8893_p4)
}
0x3b6f   :  { %s8897_s19 = scalar_lea.hbm %s9138_s6, 32 }
0x3b70   :  { %p8898_p5 = scmp.ne.s32.totalorder %s9138_s6, %s8897_s19  ;;  %p8901_p6 = scmp.lt.u32.totalorder %s8897_s19, %s9138_s6 }
0x3b72   :  { %p8903_p7 = pnand %p8901_p6, %p8898_p5 }
0x3b74   :  { %8906 = shalt.err (!%p8903_p7)
}
0x3b75   :  { %7102 = dma.vmem_to_hbm [thread:$0]  %s7100_s7, 32, %s9138_s6, [#allocation6]  }
0x3b76   :  { %8911 = dma.done.wait [#allocation6], 32  }
0x3b77   :  { %8912 = vsyncadd [#allocation6], 4294967264 }
0x3b78   :  { %7106 = vsyncpa [#allocation6], 1 }
0x3b79   :  { %7107 = vsyncmov [#allocation4] }
0x3b7c   :  { %s7108_s12 = vpop.sfrf %7107 }
0x3b7d   :  { %p7275_p8 = scmp.ne.s32.totalorder %s7108_s12, 0 }
0x3b7f   :  { %7112 = shalt.err (%p7275_p8)  }
0x3b80   :  { %7114 = vsyncmov [#allocation4 + $0x1] }
0x3b83   :  { %s7115_s27 = vpop.sfrf %7114 }
0x3b84   :  { %p7276_p9 = scmp.ne.s32.totalorder %s7115_s27, 0 }
0x3b86   :  { %7119 = shalt.err (%p7276_p9)  }

</bundles_post_ra>
